<compile_context>
chip_gen: v5e
topology: v5e:2x2
jax: 0.10.0
libtpu: 0.0.40
codegen_flags: <defaults>
</compile_context>

<pallas_src>
import functools

import numpy as np
import jax
import jax.numpy as jnp
from jax import lax
from jax.experimental import pallas as pl
from jax.experimental.pallas import tpu as pltpu


# ----------------------------------------------------------------------------
# Fused Conv(3x3, pad=1) + bias + ReLU + MaxPool(2x2) kernel.
#
# Wrapper-side layout: the zero-padded NHWC image is split into its 4 spatial
# parity planes  plane[2p+q][r, c, :] = x_pad[2r+p, 2c+q, :]  and each plane is
# flattened to (Lp, C_in).  With that layout the input needed for pool-window
# position (a, b) and conv tap (dy, dx) is a *contiguous* flat slice of one
# plane (offset = static, length = L), so the kernel body is 4 matmuls + maxes.
# ----------------------------------------------------------------------------
def _conv_relu_pool_kernel(x_ref, w_ref, b_ref, o_ref, *, Wpc, L):
    """x_ref: (1, 4, Lp, C_in) bf16 parity planes of the zero-padded image
       w_ref: (9*C_in, C_out)  bf16 conv taps, K index = (dy*3 + dx)*C_in + ci
       b_ref: (1, C_out)       f32 bias
       o_ref: (1, L, C_out)    bf16 pooled output; row m = io*Wpc + jo
                               (the jo == Wpc-1 column is junk, trimmed in glue)
    """
    pooled = None
    for a in range(2):                       # pool-window row position
        for b in range(2):                   # pool-window col position
            taps = []
            for dy in range(3):
                for dx in range(3):
                    qr = a + dy + 1          # padded row = 2*io + qr
                    qc = b + dx              # padded col = 2*jo + qc
                    plane = (qr % 2) * 2 + (qc % 2)
                    shift = (qr // 2) * Wpc + (qc // 2)   # static Python int
                    taps.append(x_ref[0, plane, pl.ds(shift, L), :])
            # Fused-tap im2col patch: one K = 9*C_in MXU matmul per (a, b).
            patch = jnp.concatenate(taps, axis=-1)               # (L, 9*C_in)
            y = jnp.dot(patch, w_ref[...],
                        preferred_element_type=jnp.float32)      # (L, C_out) f32
            pooled = y if pooled is None else jnp.maximum(pooled, y)  # VPU pool
    # bias + ReLU commute with the max (bias is per-channel, ReLU monotone).
    pooled = jnp.maximum(pooled + b_ref[...], 0.0)
    o_ref[0] = pooled.astype(o_ref.dtype)


def conv3x3_relu_pool(x_nhwc, w_oihw, bias):
    """x_nhwc: (N, H, W, C_in) ; w_oihw: (C_out, C_in, 3, 3) ; bias: (C_out,)
       returns pooled activation (N, H//2, W//2, C_out) in bf16."""
    N, H, W, C_in = x_nhwc.shape
    C_out = w_oihw.shape[0]
    Ho, Wo = H // 2, W // 2
    Wpc = Wo + 1                 # parity-plane width (last output column is junk)
    Hp = Ho + 3                  # parity-plane height (covers the +-1 tap reach)
    Lp = Hp * Wpc                # flattened plane length
    L = Ho * Wpc                 # output rows emitted by the kernel

    # --- plain-JAX glue: pad, split into parity planes, prep weights ---------
    xb = x_nhwc.astype(jnp.bfloat16)
    xp = jnp.pad(xb, ((0, 0), (2, 4), (1, 1), (0, 0)))           # (N, H+6, W+2, C_in)
    planes = jnp.stack([xp[:, p::2, q::2, :] for p in (0, 1) for q in (0, 1)],
                       axis=1)                                   # (N, 4, Hp, Wpc, C_in)
    planes = planes.reshape(N, 4, Lp, C_in)

    wmat = jnp.transpose(w_oihw, (2, 3, 1, 0)).reshape(9 * C_in, C_out)
    wmat = wmat.astype(jnp.bfloat16)
    b2 = bias.reshape(1, C_out).astype(jnp.float32)

    kernel = functools.partial(_conv_relu_pool_kernel, Wpc=Wpc, L=L)
    out = pl.pallas_call(
        kernel,
        out_shape=jax.ShapeDtypeStruct((N, L, C_out), jnp.bfloat16),
        grid_spec=pltpu.PrefetchScalarGridSpec(
            num_scalar_prefetch=0,
            grid=(N,),
            in_specs=[
                pl.BlockSpec((1, 4, Lp, C_in), lambda n: (n, 0, 0, 0)),
                pl.BlockSpec((9 * C_in, C_out), lambda n: (0, 0)),
                pl.BlockSpec((1, C_out), lambda n: (0, 0)),
            ],
            out_specs=pl.BlockSpec((1, L, C_out), lambda n: (n, 0, 0)),
        ),
        compiler_params=pltpu.CompilerParams(dimension_semantics=("parallel",)),
    )(planes, wmat, b2)

    # Drop the junk column and restore NHWC.
    return out.reshape(N, Ho, Wpc, C_out)[:, :, :Wo, :]


# ----------------------------------------------------------------------------
# MLP head: fc1 (K-tiled, f32 VMEM accumulator) + ReLU + fc2 in one kernel.
# ----------------------------------------------------------------------------
def _mlp_kernel(x_ref, w1_ref, b1_ref, w2_ref, b2_ref, o_ref, acc_ref):
    k = pl.program_id(0)

    @pl.when(k == 0)
    def _():
        acc_ref[...] = jnp.zeros_like(acc_ref)

    acc_ref[...] += jnp.dot(x_ref[...], w1_ref[...],
                            preferred_element_type=jnp.float32)

    @pl.when(k == pl.num_programs(0) - 1)
    def _():
        h = jnp.maximum(acc_ref[...] + b1_ref[...], 0.0).astype(jnp.bfloat16)
        o_ref[...] = (jnp.dot(h, w2_ref[...], preferred_element_type=jnp.float32)
                      + b2_ref[...]).astype(o_ref.dtype)


def mlp_head(x, w1, b1, w2, b2, *, block_k=256):
    """x: (N, K) ; w1: (H1, K) ; b1: (H1,) ; w2: (NC, H1) ; b2: (NC,)"""
    N, K = x.shape
    H1 = w1.shape[0]
    NC = w2.shape[0]
    tk = block_k if K % block_k == 0 else K       # fall back to one K block

    xb = x.astype(jnp.bfloat16)
    w1t = w1.T.astype(jnp.bfloat16)               # (K, H1)
    w2t = w2.T.astype(jnp.bfloat16)               # (H1, NC)

    return pl.pallas_call(
        _mlp_kernel,
        out_shape=jax.ShapeDtypeStruct((N, NC), jnp.float32),
        grid_spec=pltpu.PrefetchScalarGridSpec(
            num_scalar_prefetch=0,
            grid=(K // tk,),
            in_specs=[
                pl.BlockSpec((N, tk), lambda k: (0, k)),
                pl.BlockSpec((tk, H1), lambda k: (k, 0)),
                pl.BlockSpec((1, H1), lambda k: (0, 0)),
                pl.BlockSpec((H1, NC), lambda k: (0, 0)),
                pl.BlockSpec((1, NC), lambda k: (0, 0)),
            ],
            out_specs=pl.BlockSpec((N, NC), lambda k: (0, 0)),
            scratch_shapes=[pltpu.VMEM((N, H1), jnp.float32)],
        ),
        compiler_params=pltpu.CompilerParams(dimension_semantics=("arbitrary",)),
    )(xb, w1t, b1.reshape(1, H1).astype(jnp.float32),
      w2t, b2.reshape(1, NC).astype(jnp.float32))


# ----------------------------------------------------------------------------
# Full forward pass (glue = transposes / padding / parity split only)
# ----------------------------------------------------------------------------
def simple_cnn_forward(x_nchw, p):
    x = jnp.transpose(x_nchw, (0, 2, 3, 1))                      # NCHW -> NHWC
    x = conv3x3_relu_pool(x, p["conv1_w"], p["conv1_b"])         # (N, H/2, W/2, 16)
    x = conv3x3_relu_pool(x, p["conv2_w"], p["conv2_b"])         # (N, H/4, W/4, 32)
    # nn.Flatten on NCHW flattens in (C, H, W) order -> transpose back first.
    N, Ho, Wo, C = x.shape
    x = jnp.transpose(x, (0, 3, 1, 2)).reshape(N, C * Ho * Wo)
    return mlp_head(x, p["fc1_w"], p["fc1_b"], p["fc2_w"], p["fc2_b"])


def init_params(key, H, W, num_classes=3):
    ks = jax.random.split(key, 8)
    K = 32 * (H // 4) * (W // 4)
    return {
        "conv1_w": jax.random.normal(ks[0], (16, 3, 3, 3), jnp.float32) * 0.1,
        "conv1_b": jax.random.normal(ks[1], (16,), jnp.float32) * 0.1,
        "conv2_w": jax.random.normal(ks[2], (32, 16, 3, 3), jnp.float32) * 0.05,
        "conv2_b": jax.random.normal(ks[3], (32,), jnp.float32) * 0.05,
        "fc1_w": jax.random.normal(ks[4], (128, K), jnp.float32) * 0.02,
        "fc1_b": jax.random.normal(ks[5], (128,), jnp.float32) * 0.02,
        "fc2_w": jax.random.normal(ks[6], (num_classes, 128), jnp.float32) * 0.05,
        "fc2_b": jax.random.normal(ks[7], (num_classes,), jnp.float32) * 0.05,
    }


# ----------------------------------------------------------------------------
# Pure-JAX reference (same bf16-input / f32-accumulate quantization points as
# the kernel path, so the comparison checks the kernel structure exactly).
# ----------------------------------------------------------------------------
def reference_forward(x_nchw, p):
    def conv_block(y, w, b):
        dn = lax.conv_dimension_numbers(y.shape, w.shape, ("NCHW", "OIHW", "NCHW"))
        z = lax.conv_general_dilated(y.astype(jnp.bfloat16), w.astype(jnp.bfloat16),
                                     (1, 1), ((1, 1), (1, 1)),
                                     dimension_numbers=dn,
                                     preferred_element_type=jnp.float32)
        z = jax.nn.relu(z + b[None, :, None, None])
        z = lax.reduce_window(z, -jnp.inf, lax.max,
                              (1, 1, 2, 2), (1, 1, 2, 2), "VALID")
        return z.astype(jnp.bfloat16).astype(jnp.float32)
    y = conv_block(x_nchw, p["conv1_w"], p["conv1_b"])
    y = conv_block(y, p["conv2_w"], p["conv2_b"])
    y = y.reshape(y.shape[0], -1)
    h = jax.nn.relu(jnp.dot(y.astype(jnp.bfloat16), p["fc1_w"].T.astype(jnp.bfloat16),
                            preferred_element_type=jnp.float32) + p["fc1_b"])
    return jnp.dot(h.astype(jnp.bfloat16), p["fc2_w"].T.astype(jnp.bfloat16),
                   preferred_element_type=jnp.float32) + p["fc2_b"]


if __name__ == "__main__":
    key = jax.random.PRNGKey(0)
    kx, kp = jax.random.split(key)
    N, H, W = 2, 16, 16
    x = jax.random.normal(kx, (N, 3, H, W), jnp.float32)        # PyTorch NCHW input
    params = init_params(kp, H, W, num_classes=3)

    out = jax.block_until_ready(jax.jit(simple_cnn_forward)(x, params))
    ref = jax.block_until_ready(jax.jit(reference_forward)(x, params))

    assert out.shape == (N, 3), out.shape
    np.testing.assert_allclose(np.asarray(out, np.float32), np.asarray(ref, np.float32),
                               rtol=5e-2, atol=5e-3)
    print("KERNEL_OK")
</pallas_src>

<mosaic_0001>
module attributes {stable_mosaic.version = 11 : i64} {
  func.func @_conv_relu_pool_kernel(%arg0: i32, %arg1: memref<1x4x99x3xbf16, #tpu.memory_space<vmem>>, %arg2: memref<27x16xbf16, #tpu.memory_space<vmem>>, %arg3: memref<1x16xf32, #tpu.memory_space<vmem>>, %arg4: memref<1x72x16xbf16, #tpu.memory_space<vmem>>) attributes {dimension_semantics = [#tpu.dimension_semantics<parallel>], iteration_bounds = array<i64: 2>, scalar_prefetch = 0 : i64, scratch_operands = 0 : i64, tpu.core_type = #tpu.core_type<tc>, window_params = [{transform_indices = @transform_0, window_bounds = array<i64: 1, 4, 99, 3>}, {pipeline_mode = #tpu.pipeline_mode<synchronous>, transform_indices = @transform_1, window_bounds = array<i64: 27, 16>}, {pipeline_mode = #tpu.pipeline_mode<synchronous>, transform_indices = @transform_2, window_bounds = array<i64: 1, 16>}, {transform_indices = @transform_3, window_bounds = array<i64: 1, 72, 16>}]} {
    %c0 = arith.constant 0 : index
    %c2 = arith.constant 2 : index
    %c0_0 = arith.constant 0 : index
    %c0_1 = arith.constant 0 : index
    %0 = vector.load %arg1[%c0, %c2, %c0_0, %c0_1] : memref<1x4x99x3xbf16, #tpu.memory_space<vmem>>, vector<1x1x72x3xbf16>
    %1 = vector.shape_cast %0 : vector<1x1x72x3xbf16> to vector<72x3xbf16>
    %c0_2 = arith.constant 0 : index
    %c3 = arith.constant 3 : index
    %c0_3 = arith.constant 0 : index
    %c0_4 = arith.constant 0 : index
    %2 = vector.load %arg1[%c0_2, %c3, %c0_3, %c0_4] : memref<1x4x99x3xbf16, #tpu.memory_space<vmem>>, vector<1x1x72x3xbf16>
    %3 = vector.shape_cast %2 : vector<1x1x72x3xbf16> to vector<72x3xbf16>
    %c0_5 = arith.constant 0 : index
    %c2_6 = arith.constant 2 : index
    %c1 = arith.constant 1 : index
    %c0_7 = arith.constant 0 : index
    %4 = vector.load %arg1[%c0_5, %c2_6, %c1, %c0_7] : memref<1x4x99x3xbf16, #tpu.memory_space<vmem>>, vector<1x1x72x3xbf16>
    %5 = vector.shape_cast %4 : vector<1x1x72x3xbf16> to vector<72x3xbf16>
    %c0_8 = arith.constant 0 : index
    %c0_9 = arith.constant 0 : index
    %c9 = arith.constant 9 : index
    %c0_10 = arith.constant 0 : index
    %6 = vector.load %arg1[%c0_8, %c0_9, %c9, %c0_10] : memref<1x4x99x3xbf16, #tpu.memory_space<vmem>>, vector<1x1x72x3xbf16>
    %7 = vector.shape_cast %6 : vector<1x1x72x3xbf16> to vector<72x3xbf16>
    %c0_11 = arith.constant 0 : index
    %c1_12 = arith.constant 1 : index
    %c9_13 = arith.constant 9 : index
    %c0_14 = arith.constant 0 : index
    %8 = vector.load %arg1[%c0_11, %c1_12, %c9_13, %c0_14] : memref<1x4x99x3xbf16, #tpu.memory_space<vmem>>, vector<1x1x72x3xbf16>
    %9 = vector.shape_cast %8 : vector<1x1x72x3xbf16> to vector<72x3xbf16>
    %c0_15 = arith.constant 0 : index
    %c0_16 = arith.constant 0 : index
    %c10 = arith.constant 10 : index
    %c0_17 = arith.constant 0 : index
    %10 = vector.load %arg1[%c0_15, %c0_16, %c10, %c0_17] : memref<1x4x99x3xbf16, #tpu.memory_space<vmem>>, vector<1x1x72x3xbf16>
    %11 = vector.shape_cast %10 : vector<1x1x72x3xbf16> to vector<72x3xbf16>
    %c0_18 = arith.constant 0 : index
    %c2_19 = arith.constant 2 : index
    %c9_20 = arith.constant 9 : index
    %c0_21 = arith.constant 0 : index
    %12 = vector.load %arg1[%c0_18, %c2_19, %c9_20, %c0_21] : memref<1x4x99x3xbf16, #tpu.memory_space<vmem>>, vector<1x1x72x3xbf16>
    %13 = vector.shape_cast %12 : vector<1x1x72x3xbf16> to vector<72x3xbf16>
    %c0_22 = arith.constant 0 : index
    %c3_23 = arith.constant 3 : index
    %c9_24 = arith.constant 9 : index
    %c0_25 = arith.constant 0 : index
    %14 = vector.load %arg1[%c0_22, %c3_23, %c9_24, %c0_25] : memref<1x4x99x3xbf16, #tpu.memory_space<vmem>>, vector<1x1x72x3xbf16>
    %15 = vector.shape_cast %14 : vector<1x1x72x3xbf16> to vector<72x3xbf16>
    %c0_26 = arith.constant 0 : index
    %c2_27 = arith.constant 2 : index
    %c10_28 = arith.constant 10 : index
    %c0_29 = arith.constant 0 : index
    %16 = vector.load %arg1[%c0_26, %c2_27, %c10_28, %c0_29] : memref<1x4x99x3xbf16, #tpu.memory_space<vmem>>, vector<1x1x72x3xbf16>
    %17 = vector.shape_cast %16 : vector<1x1x72x3xbf16> to vector<72x3xbf16>
    %18 = tpu.concatenate %1, %3, %5, %7, %9, %11, %13, %15, %17 in 1 : vector<72x3xbf16>, vector<72x3xbf16>, vector<72x3xbf16>, vector<72x3xbf16>, vector<72x3xbf16>, vector<72x3xbf16>, vector<72x3xbf16>, vector<72x3xbf16>, vector<72x3xbf16> -> vector<72x27xbf16>
    %c0_30 = arith.constant 0 : index
    %c0_31 = arith.constant 0 : index
    %19 = vector.load %arg2[%c0_30, %c0_31] : memref<27x16xbf16, #tpu.memory_space<vmem>>, vector<27x16xbf16>
    %cst = arith.constant dense<0.000000e+00> : vector<72x16xf32>
    %20 = tpu.matmul %18, %19, %cst {dimension_numbers = #tpu.dot_dimension_numbers<[1], [0], [0], [1], [0, 0, 1, 1], [], []>} : vector<72x27xbf16>, vector<27x16xbf16>, vector<72x16xf32> -> vector<72x16xf32>
    %c0_32 = arith.constant 0 : index
    %c3_33 = arith.constant 3 : index
    %c0_34 = arith.constant 0 : index
    %c0_35 = arith.constant 0 : index
    %21 = vector.load %arg1[%c0_32, %c3_33, %c0_34, %c0_35] : memref<1x4x99x3xbf16, #tpu.memory_space<vmem>>, vector<1x1x72x3xbf16>
    %22 = vector.shape_cast %21 : vector<1x1x72x3xbf16> to vector<72x3xbf16>
    %c0_36 = arith.constant 0 : index
    %c2_37 = arith.constant 2 : index
    %c1_38 = arith.constant 1 : index
    %c0_39 = arith.constant 0 : index
    %23 = vector.load %arg1[%c0_36, %c2_37, %c1_38, %c0_39] : memref<1x4x99x3xbf16, #tpu.memory_space<vmem>>, vector<1x1x72x3xbf16>
    %24 = vector.shape_cast %23 : vector<1x1x72x3xbf16> to vector<72x3xbf16>
    %c0_40 = arith.constant 0 : index
    %c3_41 = arith.constant 3 : index
    %c1_42 = arith.constant 1 : index
    %c0_43 = arith.constant 0 : index
    %25 = vector.load %arg1[%c0_40, %c3_41, %c1_42, %c0_43] : memref<1x4x99x3xbf16, #tpu.memory_space<vmem>>, vector<1x1x72x3xbf16>
    %26 = vector.shape_cast %25 : vector<1x1x72x3xbf16> to vector<72x3xbf16>
    %c0_44 = arith.constant 0 : index
    %c1_45 = arith.constant 1 : index
    %c9_46 = arith.constant 9 : index
    %c0_47 = arith.constant 0 : index
    %27 = vector.load %arg1[%c0_44, %c1_45, %c9_46, %c0_47] : memref<1x4x99x3xbf16, #tpu.memory_space<vmem>>, vector<1x1x72x3xbf16>
    %28 = vector.shape_cast %27 : vector<1x1x72x3xbf16> to vector<72x3xbf16>
    %c0_48 = arith.constant 0 : index
    %c0_49 = arith.constant 0 : index
    %c10_50 = arith.constant 10 : index
    %c0_51 = arith.constant 0 : index
    %29 = vector.load %arg1[%c0_48, %c0_49, %c10_50, %c0_51] : memref<1x4x99x3xbf16, #tpu.memory_space<vmem>>, vector<1x1x72x3xbf16>
    %30 = vector.shape_cast %29 : vector<1x1x72x3xbf16> to vector<72x3xbf16>
    %c0_52 = arith.constant 0 : index
    %c1_53 = arith.constant 1 : index
    %c10_54 = arith.constant 10 : index
    %c0_55 = arith.constant 0 : index
    %31 = vector.load %arg1[%c0_52, %c1_53, %c10_54, %c0_55] : memref<1x4x99x3xbf16, #tpu.memory_space<vmem>>, vector<1x1x72x3xbf16>
    %32 = vector.shape_cast %31 : vector<1x1x72x3xbf16> to vector<72x3xbf16>
    %c0_56 = arith.constant 0 : index
    %c3_57 = arith.constant 3 : index
    %c9_58 = arith.constant 9 : index
    %c0_59 = arith.constant 0 : index
    %33 = vector.load %arg1[%c0_56, %c3_57, %c9_58, %c0_59] : memref<1x4x99x3xbf16, #tpu.memory_space<vmem>>, vector<1x1x72x3xbf16>
    %34 = vector.shape_cast %33 : vector<1x1x72x3xbf16> to vector<72x3xbf16>
    %c0_60 = arith.constant 0 : index
    %c2_61 = arith.constant 2 : index
    %c10_62 = arith.constant 10 : index
    %c0_63 = arith.constant 0 : index
    %35 = vector.load %arg1[%c0_60, %c2_61, %c10_62, %c0_63] : memref<1x4x99x3xbf16, #tpu.memory_space<vmem>>, vector<1x1x72x3xbf16>
    %36 = vector.shape_cast %35 : vector<1x1x72x3xbf16> to vector<72x3xbf16>
    %c0_64 = arith.constant 0 : index
    %c3_65 = arith.constant 3 : index
    %c10_66 = arith.constant 10 : index
    %c0_67 = arith.constant 0 : index
    %37 = vector.load %arg1[%c0_64, %c3_65, %c10_66, %c0_67] : memref<1x4x99x3xbf16, #tpu.memory_space<vmem>>, vector<1x1x72x3xbf16>
    %38 = vector.shape_cast %37 : vector<1x1x72x3xbf16> to vector<72x3xbf16>
    %39 = tpu.concatenate %22, %24, %26, %28, %30, %32, %34, %36, %38 in 1 : vector<72x3xbf16>, vector<72x3xbf16>, vector<72x3xbf16>, vector<72x3xbf16>, vector<72x3xbf16>, vector<72x3xbf16>, vector<72x3xbf16>, vector<72x3xbf16>, vector<72x3xbf16> -> vector<72x27xbf16>
    %c0_68 = arith.constant 0 : index
    %c0_69 = arith.constant 0 : index
    %40 = vector.load %arg2[%c0_68, %c0_69] : memref<27x16xbf16, #tpu.memory_space<vmem>>, vector<27x16xbf16>
    %cst_70 = arith.constant dense<0.000000e+00> : vector<72x16xf32>
    %41 = tpu.matmul %39, %40, %cst_70 {dimension_numbers = #tpu.dot_dimension_numbers<[1], [0], [0], [1], [0, 0, 1, 1], [], []>} : vector<72x27xbf16>, vector<27x16xbf16>, vector<72x16xf32> -> vector<72x16xf32>
    %42 = arith.maximumf %20, %41 : vector<72x16xf32>
    %c0_71 = arith.constant 0 : index
    %c0_72 = arith.constant 0 : index
    %c9_73 = arith.constant 9 : index
    %c0_74 = arith.constant 0 : index
    %43 = vector.load %arg1[%c0_71, %c0_72, %c9_73, %c0_74] : memref<1x4x99x3xbf16, #tpu.memory_space<vmem>>, vector<1x1x72x3xbf16>
    %44 = vector.shape_cast %43 : vector<1x1x72x3xbf16> to vector<72x3xbf16>
    %c0_75 = arith.constant 0 : index
    %c1_76 = arith.constant 1 : index
    %c9_77 = arith.constant 9 : index
    %c0_78 = arith.constant 0 : index
    %45 = vector.load %arg1[%c0_75, %c1_76, %c9_77, %c0_78] : memref<1x4x99x3xbf16, #tpu.memory_space<vmem>>, vector<1x1x72x3xbf16>
    %46 = vector.shape_cast %45 : vector<1x1x72x3xbf16> to vector<72x3xbf16>
    %c0_79 = arith.constant 0 : index
    %c0_80 = arith.constant 0 : index
    %c10_81 = arith.constant 10 : index
    %c0_82 = arith.constant 0 : index
    %47 = vector.load %arg1[%c0_79, %c0_80, %c10_81, %c0_82] : memref<1x4x99x3xbf16, #tpu.memory_space<vmem>>, vector<1x1x72x3xbf16>
    %48 = vector.shape_cast %47 : vector<1x1x72x3xbf16> to vector<72x3xbf16>
    %c0_83 = arith.constant 0 : index
    %c2_84 = arith.constant 2 : index
    %c9_85 = arith.constant 9 : index
    %c0_86 = arith.constant 0 : index
    %49 = vector.load %arg1[%c0_83, %c2_84, %c9_85, %c0_86] : memref<1x4x99x3xbf16, #tpu.memory_space<vmem>>, vector<1x1x72x3xbf16>
    %50 = vector.shape_cast %49 : vector<1x1x72x3xbf16> to vector<72x3xbf16>
    %c0_87 = arith.constant 0 : index
    %c3_88 = arith.constant 3 : index
    %c9_89 = arith.constant 9 : index
    %c0_90 = arith.constant 0 : index
    %51 = vector.load %arg1[%c0_87, %c3_88, %c9_89, %c0_90] : memref<1x4x99x3xbf16, #tpu.memory_space<vmem>>, vector<1x1x72x3xbf16>
    %52 = vector.shape_cast %51 : vector<1x1x72x3xbf16> to vector<72x3xbf16>
    %c0_91 = arith.constant 0 : index
    %c2_92 = arith.constant 2 : index
    %c10_93 = arith.constant 10 : index
    %c0_94 = arith.constant 0 : index
    %53 = vector.load %arg1[%c0_91, %c2_92, %c10_93, %c0_94] : memref<1x4x99x3xbf16, #tpu.memory_space<vmem>>, vector<1x1x72x3xbf16>
    %54 = vector.shape_cast %53 : vector<1x1x72x3xbf16> to vector<72x3xbf16>
    %c0_95 = arith.constant 0 : index
    %c0_96 = arith.constant 0 : index
    %c18 = arith.constant 18 : index
    %c0_97 = arith.constant 0 : index
    %55 = vector.load %arg1[%c0_95, %c0_96, %c18, %c0_97] : memref<1x4x99x3xbf16, #tpu.memory_space<vmem>>, vector<1x1x72x3xbf16>
    %56 = vector.shape_cast %55 : vector<1x1x72x3xbf16> to vector<72x3xbf16>
    %c0_98 = arith.constant 0 : index
    %c1_99 = arith.constant 1 : index
    %c18_100 = arith.constant 18 : index
    %c0_101 = arith.constant 0 : index
    %57 = vector.load %arg1[%c0_98, %c1_99, %c18_100, %c0_101] : memref<1x4x99x3xbf16, #tpu.memory_space<vmem>>, vector<1x1x72x3xbf16>
    %58 = vector.shape_cast %57 : vector<1x1x72x3xbf16> to vector<72x3xbf16>
    %c0_102 = arith.constant 0 : index
    %c0_103 = arith.constant 0 : index
    %c19 = arith.constant 19 : index
    %c0_104 = arith.constant 0 : index
    %59 = vector.load %arg1[%c0_102, %c0_103, %c19, %c0_104] : memref<1x4x99x3xbf16, #tpu.memory_space<vmem>>, vector<1x1x72x3xbf16>
    %60 = vector.shape_cast %59 : vector<1x1x72x3xbf16> to vector<72x3xbf16>
    %61 = tpu.concatenate %44, %46, %48, %50, %52, %54, %56, %58, %60 in 1 : vector<72x3xbf16>, vector<72x3xbf16>, vector<72x3xbf16>, vector<72x3xbf16>, vector<72x3xbf16>, vector<72x3xbf16>, vector<72x3xbf16>, vector<72x3xbf16>, vector<72x3xbf16> -> vector<72x27xbf16>
    %c0_105 = arith.constant 0 : index
    %c0_106 = arith.constant 0 : index
    %62 = vector.load %arg2[%c0_105, %c0_106] : memref<27x16xbf16, #tpu.memory_space<vmem>>, vector<27x16xbf16>
    %cst_107 = arith.constant dense<0.000000e+00> : vector<72x16xf32>
    %63 = tpu.matmul %61, %62, %cst_107 {dimension_numbers = #tpu.dot_dimension_numbers<[1], [0], [0], [1], [0, 0, 1, 1], [], []>} : vector<72x27xbf16>, vector<27x16xbf16>, vector<72x16xf32> -> vector<72x16xf32>
    %64 = arith.maximumf %42, %63 : vector<72x16xf32>
    %c0_108 = arith.constant 0 : index
    %c1_109 = arith.constant 1 : index
    %c9_110 = arith.constant 9 : index
    %c0_111 = arith.constant 0 : index
    %65 = vector.load %arg1[%c0_108, %c1_109, %c9_110, %c0_111] : memref<1x4x99x3xbf16, #tpu.memory_space<vmem>>, vector<1x1x72x3xbf16>
    %66 = vector.shape_cast %65 : vector<1x1x72x3xbf16> to vector<72x3xbf16>
    %c0_112 = arith.constant 0 : index
    %c0_113 = arith.constant 0 : index
    %c10_114 = arith.constant 10 : index
    %c0_115 = arith.constant 0 : index
    %67 = vector.load %arg1[%c0_112, %c0_113, %c10_114, %c0_115] : memref<1x4x99x3xbf16, #tpu.memory_space<vmem>>, vector<1x1x72x3xbf16>
    %68 = vector.shape_cast %67 : vector<1x1x72x3xbf16> to vector<72x3xbf16>
    %c0_116 = arith.constant 0 : index
    %c1_117 = arith.constant 1 : index
    %c10_118 = arith.constant 10 : index
    %c0_119 = arith.constant 0 : index
    %69 = vector.load %arg1[%c0_116, %c1_117, %c10_118, %c0_119] : memref<1x4x99x3xbf16, #tpu.memory_space<vmem>>, vector<1x1x72x3xbf16>
    %70 = vector.shape_cast %69 : vector<1x1x72x3xbf16> to vector<72x3xbf16>
    %c0_120 = arith.constant 0 : index
    %c3_121 = arith.constant 3 : index
    %c9_122 = arith.constant 9 : index
    %c0_123 = arith.constant 0 : index
    %71 = vector.load %arg1[%c0_120, %c3_121, %c9_122, %c0_123] : memref<1x4x99x3xbf16, #tpu.memory_space<vmem>>, vector<1x1x72x3xbf16>
    %72 = vector.shape_cast %71 : vector<1x1x72x3xbf16> to vector<72x3xbf16>
    %c0_124 = arith.constant 0 : index
    %c2_125 = arith.constant 2 : index
    %c10_126 = arith.constant 10 : index
    %c0_127 = arith.constant 0 : index
    %73 = vector.load %arg1[%c0_124, %c2_125, %c10_126, %c0_127] : memref<1x4x99x3xbf16, #tpu.memory_space<vmem>>, vector<1x1x72x3xbf16>
    %74 = vector.shape_cast %73 : vector<1x1x72x3xbf16> to vector<72x3xbf16>
    %c0_128 = arith.constant 0 : index
    %c3_129 = arith.constant 3 : index
    %c10_130 = arith.constant 10 : index
    %c0_131 = arith.constant 0 : index
    %75 = vector.load %arg1[%c0_128, %c3_129, %c10_130, %c0_131] : memref<1x4x99x3xbf16, #tpu.memory_space<vmem>>, vector<1x1x72x3xbf16>
    %76 = vector.shape_cast %75 : vector<1x1x72x3xbf16> to vector<72x3xbf16>
    %c0_132 = arith.constant 0 : index
    %c1_133 = arith.constant 1 : index
    %c18_134 = arith.constant 18 : index
    %c0_135 = arith.constant 0 : index
    %77 = vector.load %arg1[%c0_132, %c1_133, %c18_134, %c0_135] : memref<1x4x99x3xbf16, #tpu.memory_space<vmem>>, vector<1x1x72x3xbf16>
    %78 = vector.shape_cast %77 : vector<1x1x72x3xbf16> to vector<72x3xbf16>
    %c0_136 = arith.constant 0 : index
    %c0_137 = arith.constant 0 : index
    %c19_138 = arith.constant 19 : index
    %c0_139 = arith.constant 0 : index
    %79 = vector.load %arg1[%c0_136, %c0_137, %c19_138, %c0_139] : memref<1x4x99x3xbf16, #tpu.memory_space<vmem>>, vector<1x1x72x3xbf16>
    %80 = vector.shape_cast %79 : vector<1x1x72x3xbf16> to vector<72x3xbf16>
    %c0_140 = arith.constant 0 : index
    %c1_141 = arith.constant 1 : index
    %c19_142 = arith.constant 19 : index
    %c0_143 = arith.constant 0 : index
    %81 = vector.load %arg1[%c0_140, %c1_141, %c19_142, %c0_143] : memref<1x4x99x3xbf16, #tpu.memory_space<vmem>>, vector<1x1x72x3xbf16>
    %82 = vector.shape_cast %81 : vector<1x1x72x3xbf16> to vector<72x3xbf16>
    %83 = tpu.concatenate %66, %68, %70, %72, %74, %76, %78, %80, %82 in 1 : vector<72x3xbf16>, vector<72x3xbf16>, vector<72x3xbf16>, vector<72x3xbf16>, vector<72x3xbf16>, vector<72x3xbf16>, vector<72x3xbf16>, vector<72x3xbf16>, vector<72x3xbf16> -> vector<72x27xbf16>
    %c0_144 = arith.constant 0 : index
    %c0_145 = arith.constant 0 : index
    %84 = vector.load %arg2[%c0_144, %c0_145] : memref<27x16xbf16, #tpu.memory_space<vmem>>, vector<27x16xbf16>
    %cst_146 = arith.constant dense<0.000000e+00> : vector<72x16xf32>
    %85 = tpu.matmul %83, %84, %cst_146 {dimension_numbers = #tpu.dot_dimension_numbers<[1], [0], [0], [1], [0, 0, 1, 1], [], []>} : vector<72x27xbf16>, vector<27x16xbf16>, vector<72x16xf32> -> vector<72x16xf32>
    %86 = arith.maximumf %64, %85 : vector<72x16xf32>
    %c0_147 = arith.constant 0 : index
    %c0_148 = arith.constant 0 : index
    %87 = vector.load %arg3[%c0_147, %c0_148] : memref<1x16xf32, #tpu.memory_space<vmem>>, vector<1x16xf32>
    %88 = vector.broadcast %87 : vector<1x16xf32> to vector<72x16xf32>
    %89 = arith.addf %86, %88 : vector<72x16xf32>
    %cst_149 = arith.constant 0.000000e+00 : f32
    %90 = vector.broadcast %cst_149 : f32 to vector<72x16xf32>
    %91 = arith.maximumf %89, %90 : vector<72x16xf32>
    %92 = arith.truncf %91 : vector<72x16xf32> to vector<72x16xbf16>
    %c0_150 = arith.constant 0 : index
    %c0_151 = arith.constant 0 : index
    %c0_152 = arith.constant 0 : index
    %93 = vector.load %arg4[%c0_150, %c0_151, %c0_152] : memref<1x72x16xbf16, #tpu.memory_space<vmem>>, vector<1x72x16xbf16>
    %94 = vector.shape_cast %93 : vector<1x72x16xbf16> to vector<72x16xbf16>
    %95 = vector.shape_cast %92 : vector<72x16xbf16> to vector<1x72x16xbf16>
    tpu.vector_store %arg4[%c0_150, %c0_151, %c0_152], %95 {strides = array<i32>} : memref<1x72x16xbf16, #tpu.memory_space<vmem>>, vector<1x72x16xbf16>,
    return
  }
  func.func @transform_0(%arg0: i32) -> (i32, i32, i32, i32) {
    %c0_i32 = arith.constant 0 : i32
    %c0_i32_0 = arith.constant 0 : i32
    %c0_i32_1 = arith.constant 0 : i32
    %c0_i32_2 = arith.constant 0 : i32
    return %arg0, %c0_i32, %c0_i32_0, %c0_i32_1 : i32, i32, i32, i32
  }
  func.func @transform_1(%arg0: i32) -> (i32, i32) {
    %c0_i32 = arith.constant 0 : i32
    %c0_i32_0 = arith.constant 0 : i32
    %c0_i32_1 = arith.constant 0 : i32
    return %c0_i32, %c0_i32_0 : i32, i32
  }
  func.func @transform_2(%arg0: i32) -> (i32, i32) {
    %c0_i32 = arith.constant 0 : i32
    %c0_i32_0 = arith.constant 0 : i32
    %c0_i32_1 = arith.constant 0 : i32
    return %c0_i32, %c0_i32_0 : i32, i32
  }
  func.func @transform_3(%arg0: i32) -> (i32, i32, i32) {
    %c0_i32 = arith.constant 0 : i32
    %c0_i32_0 = arith.constant 0 : i32
    %c0_i32_1 = arith.constant 0 : i32
    return %arg0, %c0_i32, %c0_i32_0 : i32, i32, i32
  }
}

module attributes {stable_mosaic.version = 11 : i64} {
  func.func @_conv_relu_pool_kernel(%arg0: i32, %arg1: memref<1x4x35x16xbf16, #tpu.memory_space<vmem>>, %arg2: memref<144x32xbf16, #tpu.memory_space<vmem>>, %arg3: memref<1x32xf32, #tpu.memory_space<vmem>>, %arg4: memref<1x20x32xbf16, #tpu.memory_space<vmem>>) attributes {dimension_semantics = [#tpu.dimension_semantics<parallel>], iteration_bounds = array<i64: 2>, scalar_prefetch = 0 : i64, scratch_operands = 0 : i64, tpu.core_type = #tpu.core_type<tc>, window_params = [{transform_indices = @transform_0, window_bounds = array<i64: 1, 4, 35, 16>}, {pipeline_mode = #tpu.pipeline_mode<synchronous>, transform_indices = @transform_1, window_bounds = array<i64: 144, 32>}, {pipeline_mode = #tpu.pipeline_mode<synchronous>, transform_indices = @transform_2, window_bounds = array<i64: 1, 32>}, {transform_indices = @transform_3, window_bounds = array<i64: 1, 20, 32>}]} {
    %c0 = arith.constant 0 : index
    %c2 = arith.constant 2 : index
    %c0_0 = arith.constant 0 : index
    %c0_1 = arith.constant 0 : index
    %0 = vector.load %arg1[%c0, %c2, %c0_0, %c0_1] : memref<1x4x35x16xbf16, #tpu.memory_space<vmem>>, vector<1x1x20x16xbf16>
    %1 = vector.shape_cast %0 : vector<1x1x20x16xbf16> to vector<20x16xbf16>
    %c0_2 = arith.constant 0 : index
    %c3 = arith.constant 3 : index
    %c0_3 = arith.constant 0 : index
    %c0_4 = arith.constant 0 : index
    %2 = vector.load %arg1[%c0_2, %c3, %c0_3, %c0_4] : memref<1x4x35x16xbf16, #tpu.memory_space<vmem>>, vector<1x1x20x16xbf16>
    %3 = vector.shape_cast %2 : vector<1x1x20x16xbf16> to vector<20x16xbf16>
    %c0_5 = arith.constant 0 : index
    %c2_6 = arith.constant 2 : index
    %c1 = arith.constant 1 : index
    %c0_7 = arith.constant 0 : index
    %4 = vector.load %arg1[%c0_5, %c2_6, %c1, %c0_7] : memref<1x4x35x16xbf16, #tpu.memory_space<vmem>>, vector<1x1x20x16xbf16>
    %5 = vector.shape_cast %4 : vector<1x1x20x16xbf16> to vector<20x16xbf16>
    %c0_8 = arith.constant 0 : index
    %c0_9 = arith.constant 0 : index
    %c5 = arith.constant 5 : index
    %c0_10 = arith.constant 0 : index
    %6 = vector.load %arg1[%c0_8, %c0_9, %c5, %c0_10] : memref<1x4x35x16xbf16, #tpu.memory_space<vmem>>, vector<1x1x20x16xbf16>
    %7 = vector.shape_cast %6 : vector<1x1x20x16xbf16> to vector<20x16xbf16>
    %c0_11 = arith.constant 0 : index
    %c1_12 = arith.constant 1 : index
    %c5_13 = arith.constant 5 : index
    %c0_14 = arith.constant 0 : index
    %8 = vector.load %arg1[%c0_11, %c1_12, %c5_13, %c0_14] : memref<1x4x35x16xbf16, #tpu.memory_space<vmem>>, vector<1x1x20x16xbf16>
    %9 = vector.shape_cast %8 : vector<1x1x20x16xbf16> to vector<20x16xbf16>
    %c0_15 = arith.constant 0 : index
    %c0_16 = arith.constant 0 : index
    %c6 = arith.constant 6 : index
    %c0_17 = arith.constant 0 : index
    %10 = vector.load %arg1[%c0_15, %c0_16, %c6, %c0_17] : memref<1x4x35x16xbf16, #tpu.memory_space<vmem>>, vector<1x1x20x16xbf16>
    %11 = vector.shape_cast %10 : vector<1x1x20x16xbf16> to vector<20x16xbf16>
    %c0_18 = arith.constant 0 : index
    %c2_19 = arith.constant 2 : index
    %c5_20 = arith.constant 5 : index
    %c0_21 = arith.constant 0 : index
    %12 = vector.load %arg1[%c0_18, %c2_19, %c5_20, %c0_21] : memref<1x4x35x16xbf16, #tpu.memory_space<vmem>>, vector<1x1x20x16xbf16>
    %13 = vector.shape_cast %12 : vector<1x1x20x16xbf16> to vector<20x16xbf16>
    %c0_22 = arith.constant 0 : index
    %c3_23 = arith.constant 3 : index
    %c5_24 = arith.constant 5 : index
    %c0_25 = arith.constant 0 : index
    %14 = vector.load %arg1[%c0_22, %c3_23, %c5_24, %c0_25] : memref<1x4x35x16xbf16, #tpu.memory_space<vmem>>, vector<1x1x20x16xbf16>
    %15 = vector.shape_cast %14 : vector<1x1x20x16xbf16> to vector<20x16xbf16>
    %c0_26 = arith.constant 0 : index
    %c2_27 = arith.constant 2 : index
    %c6_28 = arith.constant 6 : index
    %c0_29 = arith.constant 0 : index
    %16 = vector.load %arg1[%c0_26, %c2_27, %c6_28, %c0_29] : memref<1x4x35x16xbf16, #tpu.memory_space<vmem>>, vector<1x1x20x16xbf16>
    %17 = vector.shape_cast %16 : vector<1x1x20x16xbf16> to vector<20x16xbf16>
    %18 = tpu.concatenate %1, %3, %5, %7, %9, %11, %13, %15, %17 in 1 : vector<20x16xbf16>, vector<20x16xbf16>, vector<20x16xbf16>, vector<20x16xbf16>, vector<20x16xbf16>, vector<20x16xbf16>, vector<20x16xbf16>, vector<20x16xbf16>, vector<20x16xbf16> -> vector<20x144xbf16>
    %c0_30 = arith.constant 0 : index
    %c0_31 = arith.constant 0 : index
    %19 = vector.load %arg2[%c0_30, %c0_31] : memref<144x32xbf16, #tpu.memory_space<vmem>>, vector<144x32xbf16>
    %cst = arith.constant dense<0.000000e+00> : vector<20x32xf32>
    %20 = tpu.matmul %18, %19, %cst {dimension_numbers = #tpu.dot_dimension_numbers<[1], [0], [0], [1], [0, 0, 1, 1], [], []>} : vector<20x144xbf16>, vector<144x32xbf16>, vector<20x32xf32> -> vector<20x32xf32>
    %c0_32 = arith.constant 0 : index
    %c3_33 = arith.constant 3 : index
    %c0_34 = arith.constant 0 : index
    %c0_35 = arith.constant 0 : index
    %21 = vector.load %arg1[%c0_32, %c3_33, %c0_34, %c0_35] : memref<1x4x35x16xbf16, #tpu.memory_space<vmem>>, vector<1x1x20x16xbf16>
    %22 = vector.shape_cast %21 : vector<1x1x20x16xbf16> to vector<20x16xbf16>
    %c0_36 = arith.constant 0 : index
    %c2_37 = arith.constant 2 : index
    %c1_38 = arith.constant 1 : index
    %c0_39 = arith.constant 0 : index
    %23 = vector.load %arg1[%c0_36, %c2_37, %c1_38, %c0_39] : memref<1x4x35x16xbf16, #tpu.memory_space<vmem>>, vector<1x1x20x16xbf16>
    %24 = vector.shape_cast %23 : vector<1x1x20x16xbf16> to vector<20x16xbf16>
    %c0_40 = arith.constant 0 : index
    %c3_41 = arith.constant 3 : index
    %c1_42 = arith.constant 1 : index
    %c0_43 = arith.constant 0 : index
    %25 = vector.load %arg1[%c0_40, %c3_41, %c1_42, %c0_43] : memref<1x4x35x16xbf16, #tpu.memory_space<vmem>>, vector<1x1x20x16xbf16>
    %26 = vector.shape_cast %25 : vector<1x1x20x16xbf16> to vector<20x16xbf16>
    %c0_44 = arith.constant 0 : index
    %c1_45 = arith.constant 1 : index
    %c5_46 = arith.constant 5 : index
    %c0_47 = arith.constant 0 : index
    %27 = vector.load %arg1[%c0_44, %c1_45, %c5_46, %c0_47] : memref<1x4x35x16xbf16, #tpu.memory_space<vmem>>, vector<1x1x20x16xbf16>
    %28 = vector.shape_cast %27 : vector<1x1x20x16xbf16> to vector<20x16xbf16>
    %c0_48 = arith.constant 0 : index
    %c0_49 = arith.constant 0 : index
    %c6_50 = arith.constant 6 : index
    %c0_51 = arith.constant 0 : index
    %29 = vector.load %arg1[%c0_48, %c0_49, %c6_50, %c0_51] : memref<1x4x35x16xbf16, #tpu.memory_space<vmem>>, vector<1x1x20x16xbf16>
    %30 = vector.shape_cast %29 : vector<1x1x20x16xbf16> to vector<20x16xbf16>
    %c0_52 = arith.constant 0 : index
    %c1_53 = arith.constant 1 : index
    %c6_54 = arith.constant 6 : index
    %c0_55 = arith.constant 0 : index
    %31 = vector.load %arg1[%c0_52, %c1_53, %c6_54, %c0_55] : memref<1x4x35x16xbf16, #tpu.memory_space<vmem>>, vector<1x1x20x16xbf16>
    %32 = vector.shape_cast %31 : vector<1x1x20x16xbf16> to vector<20x16xbf16>
    %c0_56 = arith.constant 0 : index
    %c3_57 = arith.constant 3 : index
    %c5_58 = arith.constant 5 : index
    %c0_59 = arith.constant 0 : index
    %33 = vector.load %arg1[%c0_56, %c3_57, %c5_58, %c0_59] : memref<1x4x35x16xbf16, #tpu.memory_space<vmem>>, vector<1x1x20x16xbf16>
    %34 = vector.shape_cast %33 : vector<1x1x20x16xbf16> to vector<20x16xbf16>
    %c0_60 = arith.constant 0 : index
    %c2_61 = arith.constant 2 : index
    %c6_62 = arith.constant 6 : index
    %c0_63 = arith.constant 0 : index
    %35 = vector.load %arg1[%c0_60, %c2_61, %c6_62, %c0_63] : memref<1x4x35x16xbf16, #tpu.memory_space<vmem>>, vector<1x1x20x16xbf16>
    %36 = vector.shape_cast %35 : vector<1x1x20x16xbf16> to vector<20x16xbf16>
    %c0_64 = arith.constant 0 : index
    %c3_65 = arith.constant 3 : index
    %c6_66 = arith.constant 6 : index
    %c0_67 = arith.constant 0 : index
    %37 = vector.load %arg1[%c0_64, %c3_65, %c6_66, %c0_67] : memref<1x4x35x16xbf16, #tpu.memory_space<vmem>>, vector<1x1x20x16xbf16>
    %38 = vector.shape_cast %37 : vector<1x1x20x16xbf16> to vector<20x16xbf16>
    %39 = tpu.concatenate %22, %24, %26, %28, %30, %32, %34, %36, %38 in 1 : vector<20x16xbf16>, vector<20x16xbf16>, vector<20x16xbf16>, vector<20x16xbf16>, vector<20x16xbf16>, vector<20x16xbf16>, vector<20x16xbf16>, vector<20x16xbf16>, vector<20x16xbf16> -> vector<20x144xbf16>
    %c0_68 = arith.constant 0 : index
    %c0_69 = arith.constant 0 : index
    %40 = vector.load %arg2[%c0_68, %c0_69] : memref<144x32xbf16, #tpu.memory_space<vmem>>, vector<144x32xbf16>
    %cst_70 = arith.constant dense<0.000000e+00> : vector<20x32xf32>
    %41 = tpu.matmul %39, %40, %cst_70 {dimension_numbers = #tpu.dot_dimension_numbers<[1], [0], [0], [1], [0, 0, 1, 1], [], []>} : vector<20x144xbf16>, vector<144x32xbf16>, vector<20x32xf32> -> vector<20x32xf32>
    %42 = arith.maximumf %20, %41 : vector<20x32xf32>
    %c0_71 = arith.constant 0 : index
    %c0_72 = arith.constant 0 : index
    %c5_73 = arith.constant 5 : index
    %c0_74 = arith.constant 0 : index
    %43 = vector.load %arg1[%c0_71, %c0_72, %c5_73, %c0_74] : memref<1x4x35x16xbf16, #tpu.memory_space<vmem>>, vector<1x1x20x16xbf16>
    %44 = vector.shape_cast %43 : vector<1x1x20x16xbf16> to vector<20x16xbf16>
    %c0_75 = arith.constant 0 : index
    %c1_76 = arith.constant 1 : index
    %c5_77 = arith.constant 5 : index
    %c0_78 = arith.constant 0 : index
    %45 = vector.load %arg1[%c0_75, %c1_76, %c5_77, %c0_78] : memref<1x4x35x16xbf16, #tpu.memory_space<vmem>>, vector<1x1x20x16xbf16>
    %46 = vector.shape_cast %45 : vector<1x1x20x16xbf16> to vector<20x16xbf16>
    %c0_79 = arith.constant 0 : index
    %c0_80 = arith.constant 0 : index
    %c6_81 = arith.constant 6 : index
    %c0_82 = arith.constant 0 : index
    %47 = vector.load %arg1[%c0_79, %c0_80, %c6_81, %c0_82] : memref<1x4x35x16xbf16, #tpu.memory_space<vmem>>, vector<1x1x20x16xbf16>
    %48 = vector.shape_cast %47 : vector<1x1x20x16xbf16> to vector<20x16xbf16>
    %c0_83 = arith.constant 0 : index
    %c2_84 = arith.constant 2 : index
    %c5_85 = arith.constant 5 : index
    %c0_86 = arith.constant 0 : index
    %49 = vector.load %arg1[%c0_83, %c2_84, %c5_85, %c0_86] : memref<1x4x35x16xbf16, #tpu.memory_space<vmem>>, vector<1x1x20x16xbf16>
    %50 = vector.shape_cast %49 : vector<1x1x20x16xbf16> to vector<20x16xbf16>
    %c0_87 = arith.constant 0 : index
    %c3_88 = arith.constant 3 : index
    %c5_89 = arith.constant 5 : index
    %c0_90 = arith.constant 0 : index
    %51 = vector.load %arg1[%c0_87, %c3_88, %c5_89, %c0_90] : memref<1x4x35x16xbf16, #tpu.memory_space<vmem>>, vector<1x1x20x16xbf16>
    %52 = vector.shape_cast %51 : vector<1x1x20x16xbf16> to vector<20x16xbf16>
    %c0_91 = arith.constant 0 : index
    %c2_92 = arith.constant 2 : index
    %c6_93 = arith.constant 6 : index
    %c0_94 = arith.constant 0 : index
    %53 = vector.load %arg1[%c0_91, %c2_92, %c6_93, %c0_94] : memref<1x4x35x16xbf16, #tpu.memory_space<vmem>>, vector<1x1x20x16xbf16>
    %54 = vector.shape_cast %53 : vector<1x1x20x16xbf16> to vector<20x16xbf16>
    %c0_95 = arith.constant 0 : index
    %c0_96 = arith.constant 0 : index
    %c10 = arith.constant 10 : index
    %c0_97 = arith.constant 0 : index
    %55 = vector.load %arg1[%c0_95, %c0_96, %c10, %c0_97] : memref<1x4x35x16xbf16, #tpu.memory_space<vmem>>, vector<1x1x20x16xbf16>
    %56 = vector.shape_cast %55 : vector<1x1x20x16xbf16> to vector<20x16xbf16>
    %c0_98 = arith.constant 0 : index
    %c1_99 = arith.constant 1 : index
    %c10_100 = arith.constant 10 : index
    %c0_101 = arith.constant 0 : index
    %57 = vector.load %arg1[%c0_98, %c1_99, %c10_100, %c0_101] : memref<1x4x35x16xbf16, #tpu.memory_space<vmem>>, vector<1x1x20x16xbf16>
    %58 = vector.shape_cast %57 : vector<1x1x20x16xbf16> to vector<20x16xbf16>
    %c0_102 = arith.constant 0 : index
    %c0_103 = arith.constant 0 : index
    %c11 = arith.constant 11 : index
    %c0_104 = arith.constant 0 : index
    %59 = vector.load %arg1[%c0_102, %c0_103, %c11, %c0_104] : memref<1x4x35x16xbf16, #tpu.memory_space<vmem>>, vector<1x1x20x16xbf16>
    %60 = vector.shape_cast %59 : vector<1x1x20x16xbf16> to vector<20x16xbf16>
    %61 = tpu.concatenate %44, %46, %48, %50, %52, %54, %56, %58, %60 in 1 : vector<20x16xbf16>, vector<20x16xbf16>, vector<20x16xbf16>, vector<20x16xbf16>, vector<20x16xbf16>, vector<20x16xbf16>, vector<20x16xbf16>, vector<20x16xbf16>, vector<20x16xbf16> -> vector<20x144xbf16>
    %c0_105 = arith.constant 0 : index
    %c0_106 = arith.constant 0 : index
    %62 = vector.load %arg2[%c0_105, %c0_106] : memref<144x32xbf16, #tpu.memory_space<vmem>>, vector<144x32xbf16>
    %cst_107 = arith.constant dense<0.000000e+00> : vector<20x32xf32>
    %63 = tpu.matmul %61, %62, %cst_107 {dimension_numbers = #tpu.dot_dimension_numbers<[1], [0], [0], [1], [0, 0, 1, 1], [], []>} : vector<20x144xbf16>, vector<144x32xbf16>, vector<20x32xf32> -> vector<20x32xf32>
    %64 = arith.maximumf %42, %63 : vector<20x32xf32>
    %c0_108 = arith.constant 0 : index
    %c1_109 = arith.constant 1 : index
    %c5_110 = arith.constant 5 : index
    %c0_111 = arith.constant 0 : index
    %65 = vector.load %arg1[%c0_108, %c1_109, %c5_110, %c0_111] : memref<1x4x35x16xbf16, #tpu.memory_space<vmem>>, vector<1x1x20x16xbf16>
    %66 = vector.shape_cast %65 : vector<1x1x20x16xbf16> to vector<20x16xbf16>
    %c0_112 = arith.constant 0 : index
    %c0_113 = arith.constant 0 : index
    %c6_114 = arith.constant 6 : index
    %c0_115 = arith.constant 0 : index
    %67 = vector.load %arg1[%c0_112, %c0_113, %c6_114, %c0_115] : memref<1x4x35x16xbf16, #tpu.memory_space<vmem>>, vector<1x1x20x16xbf16>
    %68 = vector.shape_cast %67 : vector<1x1x20x16xbf16> to vector<20x16xbf16>
    %c0_116 = arith.constant 0 : index
    %c1_117 = arith.constant 1 : index
    %c6_118 = arith.constant 6 : index
    %c0_119 = arith.constant 0 : index
    %69 = vector.load %arg1[%c0_116, %c1_117, %c6_118, %c0_119] : memref<1x4x35x16xbf16, #tpu.memory_space<vmem>>, vector<1x1x20x16xbf16>
    %70 = vector.shape_cast %69 : vector<1x1x20x16xbf16> to vector<20x16xbf16>
    %c0_120 = arith.constant 0 : index
    %c3_121 = arith.constant 3 : index
    %c5_122 = arith.constant 5 : index
    %c0_123 = arith.constant 0 : index
    %71 = vector.load %arg1[%c0_120, %c3_121, %c5_122, %c0_123] : memref<1x4x35x16xbf16, #tpu.memory_space<vmem>>, vector<1x1x20x16xbf16>
    %72 = vector.shape_cast %71 : vector<1x1x20x16xbf16> to vector<20x16xbf16>
    %c0_124 = arith.constant 0 : index
    %c2_125 = arith.constant 2 : index
    %c6_126 = arith.constant 6 : index
    %c0_127 = arith.constant 0 : index
    %73 = vector.load %arg1[%c0_124, %c2_125, %c6_126, %c0_127] : memref<1x4x35x16xbf16, #tpu.memory_space<vmem>>, vector<1x1x20x16xbf16>
    %74 = vector.shape_cast %73 : vector<1x1x20x16xbf16> to vector<20x16xbf16>
    %c0_128 = arith.constant 0 : index
    %c3_129 = arith.constant 3 : index
    %c6_130 = arith.constant 6 : index
    %c0_131 = arith.constant 0 : index
    %75 = vector.load %arg1[%c0_128, %c3_129, %c6_130, %c0_131] : memref<1x4x35x16xbf16, #tpu.memory_space<vmem>>, vector<1x1x20x16xbf16>
    %76 = vector.shape_cast %75 : vector<1x1x20x16xbf16> to vector<20x16xbf16>
    %c0_132 = arith.constant 0 : index
    %c1_133 = arith.constant 1 : index
    %c10_134 = arith.constant 10 : index
    %c0_135 = arith.constant 0 : index
    %77 = vector.load %arg1[%c0_132, %c1_133, %c10_134, %c0_135] : memref<1x4x35x16xbf16, #tpu.memory_space<vmem>>, vector<1x1x20x16xbf16>
    %78 = vector.shape_cast %77 : vector<1x1x20x16xbf16> to vector<20x16xbf16>
    %c0_136 = arith.constant 0 : index
    %c0_137 = arith.constant 0 : index
    %c11_138 = arith.constant 11 : index
    %c0_139 = arith.constant 0 : index
    %79 = vector.load %arg1[%c0_136, %c0_137, %c11_138, %c0_139] : memref<1x4x35x16xbf16, #tpu.memory_space<vmem>>, vector<1x1x20x16xbf16>
    %80 = vector.shape_cast %79 : vector<1x1x20x16xbf16> to vector<20x16xbf16>
    %c0_140 = arith.constant 0 : index
    %c1_141 = arith.constant 1 : index
    %c11_142 = arith.constant 11 : index
    %c0_143 = arith.constant 0 : index
    %81 = vector.load %arg1[%c0_140, %c1_141, %c11_142, %c0_143] : memref<1x4x35x16xbf16, #tpu.memory_space<vmem>>, vector<1x1x20x16xbf16>
    %82 = vector.shape_cast %81 : vector<1x1x20x16xbf16> to vector<20x16xbf16>
    %83 = tpu.concatenate %66, %68, %70, %72, %74, %76, %78, %80, %82 in 1 : vector<20x16xbf16>, vector<20x16xbf16>, vector<20x16xbf16>, vector<20x16xbf16>, vector<20x16xbf16>, vector<20x16xbf16>, vector<20x16xbf16>, vector<20x16xbf16>, vector<20x16xbf16> -> vector<20x144xbf16>
    %c0_144 = arith.constant 0 : index
    %c0_145 = arith.constant 0 : index
    %84 = vector.load %arg2[%c0_144, %c0_145] : memref<144x32xbf16, #tpu.memory_space<vmem>>, vector<144x32xbf16>
    %cst_146 = arith.constant dense<0.000000e+00> : vector<20x32xf32>
    %85 = tpu.matmul %83, %84, %cst_146 {dimension_numbers = #tpu.dot_dimension_numbers<[1], [0], [0], [1], [0, 0, 1, 1], [], []>} : vector<20x144xbf16>, vector<144x32xbf16>, vector<20x32xf32> -> vector<20x32xf32>
    %86 = arith.maximumf %64, %85 : vector<20x32xf32>
    %c0_147 = arith.constant 0 : index
    %c0_148 = arith.constant 0 : index
    %87 = vector.load %arg3[%c0_147, %c0_148] : memref<1x32xf32, #tpu.memory_space<vmem>>, vector<1x32xf32>
    %88 = vector.broadcast %87 : vector<1x32xf32> to vector<20x32xf32>
    %89 = arith.addf %86, %88 : vector<20x32xf32>
    %cst_149 = arith.constant 0.000000e+00 : f32
    %90 = vector.broadcast %cst_149 : f32 to vector<20x32xf32>
    %91 = arith.maximumf %89, %90 : vector<20x32xf32>
    %92 = arith.truncf %91 : vector<20x32xf32> to vector<20x32xbf16>
    %c0_150 = arith.constant 0 : index
    %c0_151 = arith.constant 0 : index
    %c0_152 = arith.constant 0 : index
    %93 = vector.load %arg4[%c0_150, %c0_151, %c0_152] : memref<1x20x32xbf16, #tpu.memory_space<vmem>>, vector<1x20x32xbf16>
    %94 = vector.shape_cast %93 : vector<1x20x32xbf16> to vector<20x32xbf16>
    %95 = vector.shape_cast %92 : vector<20x32xbf16> to vector<1x20x32xbf16>
    tpu.vector_store %arg4[%c0_150, %c0_151, %c0_152], %95 {strides = array<i32>} : memref<1x20x32xbf16, #tpu.memory_space<vmem>>, vector<1x20x32xbf16>,
    return
  }
  func.func @transform_0(%arg0: i32) -> (i32, i32, i32, i32) {
    %c0_i32 = arith.constant 0 : i32
    %c0_i32_0 = arith.constant 0 : i32
    %c0_i32_1 = arith.constant 0 : i32
    %c0_i32_2 = arith.constant 0 : i32
    return %arg0, %c0_i32, %c0_i32_0, %c0_i32_1 : i32, i32, i32, i32
  }
  func.func @transform_1(%arg0: i32) -> (i32, i32) {
    %c0_i32 = arith.constant 0 : i32
    %c0_i32_0 = arith.constant 0 : i32
    %c0_i32_1 = arith.constant 0 : i32
    return %c0_i32, %c0_i32_0 : i32, i32
  }
  func.func @transform_2(%arg0: i32) -> (i32, i32) {
    %c0_i32 = arith.constant 0 : i32
    %c0_i32_0 = arith.constant 0 : i32
    %c0_i32_1 = arith.constant 0 : i32
    return %c0_i32, %c0_i32_0 : i32, i32
  }
  func.func @transform_3(%arg0: i32) -> (i32, i32, i32) {
    %c0_i32 = arith.constant 0 : i32
    %c0_i32_0 = arith.constant 0 : i32
    %c0_i32_1 = arith.constant 0 : i32
    return %arg0, %c0_i32, %c0_i32_0 : i32, i32, i32
  }
}

module attributes {stable_mosaic.version = 11 : i64} {
  func.func @_mlp_kernel(%arg0: i32, %arg1: memref<2x256xbf16, #tpu.memory_space<vmem>>, %arg2: memref<256x128xbf16, #tpu.memory_space<vmem>>, %arg3: memref<1x128xf32, #tpu.memory_space<vmem>>, %arg4: memref<128x3xbf16, #tpu.memory_space<vmem>>, %arg5: memref<1x3xf32, #tpu.memory_space<vmem>>, %arg6: memref<2x3xf32, #tpu.memory_space<vmem>>, %arg7: memref<2x128xf32, #tpu.memory_space<vmem>>) attributes {dimension_semantics = [#tpu.dimension_semantics<arbitrary>], iteration_bounds = array<i64: 2>, scalar_prefetch = 0 : i64, scratch_operands = 1 : i64, tpu.core_type = #tpu.core_type<tc>, window_params = [{transform_indices = @transform_0, window_bounds = array<i64: 2, 256>}, {transform_indices = @transform_1, window_bounds = array<i64: 256, 128>}, {pipeline_mode = #tpu.pipeline_mode<synchronous>, transform_indices = @transform_2, window_bounds = array<i64: 1, 128>}, {pipeline_mode = #tpu.pipeline_mode<synchronous>, transform_indices = @transform_3, window_bounds = array<i64: 128, 3>}, {pipeline_mode = #tpu.pipeline_mode<synchronous>, transform_indices = @transform_4, window_bounds = array<i64: 1, 3>}, {pipeline_mode = #tpu.pipeline_mode<synchronous>, transform_indices = @transform_5, window_bounds = array<i64: 2, 3>}]} {
    %c0_i32 = arith.constant 0 : i32
    %0 = arith.cmpi eq, %arg0, %c0_i32 : i32
    %1 = arith.extui %0 : i1 to i32
    %c0_i32_0 = arith.constant 0 : i32
    %2 = arith.cmpi ne, %1, %c0_i32_0 : i32
    scf.if %2 {
      %cst_9 = arith.constant 0.000000e+00 : f32
      %12 = vector.broadcast %cst_9 : f32 to vector<2x128xf32>
      %c0_10 = arith.constant 0 : index
      %c0_11 = arith.constant 0 : index
      %13 = vector.load %arg7[%c0_10, %c0_11] : memref<2x128xf32, #tpu.memory_space<vmem>>, vector<2x128xf32>
      tpu.vector_store %arg7[%c0_10, %c0_11], %12 {strides = array<i32>} : memref<2x128xf32, #tpu.memory_space<vmem>>, vector<2x128xf32>,
    } else {
    }
    %c0 = arith.constant 0 : index
    %c0_1 = arith.constant 0 : index
    %3 = vector.load %arg7[%c0, %c0_1] : memref<2x128xf32, #tpu.memory_space<vmem>>, vector<2x128xf32>
    %c0_2 = arith.constant 0 : index
    %c0_3 = arith.constant 0 : index
    %4 = vector.load %arg1[%c0_2, %c0_3] : memref<2x256xbf16, #tpu.memory_space<vmem>>, vector<2x256xbf16>
    %c0_4 = arith.constant 0 : index
    %c0_5 = arith.constant 0 : index
    %5 = vector.load %arg2[%c0_4, %c0_5] : memref<256x128xbf16, #tpu.memory_space<vmem>>, vector<256x128xbf16>
    %cst = arith.constant dense<0.000000e+00> : vector<2x128xf32>
    %6 = tpu.matmul %4, %5, %cst {dimension_numbers = #tpu.dot_dimension_numbers<[1], [0], [0], [1], [0, 0, 1, 1], [], []>} : vector<2x256xbf16>, vector<256x128xbf16>, vector<2x128xf32> -> vector<2x128xf32>
    %7 = arith.addf %3, %6 : vector<2x128xf32>
    %c0_6 = arith.constant 0 : index
    %c0_7 = arith.constant 0 : index
    %8 = vector.load %arg7[%c0_6, %c0_7] : memref<2x128xf32, #tpu.memory_space<vmem>>, vector<2x128xf32>
    tpu.vector_store %arg7[%c0_6, %c0_7], %7 {strides = array<i32>} : memref<2x128xf32, #tpu.memory_space<vmem>>, vector<2x128xf32>,
    %c1_i32 = arith.constant 1 : i32
    %9 = arith.cmpi eq, %arg0, %c1_i32 : i32
    %10 = arith.extui %9 : i1 to i32
    %c0_i32_8 = arith.constant 0 : i32
    %11 = arith.cmpi ne, %10, %c0_i32_8 : i32
    scf.if %11 {
      %c0_9 = arith.constant 0 : index
      %c0_10 = arith.constant 0 : index
      %12 = vector.load %arg7[%c0_9, %c0_10] : memref<2x128xf32, #tpu.memory_space<vmem>>, vector<2x128xf32>
      %c0_11 = arith.constant 0 : index
      %c0_12 = arith.constant 0 : index
      %13 = vector.load %arg3[%c0_11, %c0_12] : memref<1x128xf32, #tpu.memory_space<vmem>>, vector<1x128xf32>
      %14 = vector.broadcast %13 : vector<1x128xf32> to vector<2x128xf32>
      %15 = arith.addf %12, %14 : vector<2x128xf32>
      %cst_13 = arith.constant 0.000000e+00 : f32
      %16 = vector.broadcast %cst_13 : f32 to vector<2x128xf32>
      %17 = arith.maximumf %15, %16 : vector<2x128xf32>
      %18 = arith.truncf %17 : vector<2x128xf32> to vector<2x128xbf16>
      %c0_14 = arith.constant 0 : index
      %c0_15 = arith.constant 0 : index
      %19 = vector.load %arg4[%c0_14, %c0_15] : memref<128x3xbf16, #tpu.memory_space<vmem>>, vector<128x3xbf16>
      %cst_16 = arith.constant dense<0.000000e+00> : vector<2x3xf32>
      %20 = tpu.matmul %18, %19, %cst_16 {dimension_numbers = #tpu.dot_dimension_numbers<[1], [0], [0], [1], [0, 0, 1, 1], [], []>} : vector<2x128xbf16>, vector<128x3xbf16>, vector<2x3xf32> -> vector<2x3xf32>
      %c0_17 = arith.constant 0 : index
      %c0_18 = arith.constant 0 : index
      %21 = vector.load %arg5[%c0_17, %c0_18] : memref<1x3xf32, #tpu.memory_space<vmem>>, vector<1x3xf32>
      %22 = vector.broadcast %21 : vector<1x3xf32> to vector<2x3xf32>
      %23 = arith.addf %20, %22 : vector<2x3xf32>
      %c0_19 = arith.constant 0 : index
      %c0_20 = arith.constant 0 : index
      %24 = vector.load %arg6[%c0_19, %c0_20] : memref<2x3xf32, #tpu.memory_space<vmem>>, vector<2x3xf32>
      tpu.vector_store %arg6[%c0_19, %c0_20], %23 {strides = array<i32>} : memref<2x3xf32, #tpu.memory_space<vmem>>, vector<2x3xf32>,
    } else {
    }
    return
  }
  func.func @transform_0(%arg0: i32) -> (i32, i32) {
    %c0_i32 = arith.constant 0 : i32
    %c0_i32_0 = arith.constant 0 : i32
    return %c0_i32, %arg0 : i32, i32
  }
  func.func @transform_1(%arg0: i32) -> (i32, i32) {
    %c0_i32 = arith.constant 0 : i32
    %c0_i32_0 = arith.constant 0 : i32
    return %arg0, %c0_i32 : i32, i32
  }
  func.func @transform_2(%arg0: i32) -> (i32, i32) {
    %c0_i32 = arith.constant 0 : i32
    %c0_i32_0 = arith.constant 0 : i32
    %c0_i32_1 = arith.constant 0 : i32
    return %c0_i32, %c0_i32_0 : i32, i32
  }
  func.func @transform_3(%arg0: i32) -> (i32, i32) {
    %c0_i32 = arith.constant 0 : i32
    %c0_i32_0 = arith.constant 0 : i32
    %c0_i32_1 = arith.constant 0 : i32
    return %c0_i32, %c0_i32_0 : i32, i32
  }
  func.func @transform_4(%arg0: i32) -> (i32, i32) {
    %c0_i32 = arith.constant 0 : i32
    %c0_i32_0 = arith.constant 0 : i32
    %c0_i32_1 = arith.constant 0 : i32
    return %c0_i32, %c0_i32_0 : i32, i32
  }
  func.func @transform_5(%arg0: i32) -> (i32, i32) {
    %c0_i32 = arith.constant 0 : i32
    %c0_i32_0 = arith.constant 0 : i32
    %c0_i32_1 = arith.constant 0 : i32
    return %c0_i32, %c0_i32_0 : i32, i32
  }
}

</mosaic_0001>

<bundles_post_ra>
// kernel: simple_cnn_forward.3
= control target key start
LH: loop header
LB: loop body
LE: loop exit
PB: predicated region body
PF: predicated region fallthrough
CT: control target
= control target key end

     0   :  { %s2275_s12 = smov 0   ;;  %s3488_s0 = inlined_call_operand.vmem [shape: bf16[2,4,99,3], index: 0, kind: input, shape index: {}]   ;;  %s3489_s1 = inlined_call_operand.vmem [shape: bf16[27,16], index: 1, kind: input, shape index: {}]   ;;  %s3490_s2 = inlined_call_operand.vmem [shape: f32[1,16], index: 2, kind: input, shape index: {}]   ;;  %s3491_s3 = inlined_call_operand.vmem [shape: bf16[2,72,16], index: 3, kind: output, shape index: {}]  }
   0x1 LB: > { %s1914_s13 = sadd.s32 4294967295, %s2244_s12   ;;  %p1918_p0 = scmp.ge.s32.totalorder %s2244_s12, 1  ;;  %s2244_s12 = sphi %s2275_s12, %s13_s12  }
   0x2   : > { %p137_p1 = scmp.lt.s32.totalorder %s2244_s12, 3 }
   0x4   : > { %p138_p2 = pnand %p1918_p0, %p137_p1 }
   0x6   : > { %141 = sbr.rel (%p138_p2) target bundleno = 713 (0x2c9), region = 32 }
   0xb   : > { %p161_p3 = scmp.lt.s32.totalorder %s1914_s13, 1  ;;  %s2246_s18 = smov 3   ;;  %vm279_vm0 = vsmask.f32 7424  ;;  %vm480_vm1 = vcmask 1046528   ;;  %vm638_vm2 = vcmask 23552  }
   0xc   : > { %s2247_s19 = smov 6   ;;  %s2248_s20 = smov 9   ;;  %vm650_vm3 = vcmask 48128   ;;  %vm661_vm4 = vcmask 72704   ;;  %vm753_vm5 = vcmask 1044480   ;;  %vm754_vm6 = vcmask 1045504  }
   0xd   : > { %s3578_s13 = smov (!%p161_p3, %s1914_s13), 1  ;;  %s2249_s21 = smov 12   ;;  %vm672_vm7 = vcmask 97280   ;;  %vm683_vm8 = vcmask 121856   ;;  %vm694_vm9 = vcmask 146432   ;;  %vm716_vm10 = vcmask 195584  }
   0xe   : > { %s2206_s14 = smul.u32 208, %s3578_s13  ;;  %s2250_s22 = smov 15   ;;  %vm705_vm11 = vcmask 171008   ;;  %vm742_vm12 = vcmask 220160   ;;  %vm1849_vm13 = vcmask 125952  }
   0xf   : > { %s2251_s23 = smov 18   ;;  %s2252_s24 = smov 21  }
  0x10   : > { %s2289_s17 = scalar_lea.vmem %s3488_s0, %s2206_s14  ;;  %s2253_s25 = smov 24  }
  0x11   : > { %v2292_v0 = vld [vmem:[%s2289_s17 + $0xac] sm:$0xff]   ;;  %v2295_v1 = vld [vmem:[%s2289_s17 + $0x9c] sm:$0xff]   ;;  %v1929_v17 = vld [vmem:[%s2289_s17 + $0x88] sm:$0xf]  ;;  %s2207_s7 = smul.u32 36, %s3578_s13 }
  0x12   : > { %3527 = vst [vmem:[#allocation2_spill] sm:$0xff] %v2292_v0  ;;  %v2298_v2 = vld [vmem:[%s2289_s17 + $0xb8] sm:$0xff]   ;;  %v2302_v4 = vld [vmem:[%s2289_s17 + $0xa0] sm:$0xff]   ;;  %v2305_v5 = vld [vmem:[%s2289_s17 + $0xa8] sm:$0xff]   ;;  %270 = vrot.lane.b32.xlu1 %v2292_v0, %s2246_s18  ;;  %v2350_v27 = vunpack.c.l.b16 %v1929_v17 }
  0x13   : > { %3528 = vst [vmem:[#allocation3_spill] sm:$0xff] %v2295_v1  ;;  %v2156_v3 = vunpack.c.h.b16 %v2298_v2  ;;  %266 = vrot.lane.b32.xlu0 %v2295_v1, %s2246_s18  ;;  %v3492_v6 = vunpack.c.h.b16 %v2302_v4  ;;  %v2147_v7 = vunpack.c.l.b16 %v2305_v5  ;;  %v2314_v8 = vld [vmem:[%s2289_s17 + $0x68] sm:$0xff]   ;;  %v2319_v10 = vld [vmem:[%s2289_s17 + $0x70] sm:$0xff]   ;;  %v2324_v13 = vld [vmem:[%s2289_s17 + $0x78] sm:$0xff]   ;;  %s3444_s10 = scalar_lea.vmem %s3491_s3, %s2207_s7 }
  0x14   : > { %3529 = vst [vmem:[#allocation4_spill] sm:$0xff] %v2305_v5  ;;  %v281_v11 = vshrl.u32 %v2314_v8, 16  ;;  %v283_v12 = vshll.u32 %v2314_v8, 16  ;;  %v2327_v14 = vld [vmem:[%s2289_s17 + $0x80] sm:$0xff]   ;;  %v288_v15 = vshll.u32 %v2319_v10, 16  ;;  %v296_v16 = vshll.u32 %v2324_v13, 16 }
  0x15   : > { %v2316_v9 = vpack.c.b16 %v2156_v3, %v2156_v3  ;;  %v1939_v18 = vld [vmem:[%s2289_s17 + $0x8c] sm:$0x1]  ;;  %v2337_v19 = vpack.c.b16 %v2147_v7, %v3492_v6  ;;  %v2340_v21 = vld [vmem:[%s2289_s17 + $0x4] sm:$0xff]   ;;  %v2346_v23 = vld [vmem:[%s2289_s17 + $0xb4] sm:$0xff]   ;;  %v300_v25 = vshrl.u32 %v2324_v13, 16  ;;  %v304_v26 = vshll.u32 %v2327_v14, 16 }
  0x16   : > { %v285_v20 = vrot.slane %v283_v12, 1  ;;  %3532 = vst [vmem:[#allocation7_spill] sm:$0xff] %v2340_v21  ;;  %v2343_v22 = vld [vmem:[%s2289_s17 + $0x4] sm:$0xf0]  ;;  %v290_v24 = vrot.slane %v288_v15, 1  ;;  %v298_v29 = vrot.slane %v296_v16, 1  ;;  %v277_v31 = vunpack.c.l.b16 %v1939_v18 }
  0x17   : > { %3530 = vst [vmem:[#allocation5_spill] sm:$0xff] %v2316_v9  ;;  %274 = vrot.lane.b32.xlu2 %v2316_v9, %s2246_s18  ;;  %v292_v30 = vshrl.u32 %v2319_v10, 16  ;;  %v2355_v33 = vld [vmem:[%s2289_s17 + $0xc] sm:$0xff]  ;;  %v306_v35 = vrot.slane %v304_v26, 1  ;;  %v308_v36 = vshrl.u32 %v2327_v14, 16  ;;  %v357_v40 = vshll.u32 %v2340_v21, 16 }
  0x18   : > { %3531 = vst [vmem:[#allocation6_spill] sm:$0xff] %v2337_v19  ;;  %v286_v28 = vor.u32 %v285_v20, %v281_v11  ;;  %v278_v32 = vpack.c.b16 %v277_v31, %v2350_v27  ;;  %v302_v37 = vor.u32 %v300_v25, %v298_v29  ;;  %v362_v41 = vshll.u32 %v2355_v33, 16  ;;  %v2370_v44 = vld [vmem:[%s2289_s17 + $0x14] sm:$0xff]  ;;  %v2373_v45 = vld [vmem:[%s2289_s17 + $0x1c] sm:$0xff]  ;;  %v1969_v50 = vld [vmem:[%s2289_s17 + $0x24] sm:$0xf] }
  0x19   : > { %3533 = vst [vmem:[#allocation8_spill] sm:$0xff] %v2346_v23  ;;  %v294_v38 = vor.u32 %v292_v30, %v290_v24  ;;  %v310_v42 = vor.u32 %v308_v36, %v306_v35  ;;  %v355_v48 = vshrl.u32 %v2340_v21, 16  ;;  %v359_v49 = vrot.slane %v357_v40, 1  ;;  %v2103_v51 = vld [vmem:[%s2289_s17 + $0x24] sm:$0x10]  ;;  %v2409_v15 = vld [vmem:[%s2289_s17 + $0x40] sm:$0xff] }
  0x1a   : > { %272 = vrot.lane.b32.xlu1 %v2346_v23, %s2246_s18  ;;  %v2362_v34 = vsel %vm279_vm0, %v286_v28, %v290_v24  ;;  %v312_v39 = vshll.u32 %v278_v32, 16  ;;  %v2376_v46 = vsel %vm279_vm0, %v302_v37, %v306_v35  ;;  %v2384_v52 = vrot.slane %v362_v41, 1  ;;  %v2412_v16 = vld [vmem:[%s2289_s17 + $0x38] sm:$0xff]   ;;  %v2421_v20 = vld [vmem:[%s2289_s17 + $0x48] sm:$0xff]  ;;  %v2432_v35 = vld [vmem:[%s2289_s17 + $0x50] sm:$0xff] }
  0x1b   : > { %268 = vrot.lane.b32.xlu0 %v2337_v19, %s2246_s18  ;;  %v2379_v47 = vsel %vm279_vm0, %v294_v38, %v298_v29  ;;  %v366_v53 = vshrl.u32 %v2355_v33, 16  ;;  %v316_v55 = vshrl.u32 %v278_v32, 16  ;;  %v370_v56 = vshll.u32 %v2370_v44, 16  ;;  %v1985_v40 = vld [vmem:[%s2289_s17 + $0x58] sm:$0xf] }
  0x1c   : > { %v314_v43 = vrot.slane %v312_v39, 1  ;;  %v378_v57 = vshll.u32 %v2373_v45, 16  ;;  %v360_v58 = vor.u32 %v359_v49, %v355_v48  ;;  %v2396_v59 = vor.u32 %v2103_v51, %v1969_v50  ;;  %v2107_v41 = vld [vmem:[%s2289_s17 + $0x58] sm:$0x10]  ;;  %v2236_v51 = vld [vmem:[%s2289_s17 + $0x4] sm:$0xe] }
  0x1d   : > { %v368_v60 = vor.u32 %v366_v53, %v2384_v52  ;;  %v372_v62 = vrot.slane %v370_v56, 1  ;;  %v382_v3 = vshrl.u32 %v2373_v45, 16  ;;  %v374_v12 = vshrl.u32 %v2370_v44, 16  ;;  %v2038_v9 = vld [vmem:[%s2289_s17 + $0xbc] sm:$0xf] }
  0x1e   : > { %v2392_v54 = vsel %vm279_vm0, %v310_v42, %v314_v43  ;;  %3534 = vst [vmem:[#allocation9_spill] sm:$0xff] %v2396_v59  ;;  %v2401_v61 = vor.u32 %v316_v55, %v314_v43  ;;  %v380_v63 = vrot.slane %v378_v57, 1  ;;  %v365_v7 = vsel %vm279_vm0, %v360_v58, %v2384_v52 }
  0x1f   : > { %319 = vrot.lane.b32.xlu2 %v2362_v34, %s2247_s19  ;;  %v386_v11 = vshll.u32 %v2396_v59, 16  ;;  %v2418_v17 = vsel %vm279_vm0, %v368_v60, %v372_v62  ;;  %v376_v25 = vor.u32 %v374_v12, %v372_v62  ;;  %v436_v26 = vshll.u32 %v2409_v15, 16 }
  0x20   : > { %v384_v18 = vor.u32 %v382_v3, %v380_v63  ;;  %v431_v28 = vshll.u32 %v2412_v16, 16  ;;  %v390_v29 = vshrl.u32 %v2396_v59, 16  ;;  %v440_v30 = vshrl.u32 %v2409_v15, 16 }
  0x21   : > { %v388_v24 = vrot.slane %v386_v11, 1  ;;  %v444_v31 = vshll.u32 %v2421_v20, 16  ;;  %v429_v32 = vshrl.u32 %v2412_v16, 16  ;;  %v2438_v37 = vsel %vm279_vm0, %v376_v25, %v380_v63 }
  0x22   : > { %323 = vrot.lane.b32.xlu1 %v2376_v46, %s2247_s19  ;;  %3536 = vst [vmem:[#allocation11_spill] sm:$0xff] %v2438_v37  ;;  %v2440_v38 = vrot.slane %v436_v26, 1  ;;  %v433_v39 = vrot.slane %v431_v28, 1  ;;  %v448_v48 = vshrl.u32 %v2421_v20, 16  ;;  %v452_v49 = vshll.u32 %v2432_v35, 16 }
  0x23   : > { %321 = vrot.lane.b32.xlu0 %v2379_v47, %s2247_s19  ;;  %v2435_v36 = vsel %vm279_vm0, %v384_v18, %v388_v24  ;;  %v2444_v42 = vor.u32 %v390_v29, %v388_v24  ;;  %v446_v43 = vrot.slane %v444_v31, 1  ;;  %v2452_v50 = vor.u32 %v2107_v41, %v1985_v40 }
  0x24   : > { %3535 = vst [vmem:[#allocation10_spill] sm:$0xff] %v2435_v36  ;;  %v442_v53 = vor.u32 %v440_v30, %v2440_v38  ;;  %v434_v55 = vor.u32 %v433_v39, %v429_v32  ;;  %v454_v57 = vrot.slane %v452_v49, 1  ;;  %v456_v63 = vshrl.u32 %v2432_v35, 16 }
  0x25   : > { %3537 = vst [vmem:[#allocation12_spill] sm:$0xff] %v2444_v42  ;;  %v450_v56 = vor.u32 %v448_v48, %v446_v43  ;;  %v460_v58 = vshll.u32 %v2452_v50, 16  ;;  %v464_v3 = vshrl.u32 %v2452_v50, 16  ;;  %v2128_v18 = vunpack.c.h.b16 %v2314_v8 }
  0x26   : > { %v2460_v60 = vsel %vm279_vm0, %v442_v53, %v446_v43  ;;  %v2464_v62 = vsel %vm279_vm0, %v434_v55, %v2440_v38  ;;  %v3493_v24 = vunpack.c.l.b16 %v2319_v10  ;;  %v458_v25 = vor.u32 %v456_v63, %v454_v57  ;;  %v2515_v53 = vld [vmem:[%s2289_s17 + $0x7c] sm:$0xff]  }
  0x27   : > { %325 = vrot.lane.b32.xlu2 %v2392_v54, %s2247_s19  ;;  %v2476_v11 = vsel %vm279_vm0, %v450_v56, %v454_v57  ;;  %v462_v12 = vrot.slane %v460_v58, 1  ;;  %v482_v28 = vrot.slane %v2355_v33, 1  ;;  %v2501_v33 = vld [vmem:[%s2289_s17 + $0x74] sm:$0xff]   ;;  %v2140_v39 = vunpack.c.h.b16 %v2327_v14  ;;  %3540 = vst [vmem:[#allocation15_spill] sm:$0xff] %v2515_v53  ;;  %v1989_v56 = vld [vmem:[%s2289_s17 + $0x8c] sm:$0xf] }
  0x28   : > { %v2488_v29 = vpack.c.b16 %v3493_v24, %v2128_v18  ;;  %v484_v40 = vrot.slane %v2370_v44, 1  ;;  %v486_v41 = vrot.slane %v2373_v45, 1  ;;  %v2510_v43 = vrot.slane %v2396_v59, 1  ;;  %v2108_v57 = vld [vmem:[%s2289_s17 + $0x8c] sm:$0x10] }
  0x29   : > { %v2491_v30 = vsel %vm279_vm0, %v458_v25, %v462_v12  ;;  %v2524_v45 = vpack.c.b16 %v2350_v27, %v2140_v39  ;;  %v525_v18 = vshll.u32 %v2515_v53, 16 }
  0x2a   : > { %393 = vrot.lane.b32.xlu1 %v365_v7, %s2248_s20  ;;  %v2469_v7 = vor.u32 %v2236_v51, %v2343_v22  ;;  %v2482_v22 = vor.u32 %v464_v3, %v462_v12  ;;  %3539 = vst [vmem:[#allocation14_spill] sm:$0xff] %v2491_v30  ;;  %v512_v32 = vshll.u32 %v2488_v29, 16  ;;  %v510_v48 = vshrl.u32 %v2488_v29, 16 }
  0x2b   : > { %327 = vrot.lane.b32.xlu0 %v2401_v61, %s2247_s19  ;;  %v517_v51 = vshll.u32 %v2501_v33, 16  ;;  %v2518_v55 = vsel %vm480_vm1, %v484_v40, %v486_v41  ;;  %v2521_v44 = vsel %vm480_vm1, %v482_v28, %v484_v40  ;;  %3541 = vst [vmem:[#allocation16_spill] sm:$0xff] %v2524_v45  ;;  %v2530_v58 = vsel %vm480_vm1, %v486_v41, %v2510_v43 }
  0x2c   : > { %3538 = vst [vmem:[#allocation13_spill] sm:$0xff] %v2482_v22  ;;  %v481_v26 = vrot.slane %v2469_v7, 1  ;;  %v514_v49 = vrot.slane %v512_v32, 1  ;;  %v521_v12 = vshrl.u32 %v2501_v33, 16  ;;  %v533_v25 = vshll.u32 %v2524_v45, 16 }
  0x2d   : > { %v2536_v3 = vrot.slane %v517_v51, 1  ;;  %v527_v39 = vrot.slane %v525_v18, 1  ;;  %v529_v40 = vshrl.u32 %v2515_v53, 16  ;;  %v575_v18 = vshll.u32 %v2305_v5, 16 }
  0x2e   : > { %v2498_v31 = vsel %vm480_vm1, %v481_v26, %v482_v28  ;;  %v515_v63 = vor.u32 %v514_v49, %v510_v48  ;;  %v2541_v26 = vor.u32 %v2108_v57, %v1989_v56  ;;  %v535_v41 = vrot.slane %v533_v25, 1  ;;  %v2560_v25 = vld [vmem:[%s2289_s17 + $0xb0] sm:$0xff]  }
  0x2f   : > { %395 = vrot.lane.b32.xlu2 %v2418_v17, %s2248_s20  ;;  %v523_v32 = vor.u32 %v521_v12, %v2536_v3  ;;  %v537_v48 = vshrl.u32 %v2524_v45, 16  ;;  %v570_v56 = vshll.u32 %v2302_v4, 16  ;;  %v531_v57 = vor.u32 %v529_v40, %v527_v39  ;;  %3544 = vst [vmem:[#allocation19_spill] sm:$0xff] %v2560_v25 }
  0x30   : > { %3542 = vst [vmem:[#allocation17_spill] sm:$0xff] %v2541_v26  ;;  %v520_v28 = vsel %vm279_vm0, %v515_v63, %v2536_v3  ;;  %v541_v49 = vshll.u32 %v2541_v26, 16  ;;  %v545_v6 = vshrl.u32 %v2541_v26, 16  ;;  %v583_v24 = vshll.u32 %v2560_v25, 16 }
  0x31   : > { %v2555_v51 = vsel %vm279_vm0, %v523_v32, %v527_v39  ;;  %v539_v63 = vor.u32 %v537_v48, %v535_v41  ;;  %v572_v32 = vrot.slane %v570_v56, 1  ;;  %v2568_v59 = vsel %vm279_vm0, %v531_v57, %v535_v41 }
  0x32   : > { %399 = vrot.lane.b32.xlu1 %v2435_v36, %s2248_s20  ;;  %3543 = vst [vmem:[#allocation18_spill] sm:$0xff] %v2555_v51  ;;  %v543_v12 = vrot.slane %v541_v49, 1  ;;  %v2573_v40 = vrot.slane %v575_v18, 1  ;;  %v579_v48 = vshrl.u32 %v2305_v5, 16  ;;  %v1993_v49 = vld [vmem:[%s2289_s17 + $0xc0] sm:$0xf] }
  0x33   : > { %397 = vrot.lane.b32.xlu0 %v2438_v37, %s2248_s20  ;;  %3545 = vst [vmem:[#allocation20_spill] sm:$0xff] %v2568_v59  ;;  %v585_v56 = vrot.slane %v583_v24, 1  ;;  %v587_v41 = vshrl.u32 %v2560_v25, 16  ;;  %v591_v57 = vshll.u32 %v2298_v2, 16  ;;  %v1954_v37 = vld [vmem:[%s2289_s17 + $0x6c] sm:$0xe] }
  0x34   : > { %v2571_v39 = vsel %vm279_vm0, %v539_v63, %v543_v12  ;;  %3547 = vst [vmem:[#allocation22_spill] sm:$0xff] %v2573_v40  ;;  %v2578_v36 = vor.u32 %v545_v6, %v543_v12  ;;  %v581_v21 = vor.u32 %v579_v48, %v2573_v40  ;;  %v617_v23 = vunpack.c.l.b16 %v1954_v37 }
  0x35   : > { %3546 = vst [vmem:[#allocation21_spill] sm:$0xff] %v2571_v39  ;;  %v589_v6 = vor.u32 %v587_v41, %v585_v56  ;;  %v593_v12 = vrot.slane %v591_v57, 1  ;;  %v3550_v48 = vunpack.c.l.b16 %v2319_v10  ;;  %v620_v41 = vrot.slane %v2501_v33, 1 }
  0x36   : > { %3548 = vst [vmem:[#allocation23_spill] sm:$0xff] %v2578_v36 }
  0x37   : > { %401 = vrot.lane.b32.xlu2 %v2444_v42, %s2248_s20  ;;  %v2109_v42 = vld [vmem:[%s2289_s17 + $0xc0] sm:$0x10] }
  0x38   : > { %v2586_v63 = vor.u32 %v2109_v42, %v1993_v49  ;;  %v595_v42 = vshrl.u32 %v2298_v2, 16  ;;  %v2611_v49 = vpack.c.b16 %v3550_v48, %v617_v23  ;;  %v2112_v48 = vld [vmem:[%s2289_s17 + $0x9c] sm:$0xff] }
  0x3a   : > { %469 = vrot.lane.b32.xlu1 %v2460_v60, %s2249_s21  ;;  %3549 = vst [vmem:[#allocation24_spill] sm:$0xff] %v2586_v63 }
  0x3b   : > { %467 = vrot.lane.b32.xlu0 %v2464_v62, %s2249_s21 }
  0x3f   : > { %471 = vrot.lane.b32.xlu2 %v2476_v11, %s2249_s21 }
  0x42   : > { %475 = vrot.lane.b32.xlu1 %v2482_v22, %s2249_s21 }
  0x43   : > { %473 = vrot.lane.b32.xlu0 %v2491_v30, %s2249_s21 }
  0x47   : > { %490 = vrot.lane.b32.xlu2 %v2498_v31, %s2250_s22 }
  0x4a   : > { %494 = vrot.lane.b32.xlu1 %v2518_v55, %s2250_s22 }
  0x4b   : > { %492 = vrot.lane.b32.xlu0 %v2521_v44, %s2250_s22 }
  0x4f   : > { %496 = vrot.lane.b32.xlu2 %v2530_v58, %s2250_s22 }
  0x52   : > { %548 = vrot.lane.b32.xlu1 %v520_v28, %s2251_s23  ;;  %v568_v28 = vshrl.u32 %v2302_v4, 16 }
  0x53   : > { %498 = vrot.lane.b32.xlu0 %v2510_v43, %s2250_s22 }
  0x54   : > { %v573_v18 = vor.u32 %v572_v32, %v568_v28  ;;  %v2606_v28 = vsel %vm279_vm0, %v589_v6, %v593_v12  ;;  %v603_v32 = vshrl.u32 %v2586_v63, 16  ;;  %v2634_v6 = vrot.slane %v2541_v26, 1 }
  0x56   : > { %v2595_v24 = vsel %vm279_vm0, %v573_v18, %v2573_v40  ;;  %v624_v18 = vrot.slane %v2524_v45, 1  ;;  %3551 = vst [vmem:[#allocation25_spill] sm:$0xff] %v2634_v6  ;;  %v2115_v45 = vld [vmem:[%s2289_s17 + $0xb4] sm:$0xff] }
  0x57   : > { %550 = vrot.lane.b32.xlu2 %v2555_v51, %s2251_s23  ;;  %v2116_v51 = vld [vmem:[%s2289_s17 + $0xbc] sm:$0x10]  ;;  %v864_v1 = vshll.u32 %v2115_v45, 16 }
  0x5a   : > { %554 = vrot.lane.b32.xlu1 %v2571_v39, %s2251_s23  ;;  %v2598_v39 = vsel %vm279_vm0, %v581_v21, %v585_v56  ;;  %v597_v21 = vor.u32 %v595_v42, %v593_v12  ;;  %v619_v56 = vrot.slane %v2611_v49, 1 }
  0x5b   : > { %552 = vrot.lane.b32.xlu0 %v2568_v59, %s2251_s23  ;;  %v599_v59 = vshll.u32 %v2586_v63, 16 }
  0x5c   : > { %v2627_v23 = vsel %vm480_vm1, %v619_v56, %v620_v41  ;;  %v2113_v56 = vld [vmem:[%s2289_s17 + $0xa4] sm:$0xff] }
  0x5d   : > { %v601_v37 = vrot.slane %v599_v59, 1  ;;  %v622_v59 = vrot.slane %v2515_v53, 1  ;;  %v852_v40 = vshrl.u32 %v2113_v56, 16 }
  0x5f   : > { %556 = vrot.lane.b32.xlu2 %v2578_v36, %s2251_s23  ;;  %v2615_v2 = vor.u32 %v603_v32, %v601_v37  ;;  %v2620_v57 = vsel %vm279_vm0, %v597_v21, %v601_v37  ;;  %v2639_v42 = vsel %vm480_vm1, %v620_v41, %v622_v59  ;;  %v2642_v37 = vsel %vm480_vm1, %v622_v59, %v624_v18  ;;  %v2114_v59 = vld [vmem:[%s2289_s17 + $0xac] sm:$0xff] }
  0x60   : > { %v2650_v32 = vsel %vm480_vm1, %v624_v18, %v2634_v6  ;;  %v843_v41 = vshll.u32 %v2112_v48, 16  ;;  %v848_v36 = vshll.u32 %v2113_v56, 16  ;;  %v841_v18 = vshrl.u32 %v2112_v48, 16 }
  0x61   : > { %v856_v26 = vshll.u32 %v2114_v59, 16  ;;  %v866_v56 = vrot.slane %v864_v1, 1 }
  0x62   : > { %608 = vrot.lane.b32.xlu1 %v2598_v39, %s2252_s24  ;;  %v845_v63 = vrot.slane %v843_v41, 1  ;;  %v850_v53 = vrot.slane %v848_v36, 1 }
  0x63   : > { %606 = vrot.lane.b32.xlu0 %v2595_v24, %s2252_s24 }
  0x64   : > { %v846_v48 = vor.u32 %v845_v63, %v841_v18  ;;  %v854_v41 = vor.u32 %v852_v40, %v850_v53 }
  0x67   : > { %610 = vrot.lane.b32.xlu2 %v2606_v28, %s2252_s24 }
  0x6a   : > { %614 = vrot.lane.b32.xlu1 %v2615_v2, %s2252_s24 }
  0x6b   : > { %612 = vrot.lane.b32.xlu0 %v2620_v57, %s2252_s24 }
  0x6f   : > { %628 = vrot.lane.b32.xlu2 %v2627_v23, %s2253_s25 }
  0x71   : > { %v2636_v12 = vpop.permute.xlu2 %274 }
  0x72   : > { %632 = vrot.lane.b32.xlu1 %v2642_v37, %s2253_s25 }
  0x73   : > { %630 = vrot.lane.b32.xlu0 %v2639_v42, %s2253_s25 }
  0x77   : > { %634 = vrot.lane.b32.xlu2 %v2650_v32, %s2253_s25 }
  0x79   : > { %v2655_v21 = vpop.permute.xlu2 %319 }
  0x7a   : > { %805 = vrot.lane.b32.xlu1 %v2362_v34, %s2246_s18  ;;  %v858_v34 = vrot.slane %v856_v26, 1 }
  0x7b   : > { %636 = vrot.lane.b32.xlu0 %v2634_v6, %s2253_s25  ;;  %v860_v6 = vshrl.u32 %v2114_v59, 16  ;;  %v868_v59 = vshrl.u32 %v2115_v45, 16 }
  0x7c   : > { %v859_v26 = vsel %vm279_vm0, %v854_v41, %v858_v34 }
  0x7d   : > { %v862_v36 = vor.u32 %v860_v6, %v858_v34  ;;  %v870_v63 = vor.u32 %v868_v59, %v866_v56 }
  0x7f   : > { %807 = vrot.lane.b32.xlu2 %v2379_v47, %s2246_s18  ;;  %v2039_v47 = vor.u32 %v2116_v51, %v2038_v9  ;;  %v867_v9 = vsel %vm279_vm0, %v862_v36, %v866_v56 }
  0x81   : > { %v2666_v25 = vpop.permute.xlu2 %325  ;;  %v872_v0 = vshll.u32 %v2039_v47, 16  ;;  %v876_v40 = vshrl.u32 %v2039_v47, 16  ;;  %v242_v47 = vpack.c.b16 %v2350_v27, %v2350_v27 }
  0x82   : > { %811 = vrot.lane.b32.xlu1 %v2392_v54, %s2246_s18  ;;  %v851_v54 = vsel %vm279_vm0, %v846_v48, %v850_v53 }
  0x83   : > { %809 = vrot.lane.b32.xlu0 %v2376_v46, %s2246_s18  ;;  %v874_v51 = vrot.slane %v872_v0, 1  ;;  %v649_v48 = vsel %vm638_vm2, %v242_v47, %v2636_v12  ;;  %v2180_v12 = vld [vmem:[%s2289_s17 + $0x38] sm:$0xf0] }
  0x84   : > { %v2674_v19 = vpop.permute.xlu1 %270 }
  0x85   : > { %v2676_v5 = vpop.permute.xlu0 %266  ;;  %v878_v1 = vor.u32 %v876_v40, %v874_v51  ;;  %v875_v53 = vsel %vm279_vm0, %v870_v63, %v874_v51  ;;  %v915_v63 = vrot.slane %v2421_v20, 1 }
  0x87   : > { %813 = vrot.lane.b32.xlu2 %v2401_v61, %s2246_s18 }
  0x89   : > { %v2680_v46 = vpop.permute.xlu2 %395 }
  0x8a   : > { %881 = vrot.lane.b32.xlu1 %v859_v26, %s2247_s19 }
  0x8b   : > { %879 = vrot.lane.b32.xlu0 %v851_v54, %s2247_s19  ;;  %v2181_v54 = vld [vmem:[%s2289_s17 + $0x38] sm:$0xe] }
  0x8c   : > { %v273_v61 = vpop.permute.xlu1 %272 }
  0x8d   : > { %v2687_v6 = vpop.permute.xlu0 %268 }
  0x8f   : > { %883 = vrot.lane.b32.xlu2 %v867_v9, %s2247_s19  ;;  %v2727_v9 = vor.u32 %v2181_v54, %v2180_v12 }
  0x91   : > { %v402_v18 = vpop.permute.xlu2 %401  ;;  %v912_v40 = vrot.slane %v2727_v9, 1 }
  0x92   : > { %887 = vrot.lane.b32.xlu1 %v878_v1, %s2247_s19  ;;  %v2001_v1 = vld [vmem:[%s3489_s1 + $0x8] sm:$0xf] }
  0x93   : > { %885 = vrot.lane.b32.xlu0 %v875_v53, %s2247_s19  ;;  %v2254_v53 = vmov 65535  }
  0x94   : > { %v2693_v45 = vpop.permute.xlu1 %323  ;;  %v755_v47 = vsel %vm753_vm5, 4294967295, %v2254_v53 }
  0x95   : > { %v2695_v34 = vpop.permute.xlu0 %321 }
  0x97   : > { %889 = vrot.lane.b32.xlu2 %v2464_v62, %s2248_s20 }
  0x99   : > { %v2699_v0 = vpop.permute.xlu2 %471 }
  0x9a   : > { %893 = vrot.lane.b32.xlu1 %v2476_v11, %s2248_s20 }
  0x9b   : > { %891 = vrot.lane.b32.xlu0 %v2460_v60, %s2248_s20 }
  0x9c   : > { %v2709_v41 = vpop.permute.xlu1 %393 }
  0x9d   : > { %v328_v62 = vpop.permute.xlu0 %327 }
  0x9e   : > { %v660_v36 = vsel %vm650_vm3, %v649_v48, %v328_v62  ;;  %v756_v48 = vsel %vm754_vm6, %v755_v47, 0  ;;  %v917_v62 = vrot.slane %v2432_v35, 1 }
  0x9f   : > { %895 = vrot.lane.b32.xlu2 %v2491_v30, %s2248_s20  ;;  %v671_v27 = vsel %vm661_vm4, %v660_v36, %v402_v18  ;;  %v646_v30 = vsel %vm638_vm2, %v2327_v14, %v273_v61 }
  0xa0   : > { %v918_v35 = vsel %vm480_vm1, %v915_v63, %v917_v62 }
  0xa1   : > { %v2715_v56 = vpop.permute.xlu2 %490 }
  0xa2   : > { %899 = vrot.lane.b32.xlu1 %v2498_v31, %s2249_s21  ;;  %v913_v31 = vrot.slane %v2409_v15, 1 }
  0xa3   : > { %897 = vrot.lane.b32.xlu0 %v2482_v22, %s2248_s20 }
  0xa4   : > { %v400_v26 = vpop.permute.xlu1 %399  ;;  %v914_v54 = vsel %vm480_vm1, %v912_v40, %v913_v31  ;;  %v916_v22 = vsel %vm480_vm1, %v913_v31, %v915_v63  ;;  %v658_v40 = vsel %vm650_vm3, %v646_v30, %v2666_v25  ;;  %v919_v31 = vrot.slane %v2452_v50, 1 }
  0xa5   : > { %v2723_v59 = vpop.permute.xlu0 %397  ;;  %v669_v14 = vsel %vm661_vm4, %v658_v40, %v400_v26 }
  0xa6   : > { %v920_v25 = vsel %vm480_vm1, %v917_v62, %v919_v31  ;;  %v640_v62 = vsel %vm638_vm2, %v2314_v8, %v2676_v5 }
  0xa7   : > { %901 = vrot.lane.b32.xlu2 %v2521_v44, %s2249_s21  ;;  %v2111_v44 = vld [vmem:[%s3489_s1 + $0x8] sm:$0x30] }
  0xa9   : > { %v497_v51 = vpop.permute.xlu2 %496 }
  0xaa   : > { %905 = vrot.lane.b32.xlu1 %v2530_v58, %s2249_s21  ;;  %v2002_v58 = vor.u32 %v2111_v44, %v2001_v1 }
  0xab   : > { %903 = vrot.lane.b32.xlu0 %v2518_v55, %s2249_s21 }
  0xac   : > { %v2742_v18 = vpop.permute.xlu1 %469  ;;  %v758_v36 = vand.u32 %v2002_v58, %v756_v48 }
  0xad   : > { %v2744_v55 = vpop.permute.xlu0 %467 }
  0xae   : > { %766 = vmatpush.bf16.msra.mxu0 %v758_v36  ;;  %1502 = vmatpush.bf16.msra.mxu2 %v758_v36 }
  0xaf   : > { %907 = vrot.lane.b32.xlu2 %v2510_v43, %s2249_s21  ;;  %1074 = vmatpush.bf16.msra.mxu1 %v758_v36  ;;  %v2110_v43 = vld [vmem:[%s3489_s1] sm:$0xff] }
  0xb0   : > { %1782 = vmatpush.bf16.msra.mxu3 %v758_v36  ;;  %v1144_v36 = vshll.u32 %v2469_v7, 16 }
  0xb1   : > { %v2749_v12 = vpop.permute.xlu2 %550 }
  0xb2   : > { %923 = vrot.lane.b32.xlu1 %v916_v22, %s2250_s22  ;;  %767 = vmatpush.bf16.msra.mxu0 %v2110_v43  ;;  %v1146_v5 = vrot.slane %v1144_v36, 1 }
  0xb3   : > { %921 = vrot.lane.b32.xlu0 %v914_v54, %s2250_s22  ;;  %1503 = vmatpush.bf16.msra.mxu2 %v2110_v43 }
  0xb4   : > { %v476_v61 = vpop.permute.xlu1 %475  ;;  %1075 = vmatpush.bf16.msra.mxu1 %v2110_v43  ;;  %1783 = vmatpush.bf16.msra.mxu3 %v2110_v43  ;;  %v652_v43 = vsel %vm650_vm3, %v640_v62, %v2655_v21 }
  0xb5   : > { %v474_v1 = vpop.permute.xlu0 %473  ;;  %v682_v22 = vsel %vm672_vm7, %v671_v27, %v476_v61  ;;  %v663_v40 = vsel %vm661_vm4, %v652_v43, %v2709_v41 }
  0xb6   : > { %v680_v63 = vsel %vm672_vm7, %v669_v14, %v474_v1  ;;  %v674_v8 = vsel %vm672_vm7, %v663_v40, %v2744_v55  ;;  %v1552_v1 = vshll.u32 %v2727_v9, 16 }
  0xb7   : > { %925 = vrot.lane.b32.xlu2 %v918_v35, %s2250_s22  ;;  %v2769_v44 = vsel %vm683_vm8, %v680_v63, %v497_v51 }
  0xb9   : > { %v557_v30 = vpop.permute.xlu2 %556 }
  0xba   : > { %929 = vrot.lane.b32.xlu1 %v919_v31, %s2250_s22  ;;  %v1142_v31 = vshrl.u32 %v2469_v7, 16 }
  0xbb   : > { %927 = vrot.lane.b32.xlu0 %v920_v25, %s2250_s22 }
  0xbc   : > { %v2774_v26 = vpop.permute.xlu1 %494  ;;  %v1147_v21 = vor.u32 %v1146_v5, %v1142_v31  ;;  %v644_v31 = vsel %vm638_vm2, %v2324_v13, %v2674_v19  ;;  %v2879_v5 = vld [vmem:[%s2289_s17 + $0x10] sm:$0xff] }
  0xbd   : > { %v493_v27 = vpop.permute.xlu0 %492 }
  0xbf   : > { %931 = vrot.lane.b32.xlu2 %v2595_v24, %s2251_s23 }
  0xc1   : > { %v2778_v58 = vpop.permute.xlu2 %610 }
  0xc2   : > { %935 = vrot.lane.b32.xlu1 %v2606_v28, %s2251_s23 }
  0xc3   : > { %933 = vrot.lane.b32.xlu0 %v2598_v39, %s2251_s23 }
  0xc4   : > { %v549_v53 = vpop.permute.xlu1 %548 }
  0xc5   : > { %v499_v51 = vpop.permute.xlu0 %498 }
  0xc6   : > { %v693_v47 = vsel %vm683_vm8, %v682_v22, %v499_v51 }
  0xc7   : > { %937 = vrot.lane.b32.xlu2 %v2620_v57, %s2251_s23  ;;  %v2788_v48 = vsel %vm694_vm9, %v693_v47, %v557_v30  ;;  %v1554_v30 = vrot.slane %v1552_v1, 1 }
  0xc9   : > { %v629_v24 = vpop.permute.xlu2 %628 }
  0xca   : > { %941 = vrot.lane.b32.xlu1 %v2627_v23, %s2252_s24 }
  0xcb   : > { %939 = vrot.lane.b32.xlu0 %v2615_v2, %s2251_s23 }
  0xcc   : > { %v2800_v35 = vpop.permute.xlu1 %554 }
  0xcd   : > { %v2798_v54 = vpop.permute.xlu0 %552 }
  0xcf   : > { %943 = vrot.lane.b32.xlu2 %v2639_v42, %s2252_s24  ;;  %v685_v42 = vsel %vm683_vm8, %v674_v8, %v2715_v56  ;;  %v642_v56 = vsel %vm638_vm2, %v2319_v10, %v2687_v6 }
  0xd0   : > { %v696_v41 = vsel %vm694_vm9, %v685_v42, %v549_v53  ;;  %v2121_v42 = vld [vmem:[%s2289_s17 + $0x3c] sm:$0xf0] }
  0xd1   : > { %v2808_v23 = vpop.permute.xlu2 %634 }
  0xd2   : > { %947 = vrot.lane.b32.xlu1 %v2650_v32, %s2252_s24  ;;  %v1148_v32 = vsel %vm279_vm0, %v1147_v21, %v2384_v52  ;;  %v1182_v52 = vshll.u32 %v2611_v49, 16  ;;  %v656_v21 = vsel %vm650_vm3, %v644_v31, %v2693_v45 }
  0xd3   : > { %945 = vrot.lane.b32.xlu0 %v2642_v37, %s2252_s24 }
  0xd4   : > { %v609_v7 = vpop.permute.xlu1 %608 }
  0xd5   : > { %v607_v14 = vpop.permute.xlu0 %606 }
  0xd6   : > { %v707_v61 = vsel %vm705_vm11, %v696_v41, %v607_v14 }
  0xd7   : > { %1131 = vrot.lane.b32.xlu2 %v2412_v16, %s2246_s18  ;;  %v718_v37 = vsel %vm716_vm10, %v707_v61, %v629_v24  ;;  %v654_v16 = vsel %vm650_vm3, %v642_v56, %v2695_v34  ;;  %v1550_v34 = vshrl.u32 %v2727_v9, 16  ;;  %v2057_v24 = vld [vmem:[%s2289_s17 + $0x8] sm:$0xe]  ;;  %v1230_v61 = vshll.u32 %v2879_v5, 16 }
  0xd8   : > { %2003 = vmatmul.msk.bf16.vlgmr.msra.gmra.mxu0 %vm742_vm12, %v718_v37  ;;  %v665_v10 = vsel %vm661_vm4, %v654_v16, %v2680_v46  ;;  %v1184_v46 = vrot.slane %v1182_v52, 1  ;;  %v2019_v37 = vld [vmem:[%s2289_s17 + $0xa0] sm:$0xe]  ;;  %v2907_v56 = vld [vmem:[%s2289_s17 + $0x44] sm:$0xff] }
  0xd9   : > { %v2824_v55 = vpop.permute.xlu2 %807  ;;  %v1555_v53 = vor.u32 %v1554_v30, %v1550_v34  ;;  %v952_v1 = vunpack.c.l.b16 %v2019_v37  ;;  %v1232_v52 = vrot.slane %v1230_v61, 1  ;;  %v3552_v34 = vld [vmem:[#allocation2_spill] sm:$0xff]  ;;  %v702_v61 = vsel %vm694_vm9, %v2769_v44, %v2800_v35 }
  0xda   : > { %1133 = vrot.lane.b32.xlu1 %v2409_v15, %s2246_s18  ;;  %v676_v15 = vsel %vm672_vm7, %v665_v10, %v2742_v18 }
  0xdb   : > { %1149 = vrot.lane.b32.xlu0 %v1148_v32, %s2247_s19  ;;  %v687_v25 = vsel %vm683_vm8, %v676_v15, %v493_v27  ;;  %v2117_v27 = vld [vmem:[%s2289_s17 + $0x8] sm:$0xf0] }
  0xdc   : > { %v2840_v63 = vpop.permute.xlu1 %614  ;;  %v698_v51 = vsel %vm694_vm9, %v687_v25, %v2749_v12  ;;  %v1556_v12 = vsel %vm279_vm0, %v1555_v53, %v2440_v38  ;;  %v2868_v43 = vor.u32 %v2117_v27, %v2057_v24  ;;  %v2073_v38 = vld [vmem:[%s2289_s17 + $0x3c] sm:$0xe]  ;;  %v3554_v53 = vunpack.c.h.b16 %v2302_v4 }
  0xdd   : > { %v2838_v22 = vpop.permute.xlu0 %612  ;;  %v709_v18 = vsel %vm705_vm11, %v698_v51, %v609_v7  ;;  %v2891_v14 = vor.u32 %v2121_v42, %v2073_v38 }
  0xde   : > { %v1225_v8 = vshll.u32 %v2868_v43, 16  ;;  %v1223_v19 = vshrl.u32 %v2868_v43, 16 }
  0xdf   : > { %1159 = vrot.lane.b32.xlu2 %v2488_v29, %s2248_s20  ;;  %v1180_v29 = vshrl.u32 %v2611_v49, 16  ;;  %v1299_v16 = vshll.u32 %v2891_v14, 16  ;;  %v1297_v30 = vshrl.u32 %v2891_v14, 16 }
  0xe0   : > { %v1227_v7 = vrot.slane %v1225_v8, 1 }
  0xe1   : > { %v2849_v6 = vpop.permute.xlu2 %813  ;;  %v1185_v49 = vor.u32 %v1184_v46, %v1180_v29  ;;  %v1301_v29 = vrot.slane %v1299_v16, 1  ;;  %v1304_v46 = vshll.u32 %v2907_v56, 16 }
  0xe2   : > { %1151 = vrot.lane.b32.xlu1 %v2418_v17, %s2247_s19  ;;  %v1228_v10 = vor.u32 %v1227_v7, %v1223_v19  ;;  %v1234_v7 = vshrl.u32 %v2879_v5, 16 }
  0xe3   : > { %1539 = vrot.lane.b32.xlu0 %v1148_v32, %s2246_s18  ;;  %v1186_v40 = vsel %vm279_vm0, %v1185_v49, %v2536_v3  ;;  %v667_v3 = vsel %vm661_vm4, %v656_v21, %v2723_v59 }
  0xe4   : > { %v633_v9 = vpop.permute.xlu1 %632  ;;  %v678_v45 = vsel %vm672_vm7, %v667_v3, %v2699_v0  ;;  %v1233_v24 = vsel %vm279_vm0, %v1228_v10, %v1232_v52 }
  0xe5   : > { %v631_v47 = vpop.permute.xlu0 %630  ;;  %v689_v32 = vsel %vm683_vm8, %v678_v45, %v2774_v26  ;;  %v1236_v45 = vor.u32 %v1234_v7, %v1232_v52 }
  0xe6   : > { %v720_v62 = vsel %vm716_vm10, %v709_v18, %v631_v47  ;;  %v700_v59 = vsel %vm694_vm9, %v689_v32, %v2798_v54  ;;  %v3553_v54 = vld [vmem:[#allocation4_spill] sm:$0xff]  ;;  %v2922_v18 = vpack.c.b16 %v3554_v53, %v952_v1 }
  0xe7   : > { %1169 = vrot.lane.b32.xlu2 %v2302_v4, %s2249_s21  ;;  %v3559_v1 = vld [vmem:[#allocation8_spill] sm:$0xff] }
  0xe8   : > { %2004 = vmatmul.msk.bf16.gmra.mxu0 %vm742_vm12, %v720_v62  ;;  %v1590_v27 = vshll.u32 %v2922_v18, 16  ;;  %v2931_v62 = vld [vmem:[%s2289_s17 + $0x18] sm:$0xff]  ;;  %v1588_v19 = vshrl.u32 %v2922_v18, 16 }
  0xe9   : > { %v884_v36 = vpop.permute.xlu2 %883 }
  0xea   : > { %1161 = vrot.lane.b32.xlu1 %v2501_v33, %s2248_s20 }
  0xeb   : > { %1557 = vrot.lane.b32.xlu0 %v1556_v12, %s2247_s19 }
  0xec   : > { %v806_v33 = vpop.permute.xlu1 %805 }
  0xed   : > { %v2886_v41 = vpop.permute.xlu0 %636 }
  0xef   : > { %1187 = vrot.lane.b32.xlu2 %v1186_v40, %s2250_s22 }
  0xf1   : > { %v890_v13 = vpop.permute.xlu2 %889 }
  0xf2   : > { %1567 = vrot.lane.b32.xlu1 %v2302_v4, %s2248_s20  ;;  %v3555_v4 = vld [vmem:[#allocation6_spill] sm:$0xff] }
  0xf3   : > { %1541 = vrot.lane.b32.xlu0 %v2418_v17, %s2246_s18  ;;  %v711_v17 = vsel %vm705_vm11, %v700_v59, %v2778_v58  ;;  %v1302_v58 = vor.u32 %v1301_v29, %v1297_v30  ;;  %v978_v49 = vsel %vm638_vm2, %v3555_v4, %v2824_v55  ;;  %v1592_v55 = vrot.slane %v1590_v27, 1  ;;  %v3558_v59 = vld [vmem:[#allocation5_spill] sm:$0xff]  ;;  %v3560_v30 = vld [vmem:[#allocation22_spill] sm:$0xff] }
  0xf4   : > { %v812_v15 = vpop.permute.xlu1 %811  ;;  %v722_v25 = vsel %vm716_vm10, %v711_v17, %v633_v9  ;;  %v1306_v9 = vrot.slane %v1304_v46, 1  ;;  %v987_v16 = vsel %vm638_vm2, %v3558_v59, %v2849_v6  ;;  %v1349_v6 = vrot.slane %v2879_v5, 1 }
  0xf5   : > { %v810_v0 = vpop.permute.xlu0 %809  ;;  %v1593_v37 = vor.u32 %v1592_v55, %v1588_v19  ;;  %v984_v44 = vsel %vm638_vm2, %v3559_v1, %v812_v15 }
  0xf6   : > { %v981_v26 = vsel %vm638_vm2, %v3552_v34, %v810_v0  ;;  %v1307_v42 = vsel %vm279_vm0, %v1302_v58, %v1306_v9  ;;  %v2963_v34 = vld [vmem:[%s2289_s17 + $0xa8] sm:$0xff]  }
  0xf7   : > { %1171 = vrot.lane.b32.xlu2 %v3553_v54, %s2249_s21  ;;  %v993_v51 = vsel %vm650_vm3, %v981_v26, %v884_v36  ;;  %v3556_v36 = vld [vmem:[#allocation3_spill] sm:$0xff]  ;;  %v1348_v26 = vrot.slane %v2868_v43, 1  ;;  %v1308_v43 = vshrl.u32 %v2907_v56, 16 }
  0xf8   : > { %2005 = vmatmul.msk.bf16.gmra.mxu0 %vm742_vm12, %v722_v25  ;;  %v975_v12 = vsel %vm638_vm2, %v3556_v36, %v806_v33  ;;  %v1238_v33 = vshll.u32 %v2931_v62, 16  ;;  %v2973_v54 = vld [vmem:[%s2289_s17 + $0x4c] sm:$0xff]  ;;  %v1594_v25 = vsel %vm279_vm0, %v1593_v37, %v3560_v30 }
  0xf9   : > { %v896_v47 = vpop.permute.xlu2 %895  ;;  %v1312_v5 = vshll.u32 %v2973_v54, 16  ;;  %v1310_v58 = vor.u32 %v1308_v43, %v1306_v9 }
  0xfa   : > { %1559 = vrot.lane.b32.xlu1 %v2460_v60, %s2247_s19  ;;  %v2954_v32 = vrot.slane %v1238_v33, 1 }
  0xfb   : > { %1261 = vrot.lane.b32.xlu0 %v1233_v24, %s2251_s23  ;;  %v2989_v27 = vrot.slane %v1312_v5, 1  ;;  %v1242_v5 = vshrl.u32 %v2931_v62, 16 }
  0xfc   : > { %v882_v8 = vpop.permute.xlu1 %881  ;;  %v1241_v29 = vsel %vm279_vm0, %v1236_v45, %v2954_v32 }
  0xfd   : > { %v880_v31 = vpop.permute.xlu0 %879  ;;  %v991_v60 = vsel %vm650_vm3, %v978_v49, %v882_v8  ;;  %v1315_v36 = vsel %vm279_vm0, %v1310_v58, %v2989_v27  ;;  %v3067_v58 = vld [vmem:[%s2289_s17 + $0x54] sm:$0xff] }
  0xfe   : > { %v989_v38 = vsel %vm650_vm3, %v975_v12, %v880_v31 }
  0xff   : > { %1577 = vrot.lane.b32.xlu2 %v1186_v40, %s2249_s21  ;;  %v999_v21 = vsel %vm661_vm4, %v989_v38, %v890_v13  ;;  %v3557_v40 = vld [vmem:[#allocation18_spill] sm:$0xff]  ;;  %v713_v13 = vsel %vm705_vm11, %v702_v61, %v2838_v22 }
 0x100   : > { %v724_v52 = vsel %vm716_vm10, %v713_v13, %v2808_v23  ;;  %v1350_v23 = vsel %vm480_vm1, %v1348_v26, %v1349_v6 }
 0x101   : > { %v902_v3 = vpop.permute.xlu2 %901 }
 0x102   : > { %1335 = vrot.lane.b32.xlu1 %v1307_v42, %s2252_s24 }
 0x103   : > { %1189 = vrot.lane.b32.xlu0 %v3557_v40, %s2250_s22 }
 0x104   : > { %v888_v10 = vpop.permute.xlu1 %887 }
 0x105   : > { %v886_v35 = vpop.permute.xlu0 %885  ;;  %v997_v22 = vsel %vm650_vm3, %v987_v16, %v888_v10 }
 0x106   : > { %v995_v0 = vsel %vm650_vm3, %v984_v44, %v886_v35 }
 0x107   : > { %1569 = vrot.lane.b32.xlu2 %v2963_v34, %s2248_s20  ;;  %v1005_v15 = vsel %vm661_vm4, %v995_v0, %v896_v47 }
 0x108   : > { %2006 = vmatmul.msk.bf16.gmra.mxu0 %vm742_vm12, %v724_v52 }
 0x109   : > { %v908_v17 = vpop.permute.xlu2 %907 }
 0x10a   : > { %1263 = vrot.lane.b32.xlu1 %v1241_v29, %s2251_s23 }
 0x10b   : > { %1595 = vrot.lane.b32.xlu0 %v1594_v25, %s2250_s22 }
 0x10c   : > { %v894_v53 = vpop.permute.xlu1 %893 }
 0x10d   : > { %v892_v46 = vpop.permute.xlu0 %891  ;;  %v1003_v24 = vsel %vm661_vm4, %v993_v51, %v894_v53  ;;  %v715_v51 = vsel %vm705_vm11, %v2788_v48, %v2840_v63  ;;  %v1628_v63 = vrot.slane %v2891_v14, 1  ;;  %v1631_v14 = vrot.slane %v2973_v54, 1  ;;  %v3563_v53 = vld [vmem:[#allocation19_spill] sm:$0xff] }
 0x10e   : > { %v1001_v47 = vsel %vm661_vm4, %v991_v60, %v892_v46  ;;  %v726_v38 = vsel %vm716_vm10, %v715_v51, %v2886_v41  ;;  %v1351_v60 = vrot.slane %v2931_v62, 1  ;;  %v1629_v41 = vrot.slane %v2907_v56, 1 }
 0x10f   : > { %1357 = vrot.lane.b32.xlu2 %v1350_v23, %s2253_s25  ;;  %v1011_v4 = vsel %vm672_vm7, %v1001_v47, %v902_v3  ;;  %v954_v56 = vrot.slane %v2922_v18, 1  ;;  %v1244_v47 = vor.u32 %v1242_v5, %v2954_v32  ;;  %v1316_v32 = vshrl.u32 %v2973_v54, 16 }
 0x110   : > { %v1352_v48 = vsel %vm480_vm1, %v1349_v6, %v1351_v60  ;;  %v1630_v61 = vsel %vm480_vm1, %v1628_v63, %v1629_v41  ;;  %v1632_v44 = vsel %vm480_vm1, %v1629_v41, %v1631_v14  ;;  %v3561_v6 = vld [vmem:[#allocation11_spill] sm:$0xff]  ;;  %v957_v62 = vrot.slane %v3563_v53, 1 }
 0x111   : > { %v926_v49 = vpop.permute.xlu2 %925 }
 0x112   : > { %1605 = vrot.lane.b32.xlu1 %v1307_v42, %s2251_s23 }
 0x113   : > { %1579 = vrot.lane.b32.xlu0 %v3557_v40, %s2249_s21  ;;  %v955_v40 = vrot.slane %v2963_v34, 1 }
 0x114   : > { %v900_v31 = vpop.permute.xlu1 %899 }
 0x115   : > { %v898_v12 = vpop.permute.xlu0 %897  ;;  %v1009_v8 = vsel %vm672_vm7, %v999_v21, %v900_v31  ;;  %v956_v18 = vsel %vm480_vm1, %v954_v56, %v955_v40  ;;  %v958_v54 = vsel %vm480_vm1, %v955_v40, %v957_v62 }
 0x116   : > { %v1007_v9 = vsel %vm661_vm4, %v997_v22, %v898_v12  ;;  %v3564_v12 = vld [vmem:[#allocation20_spill] sm:$0xff] }
 0x117   : > { %1337 = vrot.lane.b32.xlu2 %v1315_v36, %s2252_s24  ;;  %v1017_v42 = vsel %vm672_vm7, %v1007_v9, %v908_v17  ;;  %v3048_v17 = vld [vmem:[%s2289_s17 + $0x20] sm:$0xff]  ;;  %v1320_v9 = vshll.u32 %v3067_v58, 16 }
 0x118   : > { %2007 = vmatmul.msk.bf16.gmra.mxu0 %vm742_vm12, %v726_v38  ;;  %v1246_v46 = vshll.u32 %v3048_v17, 16  ;;  %v1353_v41 = vrot.slane %v3048_v17, 1 }
 0x119   : > { %v932_v3 = vpop.permute.xlu2 %931  ;;  %v3087_v38 = vrot.slane %v1320_v9, 1  ;;  %v1324_v9 = vshrl.u32 %v3067_v58, 16 }
 0x11a   : > { %1615 = vrot.lane.b32.xlu1 %v1350_v23, %s2252_s24 }
 0x11b   : > { %1597 = vrot.lane.b32.xlu0 %v2598_v39, %s2250_s22 }
 0x11c   : > { %v906_v19 = vpop.permute.xlu1 %905 }
 0x11d   : > { %v904_v21 = vpop.permute.xlu0 %903  ;;  %v1015_v7 = vsel %vm672_vm7, %v1005_v15, %v906_v19  ;;  %v3562_v15 = vld [vmem:[#allocation15_spill] sm:$0xff] }
 0x11e   : > { %v1013_v55 = vsel %vm672_vm7, %v1003_v24, %v904_v21  ;;  %v3064_v24 = vrot.slane %v1246_v46, 1  ;;  %v3565_v19 = vld [vmem:[#allocation7_spill] sm:$0xff] }
 0x11f   : > { %1359 = vrot.lane.b32.xlu2 %v1352_v48, %s2253_s25  ;;  %v1023_v39 = vsel %vm683_vm8, %v1013_v55, %v926_v49 }
 0x121   : > { %v938_v33 = vpop.permute.xlu2 %937 }
 0x122   : > { %1637 = vrot.lane.b32.xlu1 %v1630_v61, %s2253_s25 }
 0x123   : > { %1607 = vrot.lane.b32.xlu0 %v1315_v36, %s2251_s23 }
 0x124   : > { %v924_v37 = vpop.permute.xlu1 %923 }
 0x125   : > { %v922_v13 = vpop.permute.xlu0 %921  ;;  %v1021_v59 = vsel %vm683_vm8, %v1011_v4, %v924_v37 }
 0x126   : > { %v1019_v45 = vsel %vm683_vm8, %v1009_v8, %v922_v13  ;;  %v1318_v8 = vor.u32 %v1316_v32, %v2989_v27  ;;  %v1633_v13 = vrot.slane %v3067_v58, 1  ;;  %v3569_v32 = vld [vmem:[#allocation21_spill] sm:$0xff] }
 0x127   : > { %1617 = vrot.lane.b32.xlu2 %v1352_v48, %s2252_s24  ;;  %v1029_v16 = vsel %vm694_vm9, %v1019_v45, %v932_v3 }
 0x128   : > { %v1323_v27 = vsel %vm279_vm0, %v1318_v8, %v3087_v38 }
 0x129   : > { %v944_v1 = vpop.permute.xlu2 %943 }
 0x12a   : > { %963 = vrot.lane.b32.xlu1 %v956_v18, %s2253_s25  ;;  %v1118_v18 = vld [vmem:[%s2289_s17 + $0x28] sm:$0xf] }
 0x12b   : > { %1639 = vrot.lane.b32.xlu0 %v1632_v44, %s2253_s25  ;;  %v1215_v40 = vunpack.c.l.b16 %v1118_v18  ;;  %v2092_v18 = vld [vmem:[%s2289_s17 + $0x60] sm:$0x3] }
 0x12c   : > { %v930_v10 = vpop.permute.xlu1 %929 }
 0x12d   : > { %v928_v35 = vpop.permute.xlu0 %927  ;;  %v1027_v22 = vsel %vm683_vm8, %v1017_v42, %v930_v10  ;;  %v3566_v10 = vld [vmem:[#allocation10_spill] sm:$0xff] }
 0x12e   : > { %v1025_v0 = vsel %vm683_vm8, %v1015_v7, %v928_v35  ;;  %v1354_v7 = vsel %vm480_vm1, %v1351_v60, %v1353_v41  ;;  %v1119_v35 = vld [vmem:[%s2289_s17 + $0x2c] sm:$0x1] }
 0x12f   : > { %1135 = vrot.lane.b32.xlu2 %v2421_v20, %s2246_s18  ;;  %v1035_v52 = vsel %vm694_vm9, %v1025_v0, %v938_v33 }
 0x131   : > { %v1132_v26 = vpop.permute.xlu2 %1131 }
 0x132   : > { %1163 = vrot.lane.b32.xlu1 %v3562_v15, %s2248_s20  ;;  %v1368_v55 = vsel %vm638_vm2, %v3565_v19, %v1132_v26  ;;  %v2054_v26 = vld [vmem:[%s2289_s17 + $0x60] sm:$0x1] }
 0x133   : > { %1153 = vrot.lane.b32.xlu0 %v3561_v6, %s2247_s19 }
 0x134   : > { %v936_v25 = vpop.permute.xlu1 %935 }
 0x135   : > { %v934_v30 = vpop.permute.xlu0 %933  ;;  %v1033_v20 = vsel %vm694_vm9, %v1023_v39, %v936_v25 }
 0x136   : > { %v1031_v29 = vsel %vm694_vm9, %v1021_v59, %v934_v30  ;;  %v1290_v30 = vunpack.c.l.b16 %v2054_v26 }
 0x137   : > { %1543 = vrot.lane.b32.xlu2 %v3561_v6, %s2246_s18  ;;  %v3055_v23 = vsel %vm705_vm11, %v1031_v29, %v944_v1  ;;  %v3567_v6 = vld [vmem:[#allocation16_spill] sm:$0xff] }
 0x139   : > { %v1160_v43 = vpop.permute.xlu2 %1159 }
 0x13a   : > { %1561 = vrot.lane.b32.xlu1 %v2476_v11, %s2247_s19  ;;  %v1249_v11 = vsel %vm279_vm0, %v1244_v47, %v3064_v24 }
 0x13b   : > { %1173 = vrot.lane.b32.xlu0 %v3563_v53, %s2249_s21 }
 0x13c   : > { %v942_v49 = vpop.permute.xlu1 %941 }
 0x13d   : > { %v940_v4 = vpop.permute.xlu0 %939  ;;  %v3075_v31 = vsel %vm705_vm11, %v1029_v16, %v942_v49 }
 0x13e   : > { %v3070_v36 = vsel %vm694_vm9, %v1027_v22, %v940_v4  ;;  %v1216_v22 = vunpack.c.l.b16 %v1119_v35  ;;  %v1250_v4 = vshrl.u32 %v3048_v17, 16 }
 0x13f   : > { %1191 = vrot.lane.b32.xlu2 %v3564_v12, %s2250_s22 }
 0x140   : > { %v3164_v25 = vpack.c.b16 %v1216_v22, %v1215_v40  ;;  %v1626_v22 = vunpack.c.l.b16 %v2092_v18 }
 0x141   : > { %v3077_v51 = vpop.permute.xlu2 %1169 }
 0x142   : > { %1265 = vrot.lane.b32.xlu1 %v1249_v11, %s2251_s23  ;;  %v1254_v49 = vshll.u32 %v3164_v25, 16  ;;  %v3568_v11 = vld [vmem:[#allocation14_spill] sm:$0xff] }
 0x143   : > { %1571 = vrot.lane.b32.xlu0 %v3563_v53, %s2248_s20  ;;  %v3570_v53 = vld [vmem:[#allocation12_spill] sm:$0xff] }
 0x144   : > { %v948_v3 = vpop.permute.xlu1 %947 }
 0x145   : > { %v946_v42 = vpop.permute.xlu0 %945  ;;  %v3095_v63 = vsel %vm705_vm11, %v1035_v52, %v948_v3  ;;  %v2053_v52 = vld [vmem:[%s2289_s17 + $0x5c] sm:$0xf]  ;;  %v3189_v3 = vrot.slane %v1254_v49, 1 }
 0x146   : > { %v3090_v48 = vsel %vm705_vm11, %v1033_v20, %v946_v42  ;;  %v1289_v15 = vunpack.c.l.b16 %v2053_v52  ;;  %v1252_v42 = vor.u32 %v1250_v4, %v3064_v24 }
 0x147   : > { %1581 = vrot.lane.b32.xlu2 %v3564_v12, %s2249_s21  ;;  %v1130_v12 = vld [vmem:[%s2289_s17 + $0x2c] sm:$0x3] }
 0x148   : > { %v3177_v46 = vpack.c.b16 %v1290_v30, %v1289_v15  ;;  %v1257_v24 = vsel %vm279_vm0, %v1252_v42, %v3189_v3 }
 0x149   : > { %v3098_v21 = vpop.permute.xlu2 %1187 }
 0x14a   : > { %1599 = vrot.lane.b32.xlu1 %v2606_v28, %s2250_s22  ;;  %v1634_v28 = vsel %vm480_vm1, %v1631_v14, %v1633_v13  ;;  %v3144_v14 = vld [vmem:[%s2289_s17 + $0x50] sm:$0xff]  ;;  %v1328_v8 = vshll.u32 %v3177_v46, 16 }
 0x14b   : > { %1339 = vrot.lane.b32.xlu0 %v1323_v27, %s2252_s24 }
 0x14c   : > { %v3112_v33 = vpop.permute.xlu1 %1133 }
 0x14d   : > { %v1150_v39 = vpop.permute.xlu0 %1149 }
 0x14e   : > { %v1378_v61 = vsel %vm650_vm3, %v1368_v55, %v1150_v39  ;;  %v1326_v39 = vor.u32 %v1324_v9, %v3087_v38 }
 0x14f   : > { %1361 = vrot.lane.b32.xlu2 %v1354_v7, %s2253_s25  ;;  %v1388_v56 = vsel %vm661_vm4, %v1378_v61, %v1160_v43  ;;  %v3171_v43 = vld [vmem:[%s2289_s17 + $0xb8] sm:$0xff]   ;;  %v3198_v61 = vrot.slane %v1328_v8, 1 }
 0x150   : > { %v1398_v35 = vsel %vm672_vm7, %v1388_v56, %v3077_v51 }
 0x151   : > { %v3118_v37 = vpop.permute.xlu2 %1171  ;;  %v1408_v52 = vsel %vm683_vm8, %v1398_v35, %v3098_v21 }
 0x152   : > { %1619 = vrot.lane.b32.xlu1 %v1354_v7, %s2252_s24 }
 0x153   : > { %1609 = vrot.lane.b32.xlu0 %v1323_v27, %s2251_s23  ;;  %v1346_v27 = vunpack.c.l.b16 %v1130_v12  ;;  %v3226_v12 = vpack.c.b16 %v1626_v22, %v1289_v15 }
 0x154   : > { %v3133_v59 = vpop.permute.xlu1 %1151 }
 0x155   : > { %v3128_v60 = vpop.permute.xlu0 %1539  ;;  %v3130_v45 = vpop.f32.mrf.mxu0  ;;  %v1635_v8 = vrot.slane %v3226_v12, 1  ;;  %v2233_v12 = vld [vmem:[%s2289_s17 + $0x48] sm:$0xff] }
 0x157   : > { %1641 = vrot.lane.b32.xlu2 %v1634_v28, %s2253_s25 }
 0x159   : > { %v3135_v16 = vpop.permute.xlu2 %1577 }
 0x15a   : > { %1137 = vrot.lane.b32.xlu1 %v3144_v14, %s2246_s18 }
 0x15b   : > { %965 = vrot.lane.b32.xlu0 %v958_v54, %s2253_s25  ;;  %v1347_v54 = vpack.c.b16 %v1346_v27, %v1215_v40 }
 0x15c   : > { %v1162_v34 = vpop.permute.xlu1 %1161 }
 0x15d   : > { %v3148_v1 = vpop.permute.xlu0 %1557  ;;  %v3150_v44 = vpop.f32.mrf.mxu0  ;;  %v3210_v38 = vrot.slane %v1347_v54, 1 }
 0x15f   : > { %1155 = vrot.lane.b32.xlu2 %v3566_v10, %s2247_s19  ;;  %v1356_v21 = vsel %vm480_vm1, %v1353_v41, %v3210_v38 }
 0x161   : > { %v3156_v0 = vpop.permute.xlu2 %1569 }
 0x162   : > { %1545 = vrot.lane.b32.xlu1 %v3566_v10, %s2246_s18  ;;  %v1331_v10 = vsel %vm279_vm0, %v1326_v39, %v3198_v61 }
 0x163   : > { %1165 = vrot.lane.b32.xlu0 %v3567_v6, %s2248_s20  ;;  %v2229_v6 = vld [vmem:[%s2289_s17 + $0xc] sm:$0xff] }
 0x164   : > { %v3175_v5 = vpop.permute.xlu1 %1567  ;;  %v1370_v51 = vsel %vm638_vm2, %v2229_v6, %v3112_v33  ;;  %v2230_v6 = vld [vmem:[%s2289_s17 + $0x38] sm:$0xff]  }
 0x165   : > { %v3166_v29 = vpop.permute.xlu0 %1541  ;;  %v3168_v20 = vpop.f32.mrf.mxu0 }
 0x167   : > { %1175 = vrot.lane.b32.xlu2 %v3171_v43, %s2249_s21 }
 0x169   : > { %v1358_v47 = vpop.permute.xlu2 %1357 }
 0x16a   : > { %1193 = vrot.lane.b32.xlu1 %v3569_v32, %s2250_s22 }
 0x16b   : > { %1563 = vrot.lane.b32.xlu0 %v3568_v11, %s2247_s19  ;;  %v1380_v11 = vsel %vm650_vm3, %v1370_v51, %v3133_v59  ;;  %v1648_v51 = vsel %vm638_vm2, %v2230_v6, %v3128_v60  ;;  %v3572_v60 = vld [vmem:[#allocation24_spill] sm:$0xff] }
 0x16c   : > { %v3195_v7 = vpop.permute.xlu1 %1559 }
 0x16d   : > { %v1262_v19 = vpop.permute.xlu0 %1261  ;;  %v3191_v55 = vpop.f32.mrf.mxu0 }
 0x16e   : > { %v1418_v56 = vsel %vm694_vm9, %v1408_v52, %v1262_v19 }
 0x16f   : > { %1573 = vrot.lane.b32.xlu2 %v3171_v43, %s2248_s20 }
 0x171   : > { %v1338_v28 = vpop.permute.xlu2 %1337 }
 0x172   : > { %1583 = vrot.lane.b32.xlu1 %v3569_v32, %s2249_s21  ;;  %v1390_v32 = vsel %vm661_vm4, %v1380_v11, %v1162_v34  ;;  %v2231_v11 = vld [vmem:[%s2289_s17 + $0x40] sm:$0xff] }
 0x173   : > { %1267 = vrot.lane.b32.xlu0 %v1257_v24, %s2251_s23  ;;  %v1400_v17 = vsel %vm672_vm7, %v1390_v32, %v3118_v37  ;;  %v1636_v37 = vsel %vm480_vm1, %v1633_v13, %v1635_v8 }
 0x174   : > { %v1336_v30 = vpop.permute.xlu1 %1335 }
 0x175   : > { %v1190_v26 = vpop.permute.xlu0 %1189  ;;  %v3214_v40 = vpop.f32.mrf.mxu0  ;;  %v1428_v4 = vsel %vm705_vm11, %v1418_v56, %v1336_v30  ;;  %v3571_v56 = vld [vmem:[#allocation17_spill] sm:$0xff] }
 0x176   : > { %v1438_v33 = vsel %vm716_vm10, %v1428_v4, %v1358_v47  ;;  %v1410_v59 = vsel %vm683_vm8, %v1400_v17, %v1190_v26  ;;  %v1658_v4 = vsel %vm650_vm3, %v1648_v51, %v3148_v1 }
 0x177   : > { %1341 = vrot.lane.b32.xlu2 %v1331_v10, %s2252_s24  ;;  %v1449_v9 = vshll.u32 %v1438_v33, 16  ;;  %v1447_v24 = vshrl.u32 %v1438_v33, 16  ;;  %v1650_v33 = vsel %vm638_vm2, %v2231_v11, %v3166_v29  ;;  %v961_v11 = vrot.slane %v3572_v60, 1 }
 0x178   : > { %v1660_v1 = vsel %vm650_vm3, %v1650_v33, %v3195_v7 }
 0x179   : > { %v1360_v49 = vpop.permute.xlu2 %1359  ;;  %v1451_v42 = vrot.slane %v1449_v9, 1 }
 0x17a   : > { %1363 = vrot.lane.b32.xlu1 %v1356_v21, %s2253_s25 }
 0x17b   : > { %1601 = vrot.lane.b32.xlu0 %v2620_v57, %s2250_s22  ;;  %v959_v57 = vrot.slane %v3171_v43, 1  ;;  %v1452_v58 = vor.u32 %v1451_v42, %v1447_v24  ;;  %v1670_v42 = vsel %vm661_vm4, %v1660_v1, %v3156_v0  ;;  %v1332_v0 = vshrl.u32 %v3177_v46, 16 }
 0x17c   : > { %v1264_v47 = vpop.permute.xlu1 %1263 }
 0x17d   : > { %v1596_v41 = vpop.permute.xlu0 %1595  ;;  %v3238_v15 = vpop.f32.mrf.mxu0  ;;  %v1420_v34 = vsel %vm694_vm9, %v1410_v59, %v1264_v47 }
 0x17e   : > { %v1430_v27 = vsel %vm705_vm11, %v1420_v34, %v1338_v28  ;;  %v960_v28 = vsel %vm480_vm1, %v957_v62, %v959_v57  ;;  %v1258_v34 = vshrl.u32 %v3164_v25, 16 }
 0x17f   : > { %1611 = vrot.lane.b32.xlu2 %v1331_v10, %s2251_s23  ;;  %v3251_v39 = vsel %vm716_vm10, %v1430_v27, %v1360_v49  ;;  %v1668_v49 = vsel %vm661_vm4, %v1658_v4, %v3175_v5 }
 0x180   : > { %v1453_v54 = vshll.u32 %v3251_v39, 16  ;;  %v1678_v32 = vsel %vm672_vm7, %v1668_v49, %v3135_v16  ;;  %v3573_v16 = vld [vmem:[#allocation13_spill] sm:$0xff] }
 0x181   : > { %v1618_v19 = vpop.permute.xlu2 %1617  ;;  %v1688_v5 = vsel %vm683_vm8, %v1678_v32, %v1596_v41 }
 0x182   : > { %1643 = vrot.lane.b32.xlu1 %v1636_v37, %s2253_s25  ;;  %v3261_v18 = vrot.slane %v1453_v54, 1 }
 0x183   : > { %1621 = vrot.lane.b32.xlu0 %v1356_v21, %s2252_s24 }
 0x184   : > { %v1606_v10 = vpop.permute.xlu1 %1605  ;;  %v1456_v22 = vsel %vm279_vm0, %v1452_v58, %v3261_v18  ;;  %v3574_v58 = vld [vmem:[#allocation23_spill] sm:$0xff] }
 0x185   : > { %v1580_v13 = vpop.permute.xlu0 %1579  ;;  %v3263_v35 = vpop.f32.mrf.mxu0  ;;  %2087 = vmatmul.msk.bf16.vlgmr.msra.gmra.mxu2 %vm742_vm12, %v1456_v22  ;;  %v1698_v9 = vsel %vm694_vm9, %v1688_v5, %v1606_v10  ;;  %v2232_v5 = vld [vmem:[%s2289_s17 + $0x14] sm:$0xff] }
 0x186   : > { %v1680_v41 = vsel %vm672_vm7, %v1670_v42, %v1580_v13 }
 0x187   : > { %967 = vrot.lane.b32.xlu2 %v960_v28, %s2253_s25  ;;  %v1260_v28 = vor.u32 %v1258_v34, %v3189_v3 }
 0x189   : > { %v3269_v52 = vpop.permute.xlu2 %1135 }
 0x18a   : > { %1157 = vrot.lane.b32.xlu1 %v3570_v53, %s2247_s19 }
 0x18b   : > { %1139 = vrot.lane.b32.xlu0 %v2452_v50, %s2246_s18 }
 0x18c   : > { %v1616_v30 = vpop.permute.xlu1 %1615 }
 0x18d   : > { %v1598_v62 = vpop.permute.xlu0 %1597  ;;  %v3275_v26 = vpop.f32.mrf.mxu0  ;;  %v1708_v29 = vsel %vm705_vm11, %v1698_v9, %v1616_v30  ;;  %v1372_v9 = vsel %vm638_vm2, %v2232_v5, %v3269_v52 }
 0x18e   : > { %v1690_v37 = vsel %vm683_vm8, %v1680_v41, %v1598_v62 }
 0x18f   : > { %1167 = vrot.lane.b32.xlu2 %v3571_v56, %s2248_s20  ;;  %v1334_v56 = vor.u32 %v1332_v0, %v3198_v61 }
 0x191   : > { %v3286_v21 = vpop.permute.xlu2 %1543 }
 0x192   : > { %1177 = vrot.lane.b32.xlu1 %v3572_v60, %s2249_s21 }
 0x193   : > { %1547 = vrot.lane.b32.xlu0 %v3570_v53, %s2246_s18 }
 0x194   : > { %v1638_v47 = vpop.permute.xlu1 %1637 }
 0x195   : > { %v1608_v17 = vpop.permute.xlu0 %1607  ;;  %v3301_v59 = vpop.f32.mrf.mxu0  ;;  %v1718_v7 = vsel %vm716_vm10, %v1708_v29, %v1638_v47 }
 0x196   : > { %v1729_v24 = vshll.u32 %v1718_v7, 16  ;;  %v1700_v54 = vsel %vm694_vm9, %v1690_v37, %v1608_v17  ;;  %v1727_v3 = vshrl.u32 %v1718_v7, 16  ;;  %v3575_v17 = vld [vmem:[#allocation25_spill] sm:$0xff]  ;;  %v1457_v37 = vshrl.u32 %v3251_v39, 16 }
 0x197   : > { %1565 = vrot.lane.b32.xlu2 %v3573_v16, %s2247_s19  ;;  %v1710_v13 = vsel %vm705_vm11, %v1700_v54, %v1618_v19 }
 0x198   : > { %v1731_v25 = vrot.slane %v1729_v24, 1  ;;  %v1459_v0 = vor.u32 %v1457_v37, %v3261_v18 }
 0x199   : > { %v1192_v27 = vpop.permute.xlu2 %1191 }
 0x19a   : > { %1575 = vrot.lane.b32.xlu1 %v3572_v60, %s2248_s20  ;;  %v1732_v30 = vor.u32 %v1731_v25, %v1727_v3 }
 0x19b   : > { %1195 = vrot.lane.b32.xlu0 %v3574_v58, %s2250_s22 }
 0x19c   : > { %v964_v62 = vpop.permute.xlu1 %963 }
 0x19d   : > { %v1640_v10 = vpop.permute.xlu0 %1639  ;;  %v791_v22 = vpop.f32.mrf.mxu0  ;;  %v1049_v51 = vsel %vm716_vm10, %v3075_v31, %v964_v62 }
 0x19e   : > { %v3321_v53 = vsel %vm716_vm10, %v1710_v13, %v1640_v10  ;;  %2040 = vmatmul.msk.bf16.vlgmr.msra.gmra.mxu1 %vm742_vm12, %v1049_v51 }
 0x19f   : > { %1269 = vrot.lane.b32.xlu2 %v1260_v28, %s2251_s23  ;;  %v1733_v6 = vshll.u32 %v3321_v53, 16  ;;  %v1737_v51 = vshrl.u32 %v3321_v53, 16 }
 0x1a1   : > { %v1582_v46 = vpop.permute.xlu2 %1581  ;;  %v1735_v19 = vrot.slane %v1733_v6, 1 }
 0x1a2   : > { %1343 = vrot.lane.b32.xlu1 %v1334_v56, %s2252_s24 }
 0x1a3   : > { %1585 = vrot.lane.b32.xlu0 %v3574_v58, %s2249_s21  ;;  %v1736_v4 = vsel %vm279_vm0, %v1732_v30, %v1735_v19 }
 0x1a4   : > { %2093 = vmatmul.msk.bf16.vlgmr.msra.gmra.mxu3 %vm742_vm12, %v1736_v4  ;;  %v1164_v31 = vpop.permute.xlu1 %1163 }
 0x1a5   : > { %v1154_v49 = vpop.permute.xlu0 %1153 }
 0x1a6   : > { %v1382_v60 = vsel %vm650_vm3, %v1372_v9, %v1154_v49 }
 0x1a7   : > { %1603 = vrot.lane.b32.xlu2 %v2615_v2, %s2250_s22  ;;  %v962_v2 = vsel %vm480_vm1, %v959_v57, %v961_v11  ;;  %v1392_v43 = vsel %vm661_vm4, %v1382_v60, %v1164_v31 }
 0x1a9   : > { %v1362_v61 = vpop.permute.xlu2 %1361 }
 0x1aa   : > { %1613 = vrot.lane.b32.xlu1 %v1334_v56, %s2251_s23  ;;  %v1739_v56 = vor.u32 %v1737_v51, %v1735_v19 }
 0x1ab   : > { %1365 = vrot.lane.b32.xlu0 %v3210_v38, %s2253_s25 }
 0x1ac   : > { %v1562_v32 = vpop.permute.xlu1 %1561 }
 0x1ad   : > { %v1174_v33 = vpop.permute.xlu0 %1173 }
 0x1ae   : > { %v1402_v16 = vsel %vm672_vm7, %v1392_v43, %v1174_v33 }
 0x1af   : > { %1623 = vrot.lane.b32.xlu2 %v3210_v38, %s2252_s24  ;;  %v1412_v52 = vsel %vm683_vm8, %v1402_v16, %v1192_v27 }
 0x1b1   : > { %v1642_v1 = vpop.permute.xlu2 %1641 }
 0x1b2   : > { %969 = vrot.lane.b32.xlu1 %v962_v2, %s2253_s25  ;;  %v2234_v2 = vld [vmem:[%s2289_s17 + $0x1c] sm:$0xff] }
 0x1b3   : > { %1645 = vrot.lane.b32.xlu0 %v1635_v8, %s2253_s25  ;;  %v1652_v8 = vsel %vm638_vm2, %v2233_v12, %v3286_v21 }
 0x1b4   : > { %v1266_v29 = vpop.permute.xlu1 %1265  ;;  %v1662_v24 = vsel %vm650_vm3, %v1652_v8, %v1562_v32 }
 0x1b5   : > { %v1572_v38 = vpop.permute.xlu0 %1571  ;;  %v1422_v47 = vsel %vm694_vm9, %v1412_v52, %v1266_v29 }
 0x1b6   : > { %v1672_v27 = vsel %vm661_vm4, %v1662_v24, %v1572_v38 }
 0x1b7   : > { %949 = vrot.lane.b32.xlu2 %v3575_v17, %s2252_s24  ;;  %v1682_v21 = vsel %vm672_vm7, %v1672_v27, %v1582_v46 }
 0x1b9   : > { %v1156_v57 = vpop.permute.xlu2 %1155 }
 0x1bb   : > { %971 = vrot.lane.b32.xlu0 %v961_v11, %s2253_s25 }
 0x1bc   : > { %v1600_v7 = vpop.permute.xlu1 %1599 }
 0x1bd   : > { %v1340_v34 = vpop.permute.xlu0 %1339  ;;  %v1692_v10 = vsel %vm683_vm8, %v1682_v21, %v1600_v7 }
 0x1be   : > { %v1432_v42 = vsel %vm705_vm11, %v1422_v47, %v1340_v34 }
 0x1bf   : > { %v1442_v41 = vsel %vm716_vm10, %v1432_v42, %v1362_v61 }
 0x1c0   : > { %v1460_v54 = vshll.u32 %v1442_v41, 16  ;;  %v1464_v34 = vshrl.u32 %v1442_v41, 16 }
 0x1c1   : > { %v1176_v28 = vpop.permute.xlu2 %1175 }
 0x1c2   : > { %v1462_v58 = vrot.slane %v1460_v54, 1 }
 0x1c4   : > { %v1463_v25 = vsel %vm279_vm0, %v1459_v0, %v1462_v58  ;;  %v1620_v22 = vpop.permute.xlu1 %1619  ;;  %v1466_v54 = vor.u32 %v1464_v34, %v1462_v58 }
 0x1c5   : > { %v1610_v13 = vpop.permute.xlu0 %1609  ;;  %2088 = vmatmul.msk.bf16.gmra.mxu2 %vm742_vm12, %v1463_v25 }
 0x1c6   : > { %v1702_v39 = vsel %vm694_vm9, %v1692_v10, %v1610_v13 }
 0x1c7   : > { %v1712_v62 = vsel %vm705_vm11, %v1702_v39, %v1620_v22 }
 0x1c8   : > { %v1722_v3 = vsel %vm716_vm10, %v1712_v62, %v1642_v1 }
 0x1c9   : > { %v1574_v6 = vpop.permute.xlu2 %1573  ;;  %v1740_v18 = vshll.u32 %v1722_v3, 16  ;;  %v1744_v10 = vshrl.u32 %v1722_v3, 16 }
 0x1cb   : > { %v1742_v46 = vrot.slane %v1740_v18, 1 }
 0x1cc   : > { %v1138_v49 = vpop.permute.xlu1 %1137 }
 0x1cd   : > { %v966_v30 = vpop.permute.xlu0 %965  ;;  %v1743_v4 = vsel %vm279_vm0, %v1739_v56, %v1742_v46  ;;  %v1374_v19 = vsel %vm638_vm2, %v2234_v2, %v1138_v49  ;;  %v1746_v22 = vor.u32 %v1744_v10, %v1742_v46 }
 0x1ce   : > { %2094 = vmatmul.msk.bf16.gmra.mxu3 %vm742_vm12, %v1743_v4  ;;  %v1051_v31 = vsel %vm716_vm10, %v3055_v23, %v966_v30  ;;  %v1384_v60 = vsel %vm650_vm3, %v1374_v19, %v1156_v57 }
 0x1cf   : > { %2041 = vmatmul.msk.bf16.gmra.mxu1 %vm742_vm12, %v1051_v31 }
 0x1d1   : > { %v1342_v61 = vpop.permute.xlu2 %1341 }
 0x1d4   : > { %v1546_v33 = vpop.permute.xlu1 %1545 }
 0x1d5   : > { %v1166_v11 = vpop.permute.xlu0 %1165  ;;  %v1654_v43 = vsel %vm638_vm2, %v3144_v14, %v1546_v33 }
 0x1d6   : > { %v1394_v38 = vsel %vm661_vm4, %v1384_v60, %v1166_v11 }
 0x1d7   : > { %v1404_v29 = vsel %vm672_vm7, %v1394_v38, %v1176_v28 }
 0x1d9   : > { %v1612_v32 = vpop.permute.xlu2 %1611 }
 0x1dc   : > { %v1194_v1 = vpop.permute.xlu1 %1193 }
 0x1dd   : > { %v1564_v53 = vpop.permute.xlu0 %1563  ;;  %v1414_v16 = vsel %vm683_vm8, %v1404_v29, %v1194_v1 }
 0x1de   : > { %v1664_v12 = vsel %vm650_vm3, %v1654_v43, %v1564_v53 }
 0x1df   : > { %v1674_v42 = vsel %vm661_vm4, %v1664_v12, %v1574_v6 }
 0x1e1   : > { %v968_v5 = vpop.permute.xlu2 %967 }
 0x1e2   : > { %v1053_v9 = vsel %vm716_vm10, %v3090_v48, %v968_v5 }
 0x1e3   : > { %2042 = vmatmul.msk.bf16.gmra.mxu1 %vm742_vm12, %v1053_v9 }
 0x1e4   : > { %v1584_v17 = vpop.permute.xlu1 %1583 }
 0x1e5   : > { %v1268_v23 = vpop.permute.xlu0 %1267  ;;  %v1684_v37 = vsel %vm672_vm7, %v1674_v42, %v1584_v17 }
 0x1e6   : > { %v1424_v52 = vsel %vm694_vm9, %v1414_v16, %v1268_v23 }
 0x1e7   : > { %v1434_v8 = vsel %vm705_vm11, %v1424_v52, %v1342_v61  ;;  %v3576_v61 = vld [vmem:[#allocation9_spill] sm:$0xff] }
 0x1e9   : > { %v1168_v62 = vpop.permute.xlu2 %1167 }
 0x1ec   : > { %v1364_v47 = vpop.permute.xlu1 %1363 }
 0x1ed   : > { %v1602_v48 = vpop.permute.xlu0 %1601  ;;  %v1444_v57 = vsel %vm716_vm10, %v1434_v8, %v1364_v47 }
 0x1ee   : > { %v1467_v7 = vshll.u32 %v1444_v57, 16  ;;  %v1694_v14 = vsel %vm683_vm8, %v1684_v37, %v1602_v48  ;;  %v1471_v52 = vshrl.u32 %v1444_v57, 16 }
 0x1ef   : > { %v1704_v0 = vsel %vm694_vm9, %v1694_v14, %v1612_v32 }
 0x1f0   : > { %v1469_v24 = vrot.slane %v1467_v7, 1 }
 0x1f1   : > { %v1566_v56 = vpop.permute.xlu2 %1565 }
 0x1f2   : > { %v1470_v28 = vsel %vm279_vm0, %v1466_v54, %v1469_v24  ;;  %v1473_v12 = vor.u32 %v1471_v52, %v1469_v24 }
 0x1f3   : > { %2089 = vmatmul.msk.bf16.gmra.mxu2 %vm742_vm12, %v1470_v28 }
 0x1f4   : > { %v1644_v25 = vpop.permute.xlu1 %1643 }
 0x1f5   : > { %v1622_v27 = vpop.permute.xlu0 %1621 }
 0x1f6   : > { %v1714_v21 = vsel %vm705_vm11, %v1704_v0, %v1622_v27 }
 0x1f7   : > { %v1724_v41 = vsel %vm716_vm10, %v1714_v21, %v1644_v25 }
 0x1f8   : > { %v1747_v13 = vshll.u32 %v1724_v41, 16  ;;  %v1751_v27 = vshrl.u32 %v1724_v41, 16 }
 0x1f9   : > { %v1270_v31 = vpop.permute.xlu2 %1269 }
 0x1fa   : > { %v1749_v39 = vrot.slane %v1747_v13, 1 }
 0x1fc   : > { %v1750_v6 = vsel %vm279_vm0, %v1746_v22, %v1749_v39  ;;  %v1158_v51 = vpop.permute.xlu1 %1157  ;;  %v1753_v22 = vor.u32 %v1751_v27, %v1749_v39 }
 0x1fd   : > { %v1140_v58 = vpop.permute.xlu0 %1139  ;;  %2095 = vmatmul.msk.bf16.gmra.mxu3 %vm742_vm12, %v1750_v6 }
 0x1fe   : > { %v1376_v11 = vsel %vm638_vm2, %v3576_v61, %v1140_v58 }
 0x1ff   : > { %v1386_v3 = vsel %vm650_vm3, %v1376_v11, %v1158_v51 }
 0x200   : > { %v1396_v32 = vsel %vm661_vm4, %v1386_v3, %v1168_v62 }
 0x201   : > { %v1604_v19 = vpop.permute.xlu2 %1603 }
 0x204   : > { %v1178_v30 = vpop.permute.xlu1 %1177 }
 0x205   : > { %v1548_v18 = vpop.permute.xlu0 %1547  ;;  %v1406_v53 = vsel %vm672_vm7, %v1396_v32, %v1178_v30 }
 0x206   : > { %v1656_v1 = vsel %vm638_vm2, %v2452_v50, %v1548_v18 }
 0x207   : > { %v1666_v5 = vsel %vm650_vm3, %v1656_v1, %v1566_v56 }
 0x208   : > { %v1505_v42 = vpop.f32.mrf.mxu2 }
 0x209   : > { %v1624_v37 = vpop.permute.xlu2 %1623 }
 0x20c   : > { %v1576_v49 = vpop.permute.xlu1 %1575 }
 0x20d   : > { %v1196_v4 = vpop.permute.xlu0 %1195  ;;  %v1676_v60 = vsel %vm661_vm4, %v1666_v5, %v1576_v49 }
 0x20e   : > { %v1416_v2 = vsel %vm683_vm8, %v1406_v53, %v1196_v4 }
 0x20f   : > { %v1426_v9 = vsel %vm694_vm9, %v1416_v2, %v1270_v31 }
 0x210   : > { %v1507_v41 = vpop.f32.mrf.mxu2 }
 0x211   : > { %v950_v31 = vpop.permute.xlu2 %949 }
 0x212   : > { %v1047_v3 = vsel %vm705_vm11, %v3070_v36, %v950_v31 }
 0x214   : > { %v1344_v46 = vpop.permute.xlu1 %1343 }
 0x215   : > { %v1586_v33 = vpop.permute.xlu0 %1585  ;;  %v1436_v23 = vsel %vm705_vm11, %v1426_v9, %v1344_v46 }
 0x216   : > { %v1686_v29 = vsel %vm672_vm7, %v1676_v60, %v1586_v33 }
 0x217   : > { %v1696_v8 = vsel %vm683_vm8, %v1686_v29, %v1604_v19 }
 0x21b   : > { %v1077_v38 = vpop.f32.mrf.mxu1 }
 0x21c   : > { %v1614_v16 = vpop.permute.xlu1 %1613  ;;  %v1101_v47 = vmax.f32 %v3130_v45, %v1077_v38  ;;  %v3431_v45 = vld [vmem:[%s3490_s2] ss:$0 sm:$0xff] }
 0x21d   : > { %v1366_v17 = vpop.permute.xlu0 %1365  ;;  %v1706_v34 = vsel %vm694_vm9, %v1696_v8, %v1614_v16 }
 0x21e   : > { %v1446_v43 = vsel %vm716_vm10, %v1436_v23, %v1366_v17  ;;  %v1716_v54 = vsel %vm705_vm11, %v1706_v34, %v1624_v37  ;;  %v1529_v28 = vmax.f32 %v1101_v47, %v1505_v42 }
 0x21f   : > { %v1474_v50 = vshll.u32 %v1446_v43, 16 }
 0x221   : > { %v1476_v48 = vrot.slane %v1474_v50, 1 }
 0x223   : > { %v1477_v7 = vsel %vm279_vm0, %v1473_v12, %v1476_v48  ;;  %v1079_v0 = vpop.f32.mrf.mxu1 }
 0x224   : > { %2090 = vmatmul.msk.bf16.gmra.mxu2 %vm742_vm12, %v1477_v7  ;;  %v970_v24 = vpop.permute.xlu1 %969  ;;  %v1102_v6 = vmax.f32 %v3150_v44, %v1079_v0  ;;  %v1478_v44 = vshrl.u32 %v1446_v43, 16 }
 0x225   : > { %v1646_v14 = vpop.permute.xlu0 %1645  ;;  %v1055_v25 = vsel %vm716_vm10, %v3095_v63, %v970_v24 }
 0x226   : > { %v1726_v57 = vsel %vm716_vm10, %v1716_v54, %v1646_v14  ;;  %2043 = vmatmul.msk.bf16.gmra.mxu1 %vm742_vm12, %v1055_v25  ;;  %v1530_v39 = vmax.f32 %v1102_v6, %v1507_v41  ;;  %v1480_v49 = vor.u32 %v1478_v44, %v1476_v48 }
 0x227   : > { %v1754_v21 = vshll.u32 %v1726_v57, 16  ;;  %v1785_v10 = vpop.f32.mrf.mxu3  ;;  %v1758_v32 = vshrl.u32 %v1726_v57, 16 }
 0x228   : > { %v1809_v13 = vmax.f32 %v1529_v28, %v1785_v10 }
 0x229   : > { %v1756_v62 = vrot.slane %v1754_v21, 1 }
 0x22a   : > { %v1822_v58 = vadd.f32 %v3431_v45, %v1809_v13 }
 0x22b   : > { %v1757_v51 = vsel %vm279_vm0, %v1753_v22, %v1756_v62  ;;  %v1760_v53 = vor.u32 %v1758_v32, %v1756_v62 }
 0x22c   : > { %v1831_v18 = vmax.f32 %v1822_v58, 0.0  ;;  %2096 = vmatmul.msk.bf16.gmra.mxu3 %vm742_vm12, %v1757_v51 }
 0x22d   : > { %v972_v61 = vpop.permute.xlu0 %971 }
 0x22e   : > { %v1840_v63 = vpack.c.bf16 %v1831_v18, %v1831_v18  ;;  %v1057_v46 = vsel %vm716_vm10, %v1047_v3, %v972_v61 }
 0x22f   : > { %v1787_v56 = vpop.f32.mrf.mxu3 }
 0x230   : > { %1850 = vst.msk [vmem:[%s3444_s10] sm:$0xf] %vm1849_vm13, %v1840_v63  ;;  %v1810_v30 = vmax.f32 %v1530_v39, %v1787_v56 }
 0x232   : > { %v1823_v4 = vadd.f32 %v3431_v45, %v1810_v30 }
 0x234   : > { %v1832_v11 = vmax.f32 %v1823_v4, 0.0  ;;  %2091 = vmatmul.msk.bf16.gmra.mxu2 %vm742_vm12, %v1480_v49 }
 0x236   : > { %v1841_v33 = vpack.c.bf16 %v1832_v11, %v1832_v11  ;;  %2044 = vmatmul.msk.bf16.gmra.mxu1 %vm742_vm12, %v1057_v46 }
 0x238   : > { %1851 = vst.msk [vmem:[%s3444_s10 + $0x4] sm:$0xf] %vm1849_vm13, %v1841_v33 }
 0x23c   : > { %2097 = vmatmul.msk.bf16.gmra.mxu3 %vm742_vm12, %v1760_v53 }
 0x248   : > { %v1510_v1 = vpop.f32.mrf.mxu2 }
 0x24c   : > { %v1082_v2 = vpop.f32.mrf.mxu1 }
 0x24d   : > { %v1103_v19 = vmax.f32 %v3168_v20, %v1082_v2 }
 0x24f   : > { %v1531_v5 = vmax.f32 %v1103_v19, %v1510_v1 }
 0x250   : > { %v1512_v17 = vpop.f32.mrf.mxu2 }
 0x251   : > { %v1790_v9 = vpop.f32.mrf.mxu3 }
 0x252   : > { %v1811_v36 = vmax.f32 %v1531_v5, %v1790_v9 }
 0x254   : > { %v1824_v60 = vadd.f32 %v3431_v45, %v1811_v36  ;;  %v1084_v23 = vpop.f32.mrf.mxu1 }
 0x255   : > { %v1104_v38 = vmax.f32 %v3191_v55, %v1084_v23 }
 0x256   : > { %v1833_v29 = vmax.f32 %v1824_v60, 0.0 }
 0x257   : > { %v1532_v43 = vmax.f32 %v1104_v38, %v1512_v17 }
 0x258   : > { %v1842_v16 = vpack.c.bf16 %v1833_v29, %v1833_v29 }
 0x259   : > { %v1792_v52 = vpop.f32.mrf.mxu3 }
 0x25a   : > { %1852 = vst.msk [vmem:[%s3444_s10 + $0x8] sm:$0xf] %vm1849_vm13, %v1842_v16  ;;  %v1812_v50 = vmax.f32 %v1532_v43, %v1792_v52 }
 0x25c   : > { %v1825_v12 = vadd.f32 %v3431_v45, %v1812_v50 }
 0x25e   : > { %v1834_v20 = vmax.f32 %v1825_v12, 0.0 }
 0x260   : > { %v1843_v48 = vpack.c.bf16 %v1834_v20, %v1834_v20  ;;  %v1087_v8 = vpop.f32.mrf.mxu1 }
 0x261   : > { %v1105_v34 = vmax.f32 %v3214_v40, %v1087_v8 }
 0x262   : > { %1853 = vst.msk [vmem:[%s3444_s10 + $0xc] sm:$0xf] %vm1849_vm13, %v1843_v48 }
 0x268   : > { %v1089_v37 = vpop.f32.mrf.mxu1 }
 0x269   : > { %v1106_v57 = vmax.f32 %v3238_v15, %v1089_v37 }
 0x276   : > { %v1515_v47 = vpop.f32.mrf.mxu2 }
 0x277   : > { %v1533_v55 = vmax.f32 %v1105_v34, %v1515_v47 }
 0x27e   : > { %v1517_v54 = vpop.f32.mrf.mxu2 }
 0x27f   : > { %v1534_v28 = vmax.f32 %v1106_v57, %v1517_v54 }
 0x280   : > { %v1795_v42 = vpop.f32.mrf.mxu3 }
 0x281   : > { %v1813_v7 = vmax.f32 %v1533_v55, %v1795_v42 }
 0x283   : > { %v1826_v14 = vadd.f32 %v3431_v45, %v1813_v7 }
 0x285   : > { %v1835_v24 = vmax.f32 %v1826_v14, 0.0 }
 0x287   : > { %v1844_v27 = vpack.c.bf16 %v1835_v24, %v1835_v24 }
 0x288   : > { %v1797_v0 = vpop.f32.mrf.mxu3 }
 0x289   : > { %1854 = vst.msk [vmem:[%s3444_s10 + $0x10] sm:$0xf] %vm1849_vm13, %v1844_v27  ;;  %v1814_v21 = vmax.f32 %v1534_v28, %v1797_v0 }
 0x28b   : > { %v1827_v25 = vadd.f32 %v3431_v45, %v1814_v21 }
 0x28d   : > { %v1836_v40 = vmax.f32 %v1827_v25, 0.0 }
 0x28f   : > { %v1845_v10 = vpack.c.bf16 %v1836_v40, %v1836_v40 }
 0x291   : > { %1855 = vst.msk [vmem:[%s3444_s10 + $0x14] sm:$0xf] %vm1849_vm13, %v1845_v10 }
 0x2a3   : > { %v1092_v13 = vpop.f32.mrf.mxu1 }
 0x2a4   : > { %v1107_v62 = vmax.f32 %v3263_v35, %v1092_v13 }
 0x2a7   : > { %v1520_v22 = vpop.f32.mrf.mxu2 }
 0x2a8   : > { %v1535_v15 = vmax.f32 %v1107_v62, %v1520_v22 }
 0x2ab   : > { %v1094_v6 = vpop.f32.mrf.mxu1 }
 0x2ac   : > { %v1108_v41 = vmax.f32 %v3275_v26, %v1094_v6 }
 0x2af   : > { %v1522_v58 = vpop.f32.mrf.mxu2  ;;  %v1800_v51 = vpop.f32.mrf.mxu3 }
 0x2b0   : > { %v1815_v18 = vmax.f32 %v1535_v15, %v1800_v51  ;;  %v1536_v44 = vmax.f32 %v1108_v41, %v1522_v58 }
 0x2b2   : > { %v1828_v63 = vadd.f32 %v3431_v45, %v1815_v18 }
 0x2b3   : > { %v1097_v56 = vpop.f32.mrf.mxu1 }
 0x2b4   : > { %v1837_v39 = vmax.f32 %v1828_v63, 0.0  ;;  %v1109_v31 = vmax.f32 %v3301_v59, %v1097_v56 }
 0x2b6   : > { %v1846_v30 = vpack.c.bf16 %v1837_v39, %v1837_v39 }
 0x2b7   : > { %v1525_v4 = vpop.f32.mrf.mxu2  ;;  %v1802_v49 = vpop.f32.mrf.mxu3 }
 0x2b8   : > { %1856 = vst.msk [vmem:[%s3444_s10 + $0x18] sm:$0xf] %vm1849_vm13, %v1846_v30  ;;  %v1816_v35 = vmax.f32 %v1536_v44, %v1802_v49  ;;  %v1537_v26 = vmax.f32 %v1109_v31, %v1525_v4 }
 0x2ba   : > { %v1829_v61 = vadd.f32 %v3431_v45, %v1816_v35 }
 0x2bb   : > { %v1099_v3 = vpop.f32.mrf.mxu1 }
 0x2bc   : > { %v1838_v11 = vmax.f32 %v1829_v61, 0.0 }
 0x2be   : > { %v1847_v33 = vpack.c.bf16 %v1838_v11, %v1838_v11 }
 0x2bf   : > { %v1527_v46 = vpop.f32.mrf.mxu2  ;;  %v1805_v32 = vpop.f32.mrf.mxu3 }
 0x2c0   : > { %1857 = vst.msk [vmem:[%s3444_s10 + $0x1c] sm:$0xf] %vm1849_vm13, %v1847_v33  ;;  %v1817_v53 = vmax.f32 %v1537_v26, %v1805_v32 }
 0x2c2   : > { %v1830_v1 = vadd.f32 %v3431_v45, %v1817_v53 }
 0x2c4   : > { %v1839_v2 = vmax.f32 %v1830_v1, 0.0 }
 0x2c6   : > { %v1848_v19 = vpack.c.bf16 %v1839_v2, %v1839_v2 }
 0x2c7   : > { %v1807_v5 = vpop.f32.mrf.mxu3 }
 0x2c8   : > { %1858 = vst.msk [vmem:[%s3444_s10 + $0x20] sm:$0xf] %vm1849_vm13, %v1848_v19 }
 0x2c9 PF: > { %s13_s12 = sadd.s32 1, %s2244_s12  }
 0x2ca   : > { %p10_p4 = scmp.ge.s32.totalorder %s13_s12, 4  }
 0x2cc   :  { %12 = sbr.rel (!%p10_p4) target bundleno = 1 (0x1), region = 65 }

// kernel: simple_cnn_forward.4
= control target key start
LH: loop header
LB: loop body
LE: loop exit
PB: predicated region body
PF: predicated region fallthrough
CT: control target
= control target key end

     0   :  { %s1285_s12 = smov 0   ;;  %s1792_s0 = inlined_call_operand.vmem [shape: bf16[2,4,35,16], index: 0, kind: input, shape index: {}]   ;;  %s1793_s1 = inlined_call_operand.vmem [shape: bf16[144,32], index: 1, kind: input, shape index: {}]   ;;  %s1794_s2 = inlined_call_operand.vmem [shape: f32[1,32], index: 2, kind: input, shape index: {}]   ;;  %s1795_s3 = inlined_call_operand.vmem [shape: bf16[2,20,32], index: 3, kind: output, shape index: {}]  }
   0x1 LB: > { %s1117_s13 = sadd.s32 4294967295, %s1256_s12   ;;  %p1121_p0 = scmp.ge.s32.totalorder %s1256_s12, 1  ;;  %s1256_s12 = sphi %s1285_s12, %s13_s12  }
   0x2   : > { %p137_p1 = scmp.lt.s32.totalorder %s1256_s12, 3 }
   0x4   : > { %p138_p2 = pnand %p1121_p0, %p137_p1 }
   0x5   : > { %p161_p3 = scmp.lt.s32.totalorder (!%p138_p2), %s1117_s13, 1  ;;  %s1258_s18 = smov (!%p138_p2), 16  }
   0x6   : > { %141 = sbr.rel (%p138_p2) target bundleno = 438 (0x1b6), region = 32  ;;  %s1259_s19 = smov (!%p138_p2), 80  }
   0x7   : > { %s1260_s20 = smov (!%p138_p2), 64   ;;  %s1261_s21 = smov (!%p138_p2), 32  }
   0x8   : > { %s1262_s22 = smov (!%p138_p2), 112   ;;  %s1263_s23 = smov (!%p138_p2), 96  }
   0x9   : > { %s1264_s24 = smov (!%p138_p2), 48  }
   0xb   : > { %s1797_s13 = smov (!%p161_p3, %s1117_s13), 1  ;;  %vm307_vm0 = vcmask 1044480   ;;  %vm221_vm1 = vsmask.f32 7424  ;;  %vm251_vm2 = vsmask.f32 5376 }
   0xc   : > { %s1232_s14 = smul.u32 80, %s1797_s13  ;;  %vm719_vm3 = vsmask.f32 1280  ;;  %vm379_vm4 = vcmask 130048   ;;  %vm385_vm5 = vcmask 261120   ;;  %vm390_vm6 = vcmask 392192  }
   0xd   : > { %vm395_vm7 = vcmask 523264   ;;  %vm405_vm8 = vcmask 785408   ;;  %vm400_vm9 = vcmask 654336   ;;  %vm410_vm10 = vcmask 916480  }
   0xe   : > { %s1299_s17 = scalar_lea.vmem %s1792_s0, %s1232_s14  ;;  %vm771_vm11 = vcmask 1040384   ;;  %vm1060_vm12 = vcmask 254976   ;;  %vm1057_vm13 = vcmask 257024  }
   0xf   : > { %v1302_v0 = vld [vmem:[%s1299_s17 + $0x3c] sm:$0xff]   ;;  %v1189_v7 = vld [vmem:[%s1299_s17 + $0x14] sm:$0x8]  ;;  %v1315_v13 = vld [vmem:[%s1299_s17 + $0x4] sm:$0xff]  }
  0x10   : > { %v1138_v1 = vld [vmem:[%s1299_s17 + $0x3c] sm:$0xc]  ;;  %v210_v3 = vunpack.c.h.b16 %v1302_v0  ;;  %v1134_v6 = vld [vmem:[%s1299_s17 + $0x20] sm:$0x1]  ;;  %v1131_v8 = vld [vmem:[%s1299_s17 + $0x14] sm:$0xc]  ;;  %v569_v11 = vunpack.c.l.b16 %v1189_v7  ;;  %v246_v17 = vunpack.c.l.b16 %v1315_v13  ;;  %v247_v18 = vunpack.c.h.b16 %v1315_v13  ;;  %214 = vrot.lane.b32.xlu0 %v1302_v0, %s1258_s18 }
  0x11   : > { %v1306_v2 = vld [vmem:[%s1299_s17 + $0x18] sm:$0xff]   ;;  %v347_v4 = vunpack.c.l.b16 %v1138_v1  ;;  %v280_v10 = vunpack.c.l.b16 %v1134_v6  ;;  %v277_v12 = vunpack.c.l.b16 %v1131_v8  ;;  %v184_v14 = vld [vmem:[%s1299_s17 + $0xc] sm:$0x1]  ;;  %v190_v15 = vld [vmem:[%s1299_s17] sm:$0x8]  ;;  %v542_v53 = vshrl.u32 %v1302_v0, 16 }
  0x12   : > { %v1219_v5 = vunpack.c.l.b16 %v1306_v2  ;;  %v1220_v9 = vunpack.c.h.b16 %v1306_v2  ;;  %v1326_v19 = vld [vmem:[%s1299_s17 + $0x28] sm:$0xff]   ;;  %v1130_v20 = vld [vmem:[%s1299_s17 + $0x30] sm:$0x7]  ;;  %v248_v24 = vunpack.c.l.b16 %v184_v14  ;;  %v1202_v26 = vld [vmem:[%s1299_s17 + $0x30] sm:$0x10]  ;;  %v305_v27 = vunpack.c.l.b16 %v190_v15 }
  0x13   : > { %v1321_v16 = vpack.c.b16 %v210_v3, %v347_v4  ;;  %v1144_v25 = vld [vmem:[%s1299_s17 + $0x30] sm:$0xf]  ;;  %v219_v28 = vunpack.c.l.b16 %v1130_v20  ;;  %v223_v29 = vshrl.u32 %v1326_v19, 16  ;;  %v225_v30 = vshll.u32 %v1326_v19, 16  ;;  %v1141_v31 = vld [vmem:[%s1299_s17 + $0x28] sm:$0x8] }
  0x14   : > { %v1331_v21 = vpack.c.b16 %v280_v10, %v1220_v9  ;;  %v1333_v22 = vpack.c.b16 %v1219_v5, %v569_v11  ;;  %v1335_v23 = vpack.c.b16 %v1219_v5, %v277_v12  ;;  %v1188_v32 = vld [vmem:[%s1299_s17 + $0x44] sm:$0x7]  ;;  %v1349_v35 = vpack.c.b16 %v248_v24, %v247_v18  ;;  %v1203_v46 = vld [vmem:[%s1299_s17 + $0x44] sm:$0x10]  ;;  %v181_v10 = vld [vmem:[%s1299_s17] sm:$0xc] }
  0x15   : > { %v1216_v36 = vunpack.c.h.b16 %v1326_v19  ;;  %v1354_v37 = vpack.c.b16 %v246_v17, %v305_v27  ;;  %v1356_v38 = vpack.c.b16 %v219_v28, %v219_v28  ;;  %v227_v39 = vrot.slane %v225_v30, 1  ;;  %v1148_v45 = vld [vmem:[%s1299_s17 + $0x44] sm:$0xf] }
  0x16   : > { %v571_v33 = vrot.slane %v1333_v22, 3  ;;  %v572_v34 = vrot.slane %v1331_v21, 3  ;;  %v1358_v40 = vor.u32 %v1202_v26, %v1144_v25  ;;  %v1364_v42 = vrot.slane %v1349_v35, 3 }
  0x17   : > { %v374_v43 = vunpack.c.l.b16 %v1141_v31  ;;  %v539_v44 = vunpack.c.l.b16 %v1188_v32  ;;  %v308_v47 = vrot.slane %v1354_v37, 3  ;;  %v228_v48 = vor.u32 %v227_v39, %v223_v29 }
  0x18   : > { %v573_v41 = vsel %vm307_vm0, %v571_v33, %v572_v34  ;;  %v230_v49 = vshll.u32 %v1356_v38, 16  ;;  %v1372_v50 = vrot.slane %v1358_v40, 3  ;;  %v544_v54 = vshll.u32 %v1302_v0, 16 }
  0x19   : > { %574 = vrot.lane.b32.xlu2 %v573_v41, %s1259_s19  ;;  %v1376_v51 = vpack.c.b16 %v1216_v36, %v374_v43  ;;  %v1378_v52 = vpack.c.b16 %v539_v44, %v539_v44  ;;  %v1384_v55 = vsel %vm307_vm0, %v308_v47, %v1364_v42  ;;  %v1388_v57 = vor.u32 %v1203_v46, %v1148_v45 }
  0x1a   : > { %v1386_v56 = vrot.slane %v230_v49, 1  ;;  %v353_v58 = vshrl.u32 %v1321_v16, 16  ;;  %564 = vrot.lane.b32.xlu1 %v1384_v55, %s1260_s20  ;;  %v546_v60 = vrot.slane %v544_v54, 1  ;;  %v356_v62 = vshll.u32 %v1321_v16, 16 }
  0x1b   : > { %v376_v59 = vrot.slane %v1376_v51, 3  ;;  %v549_v61 = vshll.u32 %v1378_v52, 16  ;;  %v361_v4 = vshrl.u32 %v1388_v57, 16  ;;  %v364_v5 = vshll.u32 %v1388_v57, 16 }
  0x1c   : > { %v233_v63 = vsel %vm221_vm1, %v228_v48, %v1386_v56  ;;  %v355_v1 = vrot.slane %v353_v58, 2  ;;  %v547_v6 = vor.u32 %v546_v60, %v542_v53  ;;  %v358_v8 = vrot.slane %v356_v62, 3 }
  0x1d   : > { %534 = vrot.lane.b32.xlu0 %v233_v63, %s1258_s18  ;;  %v1401_v7 = vrot.slane %v549_v61, 1  ;;  %v363_v11 = vrot.slane %v361_v4, 2  ;;  %v366_v12 = vrot.slane %v364_v5, 3  ;;  %v284_v14 = vshrl.u32 %v1335_v23, 16 }
  0x1e   : > { %v287_v15 = vshll.u32 %v1335_v23, 16  ;;  %v1412_v20 = vsel %vm307_vm0, %v376_v59, %v1372_v50  ;;  %v359_v24 = vor.u32 %v358_v8, %v355_v1  ;;  %v292_v25 = vshrl.u32 %v1331_v21, 16 }
  0x1f   : > { %v295_v26 = vshll.u32 %v1331_v21, 16  ;;  %v1417_v27 = vor.u32 %v366_v12, %v363_v11  ;;  %v286_v28 = vrot.slane %v284_v14, 2  ;;  %v245_v30 = vunpack.c.l.b16 %v181_v10  ;;  %v1135_v10 = vld [vmem:[%s1299_s17 + $0x28] sm:$0xc] }
  0x20   : > { %v289_v29 = vrot.slane %v287_v15, 3  ;;  %v294_v31 = vrot.slane %v292_v25, 2  ;;  %v261_v33 = vshrl.u32 %v1349_v35, 16  ;;  %v264_v39 = vshll.u32 %v1349_v35, 16 }
  0x21   : > { %237 = vrot.lane.b32.xlu2 %v233_v63, %s1261_s21  ;;  %v297_v32 = vrot.slane %v295_v26, 3  ;;  %v552_v41 = vsel %vm221_vm1, %v547_v6, %v1401_v7  ;;  %v1429_v43 = vpack.c.b16 %v246_v17, %v245_v30  ;;  %v1440_v48 = vsel %vm251_vm2, %v359_v24, %v1417_v27 }
  0x22   : > { %582 = vrot.lane.b32.xlu1 %v1412_v20, %s1262_s22  ;;  %v290_v44 = vor.u32 %v289_v29, %v286_v28  ;;  %v263_v49 = vrot.slane %v261_v33, 2  ;;  %v266_v17 = vrot.slane %v264_v39, 3  ;;  %v680_v58 = vshll.u32 %v1354_v37, 16 }
  0x23   : > { %v1433_v45 = vor.u32 %v297_v32, %v294_v31  ;;  %v253_v46 = vshrl.u32 %v1429_v43, 16  ;;  %v256_v47 = vshll.u32 %v1429_v43, 16  ;;  %v678_v62 = vshrl.u32 %v1354_v37, 16 }
  0x24   : > { %v1447_v61 = vor.u32 %v266_v17, %v263_v49  ;;  %v682_v63 = vrot.slane %v680_v58, 1  ;;  %v684_v8 = vrot.slane %v264_v39, 1  ;;  %v318_v37 = vunpack.c.l.b16 %v1135_v10  ;;  %v669_v17 = vld [vmem:[%s1299_s17 + $0xc] sm:$0x7]  ;;  %v1194_v58 = vld [vmem:[%s1299_s17 + $0x20] sm:$0x7] }
  0x25   : > { %556 = vrot.lane.b32.xlu0 %v552_v41, %s1261_s21  ;;  %v255_v53 = vrot.slane %v253_v46, 2  ;;  %v258_v54 = vrot.slane %v256_v47, 3  ;;  %v299_v59 = vsel %vm251_vm2, %v290_v44, %v1433_v45  ;;  %v332_v15 = vshrl.u32 %v1358_v40, 16  ;;  %v668_v41 = vld [vmem:[%s1299_s17 + $0x4] sm:$0xe] }
  0x26   : > { %v683_v6 = vor.u32 %v682_v63, %v678_v62  ;;  %v1464_v12 = vor.u32 %v684_v8, %v261_v33  ;;  %v321_v14 = vpack.c.b16 %v1216_v36, %v318_v37  ;;  %v335_v29 = vshll.u32 %v1358_v40, 16 }
  0x27   : > { %v259_v60 = vor.u32 %v258_v54, %v255_v53  ;;  %v334_v30 = vrot.slane %v332_v15, 2  ;;  %v234_v33 = vshrl.u32 %v1356_v38, 16  ;;  %v702_v39 = vshll.u32 %v1376_v51, 16  ;;  %v1193_v38 = vld [vmem:[%s1299_s17 + $0x18] sm:$0xe] }
  0x28   : > { %v1458_v11 = vsel %vm221_vm1, %v683_v6, %v684_v8  ;;  %v324_v24 = vshrl.u32 %v321_v14, 16  ;;  %v327_v28 = vshll.u32 %v321_v14, 16  ;;  %v337_v36 = vrot.slane %v335_v29, 3 }
  0x29   : > { %578 = vrot.lane.b32.xlu2 %v1440_v48, %s1263_s23  ;;  %v268_v1 = vsel %vm251_vm2, %v259_v60, %v1447_v61  ;;  %v1478_v44 = vor.u32 %v234_v33, %v1386_v56  ;;  %v715_v49 = vunpack.c.l.b16 %v668_v41  ;;  %v700_v53 = vshrl.u32 %v1376_v51, 16 }
  0x2a   : > { %560 = vrot.lane.b32.xlu1 %v299_v59, %s1264_s24  ;;  %v326_v31 = vrot.slane %v324_v24, 2  ;;  %v329_v32 = vrot.slane %v327_v28, 3  ;;  %v1482_v47 = vor.u32 %v337_v36, %v334_v30  ;;  %v704_v54 = vrot.slane %v702_v39, 1 }
  0x2b   : > { %v1496_v56 = vpack.c.b16 %v247_v18, %v715_v49  ;;  %v706_v62 = vrot.slane %v335_v29, 1  ;;  %v743_v51 = vunpack.c.l.b16 %v1193_v38  ;;  %v744_v63 = vunpack.c.l.b16 %v1194_v58  ;;  %v1537_v58 = vld [vmem:[%s1793_s1 + $0x38] sm:$0xff] }
  0x2c   : > { %v330_v46 = vor.u32 %v329_v32, %v326_v31  ;;  %v705_v60 = vor.u32 %v704_v54, %v700_v53  ;;  %629 = vmatpush.bf16.msra.mxu2 %v1537_v58  ;;  %495 = vmatpush.bf16.msra.mxu0 %v1537_v58 }
  0x2d   : > { %673 = vrot.lane.b32.xlu0 %v1335_v23, %s1258_s18  ;;  %v724_v6 = vshll.u32 %v1496_v56, 16  ;;  %v1506_v10 = vpack.c.b16 %v1220_v9, %v743_v51  ;;  %v746_v13 = vpack.c.b16 %v744_v63, %v744_v63  ;;  %v1514_v2 = vor.u32 %v706_v62, %v332_v15  ;;  %v1583_v51 = vld [vmem:[%s1793_s1 + $0x18] sm:$0xff]  ;;  %v1593_v63 = vld [vmem:[%s1793_s1 + $0x10] sm:$0xff] }
  0x2e   : > { %v1502_v8 = vsel %vm221_vm1, %v705_v60, %v706_v62 }
  0x2f   : > { %v726_v24 = vrot.slane %v724_v6, 7  ;;  %v748_v28 = vshrl.u32 %v1506_v10, 16  ;;  %v751_v29 = vshll.u32 %v1506_v10, 16  ;;  %v756_v30 = vshrl.u32 %v746_v13, 16  ;;  %v1190_v6 = vld [vmem:[%s1299_s17 + $0x3c] sm:$0x8] }
  0x30   : > { %v759_v31 = vshll.u32 %v746_v13, 16  ;;  %v888_v13 = vshrl.u32 %v1333_v22, 16 }
  0x31   : > { %269 = vrot.lane.b32.xlu2 %v268_v1, %s1264_s24  ;;  %v721_v1 = vshrl.u32 %v1496_v56, 16  ;;  %v750_v33 = vrot.slane %v748_v28, 6  ;;  %v753_v39 = vrot.slane %v751_v29, 7  ;;  %v758_v41 = vrot.slane %v756_v30, 6 }
  0x32   : > { %675 = vrot.lane.b32.xlu1 %v1331_v21, %s1258_s18 }
  0x35   : > { %687 = vrot.lane.b32.xlu0 %v1458_v11, %s1261_s21 }
  0x39   : > { %300 = vrot.lane.b32.xlu2 %v299_v59, %s1260_s20  ;;  %v716_v59 = vunpack.c.l.b16 %v669_v17  ;;  %v1521_v17 = vor.u32 %v753_v39, %v750_v33 }
  0x3a   : > { %689 = vrot.lane.b32.xlu1 %v1464_v12, %s1261_s21 }
  0x3d   : > { %691 = vrot.lane.b32.xlu0 %v321_v14, %s1264_s24  ;;  %v723_v14 = vrot.slane %v721_v1, 6  ;;  %v890_v1 = vshll.u32 %v1333_v22, 16 }
  0x3f   : > { %v727_v36 = vor.u32 %v726_v24, %v723_v14 }
  0x41   : > { %311 = vrot.lane.b32.xlu2 %v1384_v55, %s1259_s19  ;;  %v339_v55 = vsel %vm251_vm2, %v330_v46, %v1482_v47  ;;  %v761_v46 = vrot.slane %v759_v31, 7 }
  0x42   : > { %693 = vrot.lane.b32.xlu1 %v1358_v40, %s1264_s24  ;;  %v718_v40 = vpack.c.b16 %v716_v59, %v716_v59  ;;  %v1559_v59 = vld [vmem:[%s1793_s1 + $0x28] sm:$0xff] }
  0x43   : > { %v762_v15 = vor.u32 %v761_v46, %v758_v41 }
  0x44   : > { %v729_v18 = vshrl.u32 %v718_v40, 16  ;;  %v732_v37 = vshll.u32 %v718_v40, 16 }
  0x45   : > { %695 = vrot.lane.b32.xlu0 %v1321_v16, %s1260_s20  ;;  %v1527_v54 = vsel %vm719_vm3, %v1521_v17, %v762_v15 }
  0x46   : > { %v731_v9 = vrot.slane %v729_v18, 6  ;;  %v734_v32 = vrot.slane %v732_v37, 7  ;;  %v892_v18 = vrot.slane %v890_v1, 1  ;;  %v1619_v37 = vld [vmem:[%s1793_s1] sm:$0xff] }
  0x48   : > { %v735_v49 = vor.u32 %v734_v32, %v731_v9  ;;  %v893_v24 = vor.u32 %v892_v18, %v888_v13 }
  0x49   : > { %340 = vrot.lane.b32.xlu2 %v339_v55, %s1263_s23 }
  0x4a   : > { %697 = vrot.lane.b32.xlu1 %v1388_v57, %s1260_s20  ;;  %v736_v53 = vsel %vm719_vm3, %v727_v36, %v735_v49 }
  0x4d   : > { %709 = vrot.lane.b32.xlu0 %v1502_v8, %s1259_s19 }
  0x51   : > { %369 = vrot.lane.b32.xlu2 %v1440_v48, %s1262_s22  ;;  %v553_v48 = vshrl.u32 %v1378_v52, 16  ;;  %v1545_v52 = vld [vmem:[%s1793_s1 + $0x30] sm:$0xff] }
  0x52   : > { %711 = vrot.lane.b32.xlu1 %v1514_v2, %s1259_s19  ;;  %630 = vmatpush.bf16.msra.mxu2 %v1545_v52 }
  0x53   : > { %v555_v38 = vor.u32 %v553_v48, %v1401_v7  ;;  %v1129_v7 = vld [vmem:[%s1299_s17 + $0x44] sm:$0x3]  ;;  %496 = vmatpush.bf16.msra.mxu0 %v1545_v52 }
  0x54   : > { %v211_v55 = vunpack.c.l.b16 %v1129_v7  ;;  %v772_v7 = vrot.slane %v1496_v56, 7 }
  0x55   : > { %737 = vrot.lane.b32.xlu0 %v727_v36, %s1263_s23 }
  0x56   : > { %631 = vmatpush.bf16.msra.mxu2 %v1559_v59  ;;  %v1572_v60 = vpack.c.b16 %v211_v55, %v211_v55 }
  0x57   : > { %497 = vmatpush.bf16.msra.mxu0 %v1559_v59 }
  0x59   : > { %764 = vrot.lane.b32.xlu2 %v1521_v17, %s1262_s22 }
  0x5a   : > { %739 = vrot.lane.b32.xlu1 %v736_v53, %s1263_s23 }
  0x5d   : > { %766 = vrot.lane.b32.xlu0 %v1527_v54, %s1262_s22 }
  0x61   : > { %558 = vrot.lane.b32.xlu2 %v555_v38, %s1261_s21 }
  0x62   : > { %536 = vrot.lane.b32.xlu1 %v1478_v44, %s1258_s18 }
  0x65   : > { %562 = vrot.lane.b32.xlu0 %v1433_v45, %s1264_s24 }
  0x69   : > { %576 = vrot.lane.b32.xlu2 %v572_v34, %s1259_s19  ;;  %v1569_v34 = vld [vmem:[%s1793_s1 + $0x20] sm:$0xff] }
  0x6a   : > { %566 = vrot.lane.b32.xlu1 %v1364_v42, %s1260_s20  ;;  %632 = vmatpush.bf16.msra.mxu2 %v1569_v34 }
  0x6b   : > { %498 = vmatpush.bf16.msra.mxu0 %v1569_v34 }
  0x6d   : > { %580 = vrot.lane.b32.xlu0 %v1417_v27, %s1263_s23 }
  0x6e   : > { %633 = vmatpush.bf16.msra.mxu2 %v1583_v51 }
  0x6f   : > { %499 = vmatpush.bf16.msra.mxu0 %v1583_v51 }
  0x71   : > { %584 = vrot.lane.b32.xlu2 %v1372_v50, %s1262_s22 }
  0x72   : > { %216 = vrot.lane.b32.xlu1 %v1572_v60, %s1258_s18  ;;  %634 = vmatpush.bf16.msra.mxu2 %v1593_v63 }
  0x73   : > { %v1578_v62 = vpop.permute.xlu2 %574  ;;  %500 = vmatpush.bf16.msra.mxu0 %v1593_v63 }
  0x75   : > { %239 = vrot.lane.b32.xlu0 %v1478_v44, %s1261_s21  ;;  %v1605_v44 = vld [vmem:[%s1793_s1 + $0x8] sm:$0xff] }
  0x76   : > { %635 = vmatpush.bf16.msra.mxu2 %v1605_v44 }
  0x77   : > { %501 = vmatpush.bf16.msra.mxu0 %v1605_v44 }
  0x79   : > { %302 = vrot.lane.b32.xlu2 %v1433_v45, %s1260_s20  ;;  %v587_v45 = vunpack.c.l.b16 %v1190_v6 }
  0x7a   : > { %271 = vrot.lane.b32.xlu1 %v1447_v61, %s1264_s24  ;;  %v1212_v61 = vld [vmem:[%s1793_s1 + $0x40] sm:$0xff]  ;;  %636 = vmatpush.bf16.msra.mxu2 %v1619_v37 }
  0x7b   : > { %v1600_v40 = vpop.permute.xlu2 %237  ;;  %v588_v14 = vpack.c.b16 %v210_v3, %v587_v45  ;;  %654 = vmatpush.bf16.msra.mxu3 %v1212_v61  ;;  %502 = vmatpush.bf16.msra.mxu0 %v1619_v37  ;;  %v894_v3 = vrot.slane %v295_v26, 1 }
  0x7c   : > { %520 = vmatpush.bf16.msra.mxu1 %v1212_v61 }
  0x7d   : > { %313 = vrot.lane.b32.xlu0 %v1364_v42, %s1259_s19  ;;  %v589_v22 = vrot.slane %v588_v14, 3  ;;  %v590_v42 = vrot.slane %v1388_v57, 3  ;;  %v896_v26 = vor.u32 %v894_v3, %v292_v25  ;;  %v912_v31 = vshll.u32 %v588_v14, 16 }
  0x7e   : > { %1030 = vmatpush.bf16.msrb.mxu2 %v1212_v61 }
  0x7f   : > { %v591_v29 = vsel %vm307_vm0, %v589_v22, %v590_v42  ;;  %868 = vmatpush.bf16.msrb.mxu3 %v1212_v61  ;;  %1186 = vmatmul.msk.bf16.vlgmr.msra.gmra.mxu1 %vm379_vm4, %v1412_v20  ;;  %v914_v9 = vrot.slane %v912_v31, 1 }
  0x80   : > { %843 = vmatpush.bf16.msrb.mxu1 %v1537_v58  ;;  %1191 = vmatmul.msk.bf16.vlgmr.msra.gmra.mxu3 %vm379_vm4, %v591_v29 }
  0x81   : > { %371 = vrot.lane.b32.xlu2 %v1417_v27, %s1262_s22  ;;  %v895_v27 = vsel %vm221_vm1, %v893_v24, %v894_v3  ;;  %1005 = vmatpush.bf16.msrb.mxu0 %v1537_v58  ;;  %v819_v24 = vshrl.u32 %v772_v7, 16 }
  0x82   : > { %342 = vrot.lane.b32.xlu1 %v1482_v47, %s1263_s23  ;;  %v215_v30 = vpop.permute.xlu0 %214 }
  0x83   : > { %v1631_v28 = vpop.permute.xlu2 %578  ;;  %1231 = vmatpush.bf16.msra.mxu3 %v1212_v61  ;;  %v381_v48 = vsel %vm379_vm4, %v1326_v19, %v215_v30 }
  0x84   : > { %844 = vmatpush.bf16.msrb.mxu1 %v1545_v52 }
  0x85   : > { %883 = vrot.lane.b32.xlu0 %v1458_v11, %s1258_s18  ;;  %1006 = vmatpush.bf16.msrb.mxu0 %v1545_v52  ;;  %v910_v11 = vshrl.u32 %v588_v14, 16 }
  0x87   : > { %v915_v25 = vor.u32 %v914_v9, %v910_v11 }
  0x88   : > { %845 = vmatpush.bf16.msrb.mxu1 %v1559_v59 }
  0x89   : > { %897 = vrot.lane.b32.xlu2 %v895_v27, %s1261_s21  ;;  %1007 = vmatpush.bf16.msrb.mxu0 %v1559_v59 }
  0x8a   : > { %885 = vrot.lane.b32.xlu1 %v1464_v12, %s1258_s18  ;;  %v916_v12 = vrot.slane %v364_v5, 1 }
  0x8b   : > { %v1650_v47 = vpop.permute.xlu2 %269 }
  0x8c   : > { %v565_v20 = vpop.permute.xlu1 %564  ;;  %846 = vmatpush.bf16.msrb.mxu1 %v1569_v34  ;;  %v917_v39 = vsel %vm221_vm1, %v915_v25, %v916_v12  ;;  %v918_v5 = vor.u32 %v916_v12, %v361_v4 }
  0x8d   : > { %899 = vrot.lane.b32.xlu0 %v896_v26, %s1261_s21  ;;  %1008 = vmatpush.bf16.msrb.mxu0 %v1569_v34 }
  0x8f   : > { %v535_v32 = vpop.permute.xlu0 %534  ;;  %1187 = vmatmul.msk.bf16.gmra.mxu1 %vm379_vm4, %v1372_v50 }
  0x90   : > { %847 = vmatpush.bf16.msrb.mxu1 %v1583_v51  ;;  %1192 = vmatmul.msk.bf16.gmra.mxu3 %vm379_vm4, %v590_v42  ;;  %v593_v50 = vsel %vm379_vm4, %v1302_v0, %v535_v32 }
  0x91   : > { %903 = vrot.lane.b32.xlu2 %v1388_v57, %s1264_s24  ;;  %1009 = vmatpush.bf16.msrb.mxu0 %v1583_v51 }
  0x92   : > { %901 = vrot.lane.b32.xlu1 %v1321_v16, %s1264_s24  ;;  %v672_v16 = vld [vmem:[%s1299_s17 + $0xc] sm:$0xf] }
  0x93   : > { %v301_v36 = vpop.permute.xlu2 %300 }
  0x94   : > { %v583_v33 = vpop.permute.xlu1 %582  ;;  %848 = vmatpush.bf16.msrb.mxu1 %v1593_v63 }
  0x95   : > { %905 = vrot.lane.b32.xlu0 %v1502_v8, %s1260_s20  ;;  %1010 = vmatpush.bf16.msrb.mxu0 %v1593_v63  ;;  %v769_v8 = vunpack.c.l.b16 %v672_v16 }
  0x97   : > { %v557_v41 = vpop.permute.xlu0 %556  ;;  %v770_v53 = vpack.c.b16 %v769_v8, %v769_v8 }
  0x98   : > { %849 = vmatpush.bf16.msrb.mxu1 %v1605_v44  ;;  %v598_v49 = vsel %vm385_vm5, %v593_v50, %v557_v41 }
  0x99   : > { %919 = vrot.lane.b32.xlu2 %v917_v39, %s1259_s19  ;;  %1011 = vmatpush.bf16.msrb.mxu0 %v1605_v44 }
  0x9a   : > { %907 = vrot.lane.b32.xlu1 %v1514_v2, %s1260_s20 }
  0x9b   : > { %v312_v46 = vpop.permute.xlu2 %311 }
  0x9c   : > { %v561_v15 = vpop.permute.xlu1 %560  ;;  %850 = vmatpush.bf16.msrb.mxu1 %v1619_v37 }
  0x9d   : > { %921 = vrot.lane.b32.xlu0 %v918_v5, %s1259_s19  ;;  %v602_v57 = vsel %vm390_vm6, %v598_v49, %v561_v15  ;;  %1012 = vmatpush.bf16.msrb.mxu0 %v1619_v37  ;;  %s1233_s19 = smul.u32 12, %s1797_s13 }
  0x9e   : > { %v606_v4 = vsel %vm395_vm7, %v602_v57, %v565_v20 }
  0x9f   : > { %v674_v2 = vpop.permute.xlu0 %673  ;;  %v610_v0 = vsel %vm400_vm9, %v606_v4, %v1578_v62 }
  0xa0   : > { %1223 = vmatpush.bf16.msra.mxu1 %v1537_v58  ;;  %v614_v38 = vsel %vm405_vm8, %v610_v0, %v1631_v28  ;;  %v387_v58 = vsel %vm385_vm5, %v381_v48, %v1600_v40  ;;  %v822_v28 = vshll.u32 %v772_v7, 16  ;;  %v776_v9 = vsel %vm379_vm4, %v1429_v43, %v674_v2 }
  0xa1   : > { %925 = vrot.lane.b32.xlu2 %v1527_v54, %s1263_s23  ;;  %v618_v55 = vsel %vm410_vm10, %v614_v38, %v583_v33  ;;  %v773_v54 = vrot.slane %v770_v53, 7  ;;  %v392_v56 = vsel %vm390_vm6, %v387_v58, %v1650_v47 }
  0xa2   : > { %923 = vrot.lane.b32.xlu1 %v1521_v17, %s1263_s23  ;;  %637 = vmatmul.bf16.vlgmr.msra.gmra.mxu2 %v618_v55  ;;  %v397_v45 = vsel %vm395_vm7, %v392_v56, %v301_v36  ;;  %v824_v27 = vrot.slane %v822_v28, 3  ;;  %v1197_v56 = vld [vmem:[%s1299_s17 + $0x20] sm:$0xf] }
  0xa3   : > { %v341_v1 = vpop.permute.xlu2 %340  ;;  %v774_v6 = vsel %vm771_vm11, %v772_v7, %v773_v54  ;;  %v402_v40 = vsel %vm400_vm9, %v397_v45, %v312_v46 }
  0xa4   : > { %1224 = vmatpush.bf16.msra.mxu1 %v1545_v52  ;;  %v676_v19 = vpop.permute.xlu1 %675  ;;  %v827_v17 = vshrl.u32 %v774_v6, 16  ;;  %v830_v13 = vshll.u32 %v774_v6, 16  ;;  %v407_v18 = vsel %vm405_vm8, %v402_v40, %v341_v1 }
  0xa5   : > { %927 = vrot.lane.b32.xlu0 %v772_v7, %s1262_s22  ;;  %v778_v12 = vsel %vm379_vm4, %v1349_v35, %v676_v19 }
  0xa6   : > { %v829_v14 = vrot.slane %v827_v17, 2  ;;  %v832_v22 = vrot.slane %v830_v13, 3 }
  0xa7   : > { %v688_v62 = vpop.permute.xlu0 %687 }
  0xa8   : > { %1225 = vmatpush.bf16.msra.mxu1 %v1559_v59  ;;  %v833_v3 = vor.u32 %v832_v22, %v829_v14  ;;  %v821_v59 = vrot.slane %v819_v24, 2 }
  0xaa   : > { %929 = vrot.lane.b32.xlu1 %v774_v6, %s1262_s22  ;;  %v825_v30 = vor.u32 %v824_v27, %v821_v59  ;;  %v932_v6 = vunpack.c.l.b16 %v1197_v56  ;;  %s170_s22 = scalar_lea.vmem %s1795_s3, %s1233_s19 }
  0xab   : > { %v370_v52 = vpop.permute.xlu2 %369 }
  0xac   : > { %v412_v61 = vsel %vm410_vm10, %v407_v18, %v370_v52  ;;  %1226 = vmatpush.bf16.msra.mxu1 %v1569_v34  ;;  %v690_v42 = vpop.permute.xlu1 %689  ;;  %v834_v26 = vsel %vm251_vm2, %v825_v30, %v833_v3  ;;  %v933_v14 = vpack.c.b16 %v932_v6, %v932_v6 }
  0xad   : > { %503 = vmatmul.bf16.vlgmr.msra.gmra.mxu0 %v412_v61  ;;  %1195 = vmatmul.msk.bf16.vlgmr.msrb.gmra.mxu3 %vm379_vm4, %v834_v26  ;;  %v782_v39 = vsel %vm385_vm5, %v778_v12, %v690_v42  ;;  %v934_v42 = vrot.slane %v1506_v10, 7 }
  0xae   : > { %v935_v24 = vrot.slane %v933_v14, 7 }
  0xaf   : > { %v692_v29 = vpop.permute.xlu0 %691 }
  0xb0   : > { %1227 = vmatpush.bf16.msra.mxu1 %v1583_v51  ;;  %v780_v51 = vsel %vm385_vm5, %v776_v9, %v688_v62  ;;  %v936_v27 = vsel %vm771_vm11, %v934_v42, %v935_v24 }
  0xb1   : > { %v784_v32 = vsel %vm390_vm6, %v780_v51, %v692_v29  ;;  %v989_v26 = vshrl.u32 %v936_v27, 16 }
  0xb3   : > { %v765_v11 = vpop.permute.xlu2 %764 }
  0xb4   : > { %1228 = vmatpush.bf16.msra.mxu1 %v1593_v63  ;;  %v694_v47 = vpop.permute.xlu1 %693 }
  0xb5   : > { %v786_v41 = vsel %vm390_vm6, %v782_v39, %v694_v47  ;;  %v992_v47 = vshll.u32 %v936_v27, 16 }
  0xb7   : > { %v696_v31 = vpop.permute.xlu0 %695  ;;  %v994_v51 = vrot.slane %v992_v47, 3 }
  0xb8   : > { %1229 = vmatpush.bf16.msra.mxu1 %v1605_v44  ;;  %v788_v63 = vsel %vm395_vm7, %v784_v32, %v696_v31  ;;  %v981_v32 = vshrl.u32 %v934_v42, 16 }
  0xbb   : > { %v559_v43 = vpop.permute.xlu2 %558 }
  0xbc   : > { %1230 = vmatpush.bf16.msra.mxu1 %v1619_v37  ;;  %v698_v34 = vpop.permute.xlu1 %697 }
  0xbd   : > { %1196 = vmatmul.msk.bf16.gmra.mxu3 %vm379_vm4, %v833_v3  ;;  %v790_v16 = vsel %vm395_vm7, %v786_v41, %v698_v34 }
  0xbf   : > { %v710_v20 = vpop.permute.xlu0 %709 }
  0xc0   : > { %v792_v36 = vsel %vm400_vm9, %v788_v63, %v710_v20 }
  0xc3   : > { %v577_v38 = vpop.permute.xlu2 %576 }
  0xc4   : > { %v712_v25 = vpop.permute.xlu1 %711 }
  0xc5   : > { %v794_v50 = vsel %vm400_vm9, %v790_v16, %v712_v25  ;;  %v984_v25 = vshll.u32 %v934_v42, 16 }
  0xc7   : > { %v738_v44 = vpop.permute.xlu0 %737 }
  0xc8   : > { %v796_v37 = vsel %vm405_vm8, %v792_v36, %v738_v44  ;;  %v983_v36 = vrot.slane %v981_v32, 2  ;;  %v986_v44 = vrot.slane %v984_v25, 3 }
  0xc9   : > { %v800_v33 = vsel %vm410_vm10, %v796_v37, %v765_v11  ;;  %v991_v11 = vrot.slane %v989_v26, 2 }
  0xca   : > { %v803_v5 = vshrl.u32 %v800_v33, 16  ;;  %v806_v46 = vshll.u32 %v800_v33, 16 }
  0xcb   : > { %v585_v40 = vpop.permute.xlu2 %584  ;;  %v995_v39 = vor.u32 %v994_v51, %v991_v11 }
  0xcc   : > { %v740_v8 = vpop.permute.xlu1 %739  ;;  %v805_v57 = vrot.slane %v803_v5, 2  ;;  %v808_v4 = vrot.slane %v806_v46, 3 }
  0xcd   : > { %v798_v49 = vsel %vm405_vm8, %v794_v50, %v740_v8  ;;  %1199 = vmatmul.msk.bf16.vlgmr.msra.gmra.mxu3 %vm379_vm4, %v995_v39 }
  0xce   : > { %v809_v7 = vor.u32 %v808_v4, %v805_v57 }
  0xcf   : > { %v767_v15 = vpop.permute.xlu0 %766 }
  0xd0   : > { %v802_v35 = vsel %vm410_vm10, %v798_v49, %v767_v15 }
  0xd1   : > { %v810_v2 = vshrl.u32 %v802_v35, 16  ;;  %v813_v53 = vshll.u32 %v802_v35, 16 }
  0xd3   : > { %v812_v0 = vrot.slane %v810_v2, 2  ;;  %v815_v48 = vrot.slane %v813_v53, 3  ;;  %v303_v59 = vpop.permute.xlu2 %302 }
  0xd4   : > { %v537_v1 = vpop.permute.xlu1 %536 }
  0xd5   : > { %v816_v55 = vor.u32 %v815_v48, %v812_v0  ;;  %v596_v19 = vsel %vm379_vm4, %v1572_v60, %v537_v1  ;;  %v1126_v60 = vld [vmem:[%s1299_s17 + $0x30] sm:$0x3] }
  0xd6   : > { %v600_v62 = vsel %vm385_vm5, %v596_v19, %v559_v43  ;;  %v203_v29 = vunpack.c.l.b16 %v1126_v60  ;;  %v987_v43 = vor.u32 %v986_v44, %v983_v36 }
  0xd7   : > { %v563_v54 = vpop.permute.xlu0 %562  ;;  %v817_v58 = vsel %vm251_vm2, %v809_v7, %v816_v55 }
  0xd8   : > { %851 = vmatmul.bf16.vlgmr.msrb.gmra.mxu1 %v817_v58  ;;  %v604_v45 = vsel %vm390_vm6, %v600_v62, %v563_v54  ;;  %v205_v30 = vpack.c.b16 %v203_v29, %v203_v29  ;;  %v996_v46 = vsel %vm251_vm2, %v987_v43, %v995_v39 }
  0xdb   : > { %v372_v63 = vpop.permute.xlu2 %371 }
  0xdc   : > { %v567_v17 = vpop.permute.xlu1 %566 }
  0xdd   : > { %v608_v13 = vsel %vm395_vm7, %v604_v45, %v567_v17 }
  0xde   : > { %v612_v52 = vsel %vm400_vm9, %v608_v13, %v577_v38 }
  0xdf   : > { %v581_v18 = vpop.permute.xlu0 %580 }
  0xe0   : > { %v616_v61 = vsel %vm405_vm8, %v612_v52, %v581_v18 }
  0xe1   : > { %v621_v22 = vsel %vm410_vm10, %v616_v61, %v585_v40 }
  0xe2   : > { %642 = vmatmul.bf16.gmra.mxu2 %v621_v22 }
  0xe3   : > { %v898_v8 = vpop.permute.xlu2 %897 }
  0xe4   : > { %v217_v28 = vpop.permute.xlu1 %216 }
  0xe5   : > { %v384_v34 = vsel %vm379_vm4, %v205_v30, %v217_v28 }
  0xe7   : > { %v240_v3 = vpop.permute.xlu0 %239 }
  0xe8   : > { %856 = vmatmul.bf16.gmra.mxu1 %v816_v55  ;;  %v389_v9 = vsel %vm385_vm5, %v384_v34, %v240_v3 }
  0xeb   : > { %v904_v35 = vpop.permute.xlu2 %903 }
  0xec   : > { %v272_v31 = vpop.permute.xlu1 %271 }
  0xed   : > { %v394_v10 = vsel %vm390_vm6, %v389_v9, %v272_v31 }
  0xee   : > { %v399_v37 = vsel %vm395_vm7, %v394_v10, %v303_v59 }
  0xef   : > { %v314_v20 = vpop.permute.xlu0 %313 }
  0xf0   : > { %v404_v12 = vsel %vm400_vm9, %v399_v37, %v314_v20 }
  0xf2   : > { %1198 = vmatmul.msk.bf16.vlgmr.msrb.gmra.mxu2 %vm379_vm4, %v996_v46 }
  0xf3   : > { %v920_v7 = vpop.permute.xlu2 %919 }
  0xf4   : > { %v343_v33 = vpop.permute.xlu1 %342 }
  0xf5   : > { %v409_v41 = vsel %vm405_vm8, %v404_v12, %v343_v33 }
  0xf6   : > { %v415_v16 = vsel %vm410_vm10, %v409_v41, %v372_v63 }
  0xf7   : > { %v884_v5 = vpop.permute.xlu0 %883  ;;  %508 = vmatmul.bf16.gmra.mxu0 %v415_v16 }
  0xf8   : > { %v938_v0 = vsel %vm379_vm4, %v1335_v23, %v884_v5 }
  0xf9   : > { %v942_v55 = vsel %vm385_vm5, %v938_v0, %v898_v8 }
  0xfb   : > { %v926_v14 = vpop.permute.xlu2 %925 }
  0xfc   : > { %v886_v50 = vpop.permute.xlu1 %885  ;;  %v522_v2 = vpop.f32.mrf.mxu1 }
  0xfd   : > { %v940_v19 = vsel %vm379_vm4, %v1331_v21, %v886_v50 }
  0xff   : > { %v900_v49 = vpop.permute.xlu0 %899 }
 0x100   : > { %v944_v56 = vsel %vm385_vm5, %v940_v19, %v900_v49 }
 0x101   : > { %v948_v13 = vsel %vm390_vm6, %v944_v56, %v904_v35  ;;  %v1249_v56 = vld [vmem:[%s1794_s2] ss:$0 sm:$0xff] }
 0x103   : > { %v656_v4 = vpop.f32.mrf.mxu3 }
 0x104   : > { %v902_v15 = vpop.permute.xlu1 %901  ;;  %v524_v1 = vpop.f32.mrf.mxu1 }
 0x105   : > { %v946_v54 = vsel %vm390_vm6, %v942_v55, %v902_v15 }
 0x107   : > { %v906_v57 = vpop.permute.xlu0 %905 }
 0x108   : > { %v950_v58 = vsel %vm395_vm7, %v946_v54, %v906_v57 }
 0x109   : > { %v954_v6 = vsel %vm400_vm9, %v950_v58, %v920_v7 }
 0x10b   : > { %v658_v38 = vpop.f32.mrf.mxu3 }
 0x10c   : > { %v908_v53 = vpop.permute.xlu1 %907  ;;  %v527_v52 = vpop.f32.mrf.mxu1 }
 0x10d   : > { %v952_v18 = vsel %vm395_vm7, %v948_v13, %v908_v53 }
 0x10f   : > { %v922_v48 = vpop.permute.xlu0 %921 }
 0x110   : > { %v956_v61 = vsel %vm400_vm9, %v952_v18, %v922_v48 }
 0x111   : > { %v960_v60 = vsel %vm405_vm8, %v956_v61, %v926_v14 }
 0x113   : > { %v661_v17 = vpop.f32.mrf.mxu3 }
 0x114   : > { %v924_v62 = vpop.permute.xlu1 %923  ;;  %v529_v47 = vpop.f32.mrf.mxu1 }
 0x115   : > { %v958_v23 = vsel %vm405_vm8, %v954_v6, %v924_v62 }
 0x117   : > { %v928_v45 = vpop.permute.xlu0 %927 }
 0x118   : > { %v962_v40 = vsel %vm410_vm10, %v958_v23, %v928_v45 }
 0x119   : > { %v965_v21 = vshrl.u32 %v962_v40, 16  ;;  %v968_v22 = vshll.u32 %v962_v40, 16 }
 0x11b   : > { %v967_v28 = vrot.slane %v965_v21, 2  ;;  %v970_v29 = vrot.slane %v968_v22, 3  ;;  %v663_v27 = vpop.f32.mrf.mxu3 }
 0x11c   : > { %v930_v42 = vpop.permute.xlu1 %929 }
 0x11d   : > { %v964_v24 = vsel %vm410_vm10, %v960_v60, %v930_v42  ;;  %v971_v31 = vor.u32 %v970_v29, %v967_v28 }
 0x11e   : > { %v972_v3 = vshrl.u32 %v964_v24, 16  ;;  %v975_v59 = vshll.u32 %v964_v24, 16 }
 0x120   : > { %v974_v30 = vrot.slane %v972_v3, 2  ;;  %v977_v26 = vrot.slane %v975_v59, 3 }
 0x122   : > { %v978_v34 = vor.u32 %v977_v26, %v974_v30 }
 0x124   : > { %1018 = vmatmul.bf16.vlgmr.msra.gmra.mxu1 %v978_v34  ;;  %v979_v20 = vsel %vm251_vm2, %v971_v31, %v978_v34 }
 0x125   : > { %v638_v11 = vpop.f32.mrf.mxu2  ;;  %1013 = vmatmul.bf16.vlgmr.msrb.gmra.mxu0 %v979_v20 }
 0x126   : > { %v657_v9 = vadd.f32 %v656_v4, %v638_v11 }
 0x12a   : > { %v504_v51 = vpop.f32.mrf.mxu0 }
 0x12b   : > { %v523_v10 = vadd.f32 %v522_v2, %v504_v51 }
 0x12d   : > { %v665_v32 = vmax.f32 %v523_v10, %v657_v9  ;;  %v640_v25 = vpop.f32.mrf.mxu2 }
 0x12e   : > { %v659_v63 = vadd.f32 %v658_v38, %v640_v25 }
 0x130   : > { %v870_v12 = vpop.f32.mrf.mxu3 }
 0x132   : > { %v506_v36 = vpop.f32.mrf.mxu0 }
 0x133   : > { %v525_v44 = vadd.f32 %v524_v1, %v506_v36 }
 0x135   : > { %v666_v37 = vmax.f32 %v525_v44, %v659_v63 }
 0x138   : > { %v872_v33 = vpop.f32.mrf.mxu3 }
 0x140   : > { %v875_v43 = vpop.f32.mrf.mxu3 }
 0x148   : > { %v877_v39 = vpop.f32.mrf.mxu3 }
 0x150   : > { %v1037_v53 = vpop.f32.mrf.mxu3 }
 0x155   : > { %v852_v41 = vpop.f32.mrf.mxu1 }
 0x156   : > { %v871_v16 = vadd.f32 %v870_v12, %v852_v41 }
 0x158   : > { %v879_v5 = vmax.f32 %v665_v32, %v871_v16  ;;  %v1039_v0 = vpop.f32.mrf.mxu3 }
 0x15d   : > { %v854_v46 = vpop.f32.mrf.mxu1 }
 0x15e   : > { %v873_v8 = vadd.f32 %v872_v33, %v854_v46 }
 0x160   : > { %v880_v50 = vmax.f32 %v666_v37, %v873_v8 }
 0x165   : > { %v643_v49 = vpop.f32.mrf.mxu2  ;;  %v857_v15 = vpop.f32.mrf.mxu1 }
 0x166   : > { %v662_v38 = vadd.f32 %v661_v17, %v643_v49  ;;  %v876_v55 = vadd.f32 %v875_v43, %v857_v15 }
 0x16d   : > { %v645_v35 = vpop.f32.mrf.mxu2  ;;  %v859_v57 = vpop.f32.mrf.mxu1 }
 0x174   : > { %v509_v4 = vpop.f32.mrf.mxu0 }
 0x175   : > { %v528_v48 = vadd.f32 %v527_v52, %v509_v4  ;;  %v1032_v1 = vpop.f32.mrf.mxu2 }
 0x177   : > { %v667_v7 = vmax.f32 %v528_v48, %v662_v38 }
 0x179   : > { %v881_v58 = vmax.f32 %v667_v7, %v876_v55 }
 0x17c   : > { %v511_v2 = vpop.f32.mrf.mxu0 }
 0x17d   : > { %v1034_v14 = vpop.f32.mrf.mxu2 }
 0x1a1   : > { %v1019_v54 = vpop.f32.mrf.mxu1 }
 0x1a2   : > { %v1038_v19 = vadd.f32 %v1037_v53, %v1019_v54  ;;  %v1014_v62 = vpop.f32.mrf.mxu0 }
 0x1a3   : > { %v1033_v6 = vadd.f32 %v1032_v1, %v1014_v62 }
 0x1a4   : > { %v1043_v23 = vmax.f32 %v881_v58, %v1038_v19 }
 0x1a5   : > { %v1041_v45 = vmax.f32 %v879_v5, %v1033_v6 }
 0x1a6   : > { %v1050_v13 = vadd.f32 %v1249_v56, %v1043_v23 }
 0x1a7   : > { %v1048_v40 = vadd.f32 %v1249_v56, %v1041_v45 }
 0x1a8   : > { %v1053_v18 = vmax.f32 %v1050_v13, 0.0 }
 0x1a9   : > { %v1051_v17 = vmax.f32 %v1048_v40, 0.0  ;;  %v1021_v52 = vpop.f32.mrf.mxu1 }
 0x1aa   : > { %v1056_v61 = vpack.c.bf16 %v1053_v18, %v1053_v18  ;;  %v1016_v21 = vpop.f32.mrf.mxu0 }
 0x1ab   : > { %v1054_v22 = vpack.c.bf16 %v1051_v17, %v1051_v17  ;;  %v1035_v60 = vadd.f32 %v1034_v14, %v1016_v21 }
 0x1ac   : > { %1061 = vst.msk [vmem:[%s170_s22 + $0x8] sm:$0x3] %vm1060_vm12, %v1056_v61 }
 0x1ad   : > { %1058 = vst.msk [vmem:[%s170_s22] sm:$0xf] %vm1057_vm13, %v1054_v22  ;;  %v1042_v42 = vmax.f32 %v880_v50, %v1035_v60 }
 0x1af   : > { %v1049_v24 = vadd.f32 %v1249_v56, %v1042_v42 }
 0x1b1   : > { %v1052_v28 = vmax.f32 %v1049_v24, 0.0 }
 0x1b3   : > { %v1055_v29 = vpack.c.bf16 %v1052_v28, %v1052_v28 }
 0x1b5   : > { %1059 = vst.msk [vmem:[%s170_s22 + $0x4] sm:$0xf] %vm1057_vm13, %v1055_v29 }
 0x1b6 PF: > { %s13_s12 = sadd.s32 1, %s1256_s12  }
 0x1b7   : > { %p10_p4 = scmp.ge.s32.totalorder %s13_s12, 4  }
 0x1b9   :  { %12 = sbr.rel (!%p10_p4) target bundleno = 1 (0x1), region = 65 }

// kernel: simple_cnn_forward.5
= control target key start
LH: loop header
LB: loop body
LE: loop exit
PB: predicated region body
PF: predicated region fallthrough
CT: control target
= control target key end

     0   :  { %10 = vsyncpa [#allocation4], 0  ;;  %s776_s18 = smov 0   ;;  %s851_s0 = inlined_call_operand.vmem [shape: bf16[2,512], index: 0, kind: input, shape index: {}]   ;;  %s852_s1 = inlined_call_operand.vmem [shape: bf16[512,128], index: 1, kind: input, shape index: {}]   ;;  %s853_s2 = inlined_call_operand.vmem [shape: f32[1,128], index: 2, kind: input, shape index: {}]   ;;  %s854_s3 = inlined_call_operand.vmem [shape: bf16[128,3], index: 3, kind: input, shape index: {}]   ;;  %s855_s4 = inlined_call_operand.vmem [shape: f32[1,3], index: 4, kind: input, shape index: {}]   ;;  %s856_s5 = inlined_call_operand.hbm [shape: f32[2,3], index: 5, kind: output, shape index: {}]  }
   0x1 LB: > { %s782_s19 = sadd.s32 4294967295, %s742_s18   ;;  %p556_p0 = scmp.ge.s32.totalorder %s742_s18, 1  ;;  %s742_s18 = sphi %s776_s18, %s16_s18  }
   0x2   : > { %p194_p1 = scmp.lt.s32.totalorder %s742_s18, 3 }
   0x4   : > { %p195_p2 = pnand %p556_p0, %p194_p1 }
   0x5   : > { %s557_s20 = sshll.u32 (!%p195_p2), %s782_s19, 1  ;;  %s558_s21 = sshll.u32 (!%p195_p2), %s782_s19, 5 }
   0x6   : > { %198 = sbr.rel (%p195_p2) target bundleno = 358 (0x166), region = 40  ;;  %p222_p3 = scmp.lt.s32.totalorder (!%p195_p2), %s557_s20, 3 }
   0x7   : > { %p227_p4 = scmp.lt.s32.totalorder (!%p195_p2), %s558_s21, 63  ;;  %p560_p5 = scmp.ne.s32.totalorder (!%p195_p2), %s782_s19, 0 }
   0xb   : > { %s858_s20 = smov (!%p222_p3, %s557_s20), 3  ;;  %s860_s21 = smov (!%p227_p4, %s558_s21), 63 }
   0xc   : > { %s224_s24 = scalar_lea.vmem %s851_s0, %s858_s20  ;;  %s559_s25 = sshll.u32 %s860_s21, 2 }
   0xd   : > { %s794_s28 = scalar_lea.vmem %s852_s1, %s559_s25  ;;  %235 = sbr.rel (%p560_p5) target bundleno = 20 (0x14), region = 44 }
  0x12   : > { %v744_v0 = vmov 0.0  }
  0x13   : > { %236 = vst [vmem:[#allocation2] sm:$0x3] %v744_v0 }
  0x14 PF: > { %v669_v1 = vld [vmem:[%s794_s28 + $0x38] sm:$0xff]  ;;  %v668_v3 = vld [vmem:[%s794_s28 + $0x30] sm:$0xff]  ;;  %v238_v5 = vld [vmem:[%s224_s24] sm:$0x3]  ;;  %p625_p6 = scmp.ne.s32.totalorder %s782_s19, 1 }
  0x15   : > { %v677_v2 = vld [vmem:[%s794_s28 + $0x78] sm:$0xff]  ;;  %373 = vmatpush.bf16.msra.mxu0 %v669_v1  ;;  %v676_v4 = vld [vmem:[%s794_s28 + $0x70] sm:$0xff]  ;;  %v667_v6 = vld [vmem:[%s794_s28 + $0x28] sm:$0xff]  ;;  %272 = vst [vmem:[#allocation1] ss:$9 sm:$0xff] %v238_v5 }
  0x16   : > { %386 = vmatpush.bf16.msra.mxu1 %v677_v2  ;;  %v675_v7 = vld [vmem:[%s794_s28 + $0x68] sm:$0xff]  ;;  %v666_v8 = vld [vmem:[%s794_s28 + $0x20] sm:$0xff]  ;;  %v665_v10 = vld [vmem:[%s794_s28 + $0x18] sm:$0xff] }
  0x17   : > { %v674_v9 = vld [vmem:[%s794_s28 + $0x60] sm:$0xff]  ;;  %v673_v11 = vld [vmem:[%s794_s28 + $0x58] sm:$0xff]  ;;  %v664_v12 = vld [vmem:[%s794_s28 + $0x10] sm:$0xff] }
  0x18   : > { %v672_v13 = vld [vmem:[%s794_s28 + $0x50] sm:$0xff]  ;;  %v663_v14 = vld [vmem:[%s794_s28 + $0x8] sm:$0xff]  ;;  %v662_v16 = vld [vmem:[%s794_s28] sm:$0xff] }
  0x19   : > { %374 = vmatpush.bf16.msra.mxu0 %v668_v3  ;;  %v671_v15 = vld [vmem:[%s794_s28 + $0x48] sm:$0xff]  ;;  %v670_v17 = vld [vmem:[%s794_s28 + $0x40] sm:$0xff] }
  0x1a   : > { %387 = vmatpush.bf16.msra.mxu1 %v676_v4  ;;  %v237_v21 = vld [vmem:[#allocation2] sm:$0x3] }
  0x1c   : > { %v273_v18 = vld [vmem:[#allocation1] sm:$0xff]  ;;  %v274_v19 = vld [vmem:[#allocation1 + $0x9] sm:$0xff] }
  0x1d   : > { %375 = vmatpush.bf16.msra.mxu0 %v667_v6 }
  0x1e   : > { %388 = vmatpush.bf16.msra.mxu1 %v675_v7 }
  0x21   : > { %376 = vmatpush.bf16.msra.mxu0 %v666_v8 }
  0x22   : > { %389 = vmatpush.bf16.msra.mxu1 %v674_v9 }
  0x25   : > { %377 = vmatpush.bf16.msra.mxu0 %v665_v10 }
  0x26   : > { %390 = vmatpush.bf16.msra.mxu1 %v673_v11 }
  0x29   : > { %378 = vmatpush.bf16.msra.mxu0 %v664_v12 }
  0x2a   : > { %391 = vmatpush.bf16.msra.mxu1 %v672_v13 }
  0x2d   : > { %379 = vmatpush.bf16.msra.mxu0 %v663_v14 }
  0x2e   : > { %392 = vmatpush.bf16.msra.mxu1 %v671_v15 }
  0x31   : > { %380 = vmatpush.bf16.msra.mxu0 %v662_v16 }
  0x32   : > { %393 = vmatpush.bf16.msra.mxu1 %v670_v17 }
  0x34   : > { %381 = vmatmul.bf16.vlgmr.msra.gmra.mxu0 %v273_v18 }
  0x35   : > { %394 = vmatmul.bf16.vlgmr.msra.gmra.mxu1 %v274_v19 }
  0xb1   : > { %v382_v20 = vpop.f32.mrf.mxu0 }
  0xb2   : > { %v395_v22 = vpop.f32.mrf.mxu1 }
  0xb3   : > { %v396_v23 = vadd.f32 %v395_v22, %v382_v20 }
  0xb5   : > { %v399_v24 = vadd.f32 %v396_v23, %v237_v21 }
  0xb6   : > { %404 = sbr.rel (%p625_p6) target bundleno = 353 (0x161), region = 48 }
  0xb7   : > { %400 = vst [vmem:[#allocation2] sm:$0x3] %v399_v24 }
  0xb9   : > { %v384_v25 = vpop.f32.mrf.mxu0 }
  0xba   : > { %v397_v26 = vpop.f32.mrf.mxu1 }
  0xbb   : > { %v685_v27 = vld [vmem:[%s854_s3 + $0x38] sm:$0xff]  ;;  %v684_v28 = vld [vmem:[%s854_s3 + $0x30] sm:$0xff]  ;;  %v683_v29 = vld [vmem:[%s854_s3 + $0x28] sm:$0xff]  ;;  %vm494_vm0 = vcmask 17408  }
  0xbc   : > { %481 = vmatpush.bf16.msra.mxu0 %v685_v27  ;;  %v682_v30 = vld [vmem:[%s854_s3 + $0x20] sm:$0xff]  ;;  %v681_v31 = vld [vmem:[%s854_s3 + $0x18] sm:$0xff]  ;;  %v680_v33 = vld [vmem:[%s854_s3 + $0x10] sm:$0xff] }
  0xbd   : > { %v702_v32 = vld [vmem:[%s853_s2] ss:$0 sm:$0xff]  ;;  %v679_v36 = vld [vmem:[%s854_s3 + $0x8] sm:$0xff] }
  0xbe   : > { %v405_v34 = vld [vmem:[#allocation2] sm:$0x3]  ;;  %v678_v38 = vld [vmem:[%s854_s3] sm:$0xff] }
  0xbf   : > { %v410_v35 = vadd.f32 %v702_v32, %v405_v34  ;;  %v703_v40 = vld [vmem:[%s855_s4] ss:$0 sm:$0xff] }
  0xc0   : > { %482 = vmatpush.bf16.msra.mxu0 %v684_v28 }
  0xc1   : > { %v411_v37 = vmax.f32 %v410_v35, 0.0 }
  0xc3   : > { %v412_v39 = vpack.c.bf16 %v411_v37, %v411_v37 }
  0xc4   : > { %483 = vmatpush.bf16.msra.mxu0 %v683_v29 }
  0xc8   : > { %484 = vmatpush.bf16.msra.mxu0 %v682_v30 }
  0xcc   : > { %485 = vmatpush.bf16.msra.mxu0 %v681_v31 }
  0xd0   : > { %486 = vmatpush.bf16.msra.mxu0 %v680_v33 }
  0xd4   : > { %487 = vmatpush.bf16.msra.mxu0 %v679_v36 }
  0xd8   : > { %488 = vmatpush.bf16.msra.mxu0 %v678_v38 }
  0xdb   : > { %489 = vmatmul.bf16.vlgmr.msra.gmra.mxu0 %v412_v39 }
 0x158   : > { %v490_v41 = vpop.f32.mrf.mxu0 }
 0x159   : > { %v491_v42 = vadd.f32 %v703_v40, %v490_v41 }
 0x15b   : > { %495 = vst.msk [vmem:[#allocation3] sm:$0x3] %vm494_vm0, %v491_v42 }
 0x160   : > { %v492_v43 = vpop.f32.mrf.mxu0 }
 0x161 PF: > { %p690_p7 = scmp.eq.s32.totalorder %s782_s19, 1  ;;  %s745_s26 = smov [#allocation3]  }
 0x162   : > { %s502_s27 = sshll.u32 %s745_s26, 4  ;;  %s504_s30 = sshll.u32 %s856_s5, 4  ;;  %s503_s27 = int_to_ptr.vmem [resolvable:$true] %s502_s27  ;;  %s505_s30 = int_to_ptr.hbm [resolvable:$true] %s504_s30 }
 0x163   : > { %687 = dma.vmem_to_hbm [thread:$0]  (%p690_p7), %s503_s27, 32, %s505_s30, [#allocation4]  }
 0x164   : > { %737 = dma.done.wait (%p690_p7), [#allocation4], 32  }
 0x165   : > { %739 = vsyncadd (%p690_p7), [#allocation4], 4294967264 }
 0x166 PF: > { %s16_s18 = sadd.s32 1, %s742_s18  }
 0x167   : > { %p13_p8 = scmp.ge.s32.totalorder %s16_s18, 4  }
 0x169   :  { %15 = sbr.rel (!%p13_p8) target bundleno = 1 (0x1), region = 78 }
 0x16e   :  { %518 = vsyncpa [#allocation4], 1 }
 0x16f   :  { %520 = vsyncpa [#allocation4 + $0x1], 1 }

</bundles_post_ra>
